<compile_context>
chip_gen: v7x
topology: tpu7x:2x2x1
jax: 0.10.0
libtpu: 0.0.40
codegen_flags: <defaults>
</compile_context>

<pallas_src>
import functools

import jax
import jax.numpy as jnp
from jax.experimental import pallas as pl
from jax.experimental.pallas import tpu as pltpu

KSIZE = 7
PAD = (KSIZE - 1) // 2  # 3
C_CHUNK = 8             # stream channels in sublane-sized chunks


def _spatial_gate_kernel(w_ref, b_ref, mask_ref, x_ref, o_ref, *, C, H, W):
    """One batch element per grid step.

    w_ref    : SMEM (2*7*7,)  BN-folded conv weights; index = c*49 + ky*7 + kx
               (c=0 -> channel-max tap, scaled by a; c=1 -> channel-sum tap,
                scaled by a/C so the raw channel sum replaces the mean)
    b_ref    : SMEM (1,)      folded BatchNorm bias
    mask_ref : VMEM (14, H*W) host-precomputed boundary masks
               rows 0..6 = colmask[kx], rows 7..13 = rowmask[ky]
    x_ref    : VMEM (1, C, H*W)  lane-dense view of one image
    o_ref    : VMEM (1, C, H*W)
    """
    HW = H * W

    # ---- ChannelPool: max & sum over C, streamed in <=8-channel chunks ----
    cmax = None
    csum = None
    for c0 in range(0, C, C_CHUNK):
        cs = min(C_CHUNK, C - c0)
        blk = x_ref[0, c0:c0 + cs, :].astype(jnp.float32)      # (cs, HW)
        pmax = jnp.max(blk, axis=0, keepdims=True)             # (1, HW)
        psum = jnp.sum(blk, axis=0, keepdims=True)             # (1, HW)
        if cmax is None:
            cmax, csum = pmax, psum
        else:
            cmax = jnp.maximum(cmax, pmax)
            csum = csum + psum
    # 1/C (mean) and the BN scale are folded into the weights on the host.

    # ---- hoist boundary-mask rows out of the tap loop (stay in vregs) ----
    colmask = [None if k == PAD else mask_ref[k:k + 1, :] for k in range(KSIZE)]
    rowmask = [None if k == PAD else mask_ref[KSIZE + k:KSIZE + k + 1, :]
               for k in range(KSIZE)]

    # ---- 7x7 conv (2 in -> 1 out, zero pad 3): XLU rolls + masked VPU FMAs ----
    # For unmasked positions the flattened index never wraps, so the cyclic
    # roll plus the 0/1 row/col masks reproduce exact zero padding.
    acc = None
    for ky in range(KSIZE):
        dy = ky - PAD
        inner = None                        # per-ky partial accumulator (ILP)
        for kx in range(KSIZE):
            dx = kx - PAD
            shift = (-(dy * W + dx)) % HW   # static lane rotation amount
            w_max = w_ref[ky * KSIZE + kx]
            w_sum = w_ref[KSIZE * KSIZE + ky * KSIZE + kx]
            r_max = pltpu.roll(cmax, shift, axis=1) if shift else cmax
            r_sum = pltpu.roll(csum, shift, axis=1) if shift else csum
            t = w_max * r_max + w_sum * r_sum
            if colmask[kx] is not None:
                t = t * colmask[kx]
            inner = t if inner is None else inner + t
        if rowmask[ky] is not None:
            inner = inner * rowmask[ky]
        acc = inner if acc is None else acc + inner

    # ---- folded BatchNorm (eval) bias + sigmoid ----
    y = acc + b_ref[0]
    # exp goes to the EUP; keep the exact reciprocal to hold 1e-4 tolerance
    # (approx=True would trade a little precision for another EUP slot).
    scale = pl.reciprocal(1.0 + jnp.exp(-y), approx=False)     # (1, HW)

    # ---- gate the input, streamed per channel chunk ----
    for c0 in range(0, C, C_CHUNK):
        cs = min(C_CHUNK, C - c0)
        blk = x_ref[0, c0:c0 + cs, :].astype(jnp.float32)
        o_ref[0, c0:c0 + cs, :] = (blk * scale).astype(o_ref.dtype)


def spatial_gate(x, conv_w, bn_gamma, bn_beta, bn_mean, bn_var, eps=1e-5):
    """x: (N, C, H, W) float32, conv_w: (1, 2, 7, 7)."""
    N, C, H, W = x.shape
    HW = H * W

    # Fold BatchNorm2d(1) (eval) and the 1/C of the channel-mean into the
    # conv weights:  a*(w_max*max + w_mean*mean) + b
    #             = (a*w_max)*max + (a*w_mean/C)*sum + b
    a = (bn_gamma / jnp.sqrt(bn_var + eps)).astype(jnp.float32).reshape(())
    b = (bn_beta - bn_mean * a).astype(jnp.float32).reshape((1,))
    w_max = conv_w[0, 0].astype(jnp.float32) * a            # (7, 7)
    w_sum = conv_w[0, 1].astype(jnp.float32) * (a / C)      # (7, 7)
    w_flat = jnp.concatenate([w_max.reshape(-1), w_sum.reshape(-1)])  # (98,)

    # Boundary 0/1 masks for the flattened-domain conv, built once on the host.
    lane = jnp.arange(HW, dtype=jnp.int32)
    col = lane % W
    row = lane // W
    mask_rows = []
    for k in range(KSIZE):
        d = k - PAD
        mask_rows.append(((col + d >= 0) & (col + d < W)).astype(jnp.float32))
    for k in range(KSIZE):
        d = k - PAD
        mask_rows.append(((row + d >= 0) & (row + d < H)).astype(jnp.float32))
    masks = jnp.stack(mask_rows, axis=0)                     # (14, HW)

    x_flat = x.reshape(N, C, HW)                             # lane-dense view

    kernel = functools.partial(_spatial_gate_kernel, C=C, H=H, W=W)

    out_flat = pl.pallas_call(
        kernel,
        out_shape=jax.ShapeDtypeStruct((N, C, HW), x.dtype),
        grid=(N,),
        in_specs=[
            pl.BlockSpec(memory_space=pltpu.MemorySpace.SMEM),    # folded conv weights
            pl.BlockSpec(memory_space=pltpu.MemorySpace.SMEM),    # folded BN bias
            pl.BlockSpec((2 * KSIZE, HW), lambda n: (0, 0)),      # boundary masks (fetched once)
            pl.BlockSpec((1, C, HW), lambda n: (n, 0, 0)),        # x, lane-dense
        ],
        out_specs=pl.BlockSpec((1, C, HW), lambda n: (n, 0, 0)),
        compiler_params=pltpu.CompilerParams(
            dimension_semantics=("parallel",),
            vmem_limit_bytes=32 * 1024 * 1024,
        ),
    )(w_flat, b, masks, x_flat)

    return out_flat.reshape(N, C, H, W)


def _reference(x, conv_w, bn_gamma, bn_beta, bn_mean, bn_var, eps=1e-5):
    """Pure-JAX reference of SpatialGate.forward (eval-mode BN)."""
    cmax = jnp.max(x, axis=1, keepdims=True)
    cmean = jnp.mean(x, axis=1, keepdims=True)
    pooled = jnp.concatenate([cmax, cmean], axis=1)          # (N, 2, H, W)
    conv = jax.lax.conv_general_dilated(
        pooled, conv_w, window_strides=(1, 1),
        padding=((PAD, PAD), (PAD, PAD)),
        dimension_numbers=("NCHW", "OIHW", "NCHW"))
    y = (conv - bn_mean) / jnp.sqrt(bn_var + eps) * bn_gamma + bn_beta
    scale = jax.nn.sigmoid(y)
    return x * scale


if __name__ == "__main__":
    key = jax.random.PRNGKey(0)
    kx_key, kw_key = jax.random.split(key)

    N, C, H, W = 2, 4, 16, 16
    x = jax.random.normal(kx_key, (N, C, H, W), dtype=jnp.float32)

    # Deterministic synthetic parameters: Conv2d(2, 1, 7, bias=False) +
    # non-trivial BatchNorm2d(1) stats to exercise the folded-BN path.
    conv_w = jax.random.normal(kw_key, (1, 2, KSIZE, KSIZE), dtype=jnp.float32) * 0.1
    bn_gamma = jnp.array(1.2, jnp.float32)
    bn_beta = jnp.array(0.1, jnp.float32)
    bn_mean = jnp.array(0.05, jnp.float32)
    bn_var = jnp.array(0.9, jnp.float32)

    out = spatial_gate(x, conv_w, bn_gamma, bn_beta, bn_mean, bn_var)
    out = jax.block_until_ready(out)

    ref = _reference(x, conv_w, bn_gamma, bn_beta, bn_mean, bn_var)
    assert out.shape == x.shape and out.dtype == x.dtype
    assert jnp.allclose(out, ref, atol=1e-4, rtol=1e-4), "mismatch vs reference"

    print("KERNEL_OK")
</pallas_src>

<mosaic_0001>
module attributes {stable_mosaic.version = 11 : i64} {
  func.func @_spatial_gate_kernel(%arg0: i32, %arg1: memref<98xf32, #tpu.memory_space<smem>>, %arg2: memref<1xf32, #tpu.memory_space<smem>>, %arg3: memref<14x256xf32, #tpu.memory_space<vmem>>, %arg4: memref<1x4x256xf32, #tpu.memory_space<vmem>>, %arg5: memref<1x4x256xf32, #tpu.memory_space<vmem>>) attributes {dimension_semantics = [#tpu.dimension_semantics<parallel>], iteration_bounds = array<i64: 2>, scalar_prefetch = 0 : i64, scratch_operands = 0 : i64, tpu.core_type = #tpu.core_type<tc>, window_params = [{transform_indices = @transform_0, window_bounds = array<i64: 98>}, {transform_indices = @transform_1, window_bounds = array<i64: 1>}, {pipeline_mode = #tpu.pipeline_mode<synchronous>, transform_indices = @transform_2, window_bounds = array<i64: 14, 256>}, {transform_indices = @transform_3, window_bounds = array<i64: 1, 4, 256>}, {transform_indices = @transform_4, window_bounds = array<i64: 1, 4, 256>}]} {
    %c0 = arith.constant 0 : index
    %c0_0 = arith.constant 0 : index
    %c0_1 = arith.constant 0 : index
    %0 = vector.load %arg4[%c0, %c0_0, %c0_1] : memref<1x4x256xf32, #tpu.memory_space<vmem>>, vector<1x4x256xf32>
    %1 = vector.shape_cast %0 : vector<1x4x256xf32> to vector<4x256xf32>
    %cst = arith.constant dense<0xFF800000> : vector<256xf32>
    %2 = vector.multi_reduction <maximumf>, %1, %cst [0] : vector<4x256xf32> to vector<256xf32>
    %3 = vector.shape_cast %2 : vector<256xf32> to vector<1x256xf32>
    %cst_2 = arith.constant dense<0.000000e+00> : vector<256xf32>
    %4 = vector.multi_reduction <add>, %1, %cst_2 [0] : vector<4x256xf32> to vector<256xf32>
    %5 = vector.shape_cast %4 : vector<256xf32> to vector<1x256xf32>
    %c0_3 = arith.constant 0 : index
    %c0_4 = arith.constant 0 : index
    %6 = vector.load %arg3[%c0_3, %c0_4] : memref<14x256xf32, #tpu.memory_space<vmem>>, vector<1x256xf32>
    %c1 = arith.constant 1 : index
    %c0_5 = arith.constant 0 : index
    %7 = vector.load %arg3[%c1, %c0_5] : memref<14x256xf32, #tpu.memory_space<vmem>>, vector<1x256xf32>
    %c2 = arith.constant 2 : index
    %c0_6 = arith.constant 0 : index
    %8 = vector.load %arg3[%c2, %c0_6] : memref<14x256xf32, #tpu.memory_space<vmem>>, vector<1x256xf32>
    %c4 = arith.constant 4 : index
    %c0_7 = arith.constant 0 : index
    %9 = vector.load %arg3[%c4, %c0_7] : memref<14x256xf32, #tpu.memory_space<vmem>>, vector<1x256xf32>
    %c5 = arith.constant 5 : index
    %c0_8 = arith.constant 0 : index
    %10 = vector.load %arg3[%c5, %c0_8] : memref<14x256xf32, #tpu.memory_space<vmem>>, vector<1x256xf32>
    %c6 = arith.constant 6 : index
    %c0_9 = arith.constant 0 : index
    %11 = vector.load %arg3[%c6, %c0_9] : memref<14x256xf32, #tpu.memory_space<vmem>>, vector<1x256xf32>
    %c7 = arith.constant 7 : index
    %c0_10 = arith.constant 0 : index
    %12 = vector.load %arg3[%c7, %c0_10] : memref<14x256xf32, #tpu.memory_space<vmem>>, vector<1x256xf32>
    %c8 = arith.constant 8 : index
    %c0_11 = arith.constant 0 : index
    %13 = vector.load %arg3[%c8, %c0_11] : memref<14x256xf32, #tpu.memory_space<vmem>>, vector<1x256xf32>
    %c9 = arith.constant 9 : index
    %c0_12 = arith.constant 0 : index
    %14 = vector.load %arg3[%c9, %c0_12] : memref<14x256xf32, #tpu.memory_space<vmem>>, vector<1x256xf32>
    %c11 = arith.constant 11 : index
    %c0_13 = arith.constant 0 : index
    %15 = vector.load %arg3[%c11, %c0_13] : memref<14x256xf32, #tpu.memory_space<vmem>>, vector<1x256xf32>
    %c12 = arith.constant 12 : index
    %c0_14 = arith.constant 0 : index
    %16 = vector.load %arg3[%c12, %c0_14] : memref<14x256xf32, #tpu.memory_space<vmem>>, vector<1x256xf32>
    %c13 = arith.constant 13 : index
    %c0_15 = arith.constant 0 : index
    %17 = vector.load %arg3[%c13, %c0_15] : memref<14x256xf32, #tpu.memory_space<vmem>>, vector<1x256xf32>
    %c0_16 = arith.constant 0 : index
    %18 = memref.load %arg1[%c0_16] : memref<98xf32, #tpu.memory_space<smem>>
    %c49 = arith.constant 49 : index
    %19 = memref.load %arg1[%c49] : memref<98xf32, #tpu.memory_space<smem>>
    %c51_i32 = arith.constant 51 : i32
    %20 = tpu.dynamic_rotate %3 by %c51_i32 dim 1 : vector<1x256xf32>, i32 -> vector<1x256xf32>
    %c51_i32_17 = arith.constant 51 : i32
    %21 = tpu.dynamic_rotate %5 by %c51_i32_17 dim 1 : vector<1x256xf32>, i32 -> vector<1x256xf32>
    %22 = vector.broadcast %18 : f32 to vector<1x256xf32>
    %23 = arith.mulf %22, %20 : vector<1x256xf32>
    %24 = vector.broadcast %19 : f32 to vector<1x256xf32>
    %25 = arith.mulf %24, %21 : vector<1x256xf32>
    %26 = arith.addf %23, %25 : vector<1x256xf32>
    %27 = arith.mulf %26, %6 : vector<1x256xf32>
    %c1_18 = arith.constant 1 : index
    %28 = memref.load %arg1[%c1_18] : memref<98xf32, #tpu.memory_space<smem>>
    %c50 = arith.constant 50 : index
    %29 = memref.load %arg1[%c50] : memref<98xf32, #tpu.memory_space<smem>>
    %c50_i32 = arith.constant 50 : i32
    %30 = tpu.dynamic_rotate %3 by %c50_i32 dim 1 : vector<1x256xf32>, i32 -> vector<1x256xf32>
    %c50_i32_19 = arith.constant 50 : i32
    %31 = tpu.dynamic_rotate %5 by %c50_i32_19 dim 1 : vector<1x256xf32>, i32 -> vector<1x256xf32>
    %32 = vector.broadcast %28 : f32 to vector<1x256xf32>
    %33 = arith.mulf %32, %30 : vector<1x256xf32>
    %34 = vector.broadcast %29 : f32 to vector<1x256xf32>
    %35 = arith.mulf %34, %31 : vector<1x256xf32>
    %36 = arith.addf %33, %35 : vector<1x256xf32>
    %37 = arith.mulf %36, %7 : vector<1x256xf32>
    %38 = arith.addf %27, %37 : vector<1x256xf32>
    %c2_20 = arith.constant 2 : index
    %39 = memref.load %arg1[%c2_20] : memref<98xf32, #tpu.memory_space<smem>>
    %c51 = arith.constant 51 : index
    %40 = memref.load %arg1[%c51] : memref<98xf32, #tpu.memory_space<smem>>
    %c49_i32 = arith.constant 49 : i32
    %41 = tpu.dynamic_rotate %3 by %c49_i32 dim 1 : vector<1x256xf32>, i32 -> vector<1x256xf32>
    %c49_i32_21 = arith.constant 49 : i32
    %42 = tpu.dynamic_rotate %5 by %c49_i32_21 dim 1 : vector<1x256xf32>, i32 -> vector<1x256xf32>
    %43 = vector.broadcast %39 : f32 to vector<1x256xf32>
    %44 = arith.mulf %43, %41 : vector<1x256xf32>
    %45 = vector.broadcast %40 : f32 to vector<1x256xf32>
    %46 = arith.mulf %45, %42 : vector<1x256xf32>
    %47 = arith.addf %44, %46 : vector<1x256xf32>
    %48 = arith.mulf %47, %8 : vector<1x256xf32>
    %49 = arith.addf %38, %48 : vector<1x256xf32>
    %c3 = arith.constant 3 : index
    %50 = memref.load %arg1[%c3] : memref<98xf32, #tpu.memory_space<smem>>
    %c52 = arith.constant 52 : index
    %51 = memref.load %arg1[%c52] : memref<98xf32, #tpu.memory_space<smem>>
    %c48_i32 = arith.constant 48 : i32
    %52 = tpu.dynamic_rotate %3 by %c48_i32 dim 1 : vector<1x256xf32>, i32 -> vector<1x256xf32>
    %c48_i32_22 = arith.constant 48 : i32
    %53 = tpu.dynamic_rotate %5 by %c48_i32_22 dim 1 : vector<1x256xf32>, i32 -> vector<1x256xf32>
    %54 = vector.broadcast %50 : f32 to vector<1x256xf32>
    %55 = arith.mulf %54, %52 : vector<1x256xf32>
    %56 = vector.broadcast %51 : f32 to vector<1x256xf32>
    %57 = arith.mulf %56, %53 : vector<1x256xf32>
    %58 = arith.addf %55, %57 : vector<1x256xf32>
    %59 = arith.addf %49, %58 : vector<1x256xf32>
    %c4_23 = arith.constant 4 : index
    %60 = memref.load %arg1[%c4_23] : memref<98xf32, #tpu.memory_space<smem>>
    %c53 = arith.constant 53 : index
    %61 = memref.load %arg1[%c53] : memref<98xf32, #tpu.memory_space<smem>>
    %c47_i32 = arith.constant 47 : i32
    %62 = tpu.dynamic_rotate %3 by %c47_i32 dim 1 : vector<1x256xf32>, i32 -> vector<1x256xf32>
    %c47_i32_24 = arith.constant 47 : i32
    %63 = tpu.dynamic_rotate %5 by %c47_i32_24 dim 1 : vector<1x256xf32>, i32 -> vector<1x256xf32>
    %64 = vector.broadcast %60 : f32 to vector<1x256xf32>
    %65 = arith.mulf %64, %62 : vector<1x256xf32>
    %66 = vector.broadcast %61 : f32 to vector<1x256xf32>
    %67 = arith.mulf %66, %63 : vector<1x256xf32>
    %68 = arith.addf %65, %67 : vector<1x256xf32>
    %69 = arith.mulf %68, %9 : vector<1x256xf32>
    %70 = arith.addf %59, %69 : vector<1x256xf32>
    %c5_25 = arith.constant 5 : index
    %71 = memref.load %arg1[%c5_25] : memref<98xf32, #tpu.memory_space<smem>>
    %c54 = arith.constant 54 : index
    %72 = memref.load %arg1[%c54] : memref<98xf32, #tpu.memory_space<smem>>
    %c46_i32 = arith.constant 46 : i32
    %73 = tpu.dynamic_rotate %3 by %c46_i32 dim 1 : vector<1x256xf32>, i32 -> vector<1x256xf32>
    %c46_i32_26 = arith.constant 46 : i32
    %74 = tpu.dynamic_rotate %5 by %c46_i32_26 dim 1 : vector<1x256xf32>, i32 -> vector<1x256xf32>
    %75 = vector.broadcast %71 : f32 to vector<1x256xf32>
    %76 = arith.mulf %75, %73 : vector<1x256xf32>
    %77 = vector.broadcast %72 : f32 to vector<1x256xf32>
    %78 = arith.mulf %77, %74 : vector<1x256xf32>
    %79 = arith.addf %76, %78 : vector<1x256xf32>
    %80 = arith.mulf %79, %10 : vector<1x256xf32>
    %81 = arith.addf %70, %80 : vector<1x256xf32>
    %c6_27 = arith.constant 6 : index
    %82 = memref.load %arg1[%c6_27] : memref<98xf32, #tpu.memory_space<smem>>
    %c55 = arith.constant 55 : index
    %83 = memref.load %arg1[%c55] : memref<98xf32, #tpu.memory_space<smem>>
    %c45_i32 = arith.constant 45 : i32
    %84 = tpu.dynamic_rotate %3 by %c45_i32 dim 1 : vector<1x256xf32>, i32 -> vector<1x256xf32>
    %c45_i32_28 = arith.constant 45 : i32
    %85 = tpu.dynamic_rotate %5 by %c45_i32_28 dim 1 : vector<1x256xf32>, i32 -> vector<1x256xf32>
    %86 = vector.broadcast %82 : f32 to vector<1x256xf32>
    %87 = arith.mulf %86, %84 : vector<1x256xf32>
    %88 = vector.broadcast %83 : f32 to vector<1x256xf32>
    %89 = arith.mulf %88, %85 : vector<1x256xf32>
    %90 = arith.addf %87, %89 : vector<1x256xf32>
    %91 = arith.mulf %90, %11 : vector<1x256xf32>
    %92 = arith.addf %81, %91 : vector<1x256xf32>
    %93 = arith.mulf %92, %12 : vector<1x256xf32>
    %c7_29 = arith.constant 7 : index
    %94 = memref.load %arg1[%c7_29] : memref<98xf32, #tpu.memory_space<smem>>
    %c56 = arith.constant 56 : index
    %95 = memref.load %arg1[%c56] : memref<98xf32, #tpu.memory_space<smem>>
    %c35_i32 = arith.constant 35 : i32
    %96 = tpu.dynamic_rotate %3 by %c35_i32 dim 1 : vector<1x256xf32>, i32 -> vector<1x256xf32>
    %c35_i32_30 = arith.constant 35 : i32
    %97 = tpu.dynamic_rotate %5 by %c35_i32_30 dim 1 : vector<1x256xf32>, i32 -> vector<1x256xf32>
    %98 = vector.broadcast %94 : f32 to vector<1x256xf32>
    %99 = arith.mulf %98, %96 : vector<1x256xf32>
    %100 = vector.broadcast %95 : f32 to vector<1x256xf32>
    %101 = arith.mulf %100, %97 : vector<1x256xf32>
    %102 = arith.addf %99, %101 : vector<1x256xf32>
    %103 = arith.mulf %102, %6 : vector<1x256xf32>
    %c8_31 = arith.constant 8 : index
    %104 = memref.load %arg1[%c8_31] : memref<98xf32, #tpu.memory_space<smem>>
    %c57 = arith.constant 57 : index
    %105 = memref.load %arg1[%c57] : memref<98xf32, #tpu.memory_space<smem>>
    %c34_i32 = arith.constant 34 : i32
    %106 = tpu.dynamic_rotate %3 by %c34_i32 dim 1 : vector<1x256xf32>, i32 -> vector<1x256xf32>
    %c34_i32_32 = arith.constant 34 : i32
    %107 = tpu.dynamic_rotate %5 by %c34_i32_32 dim 1 : vector<1x256xf32>, i32 -> vector<1x256xf32>
    %108 = vector.broadcast %104 : f32 to vector<1x256xf32>
    %109 = arith.mulf %108, %106 : vector<1x256xf32>
    %110 = vector.broadcast %105 : f32 to vector<1x256xf32>
    %111 = arith.mulf %110, %107 : vector<1x256xf32>
    %112 = arith.addf %109, %111 : vector<1x256xf32>
    %113 = arith.mulf %112, %7 : vector<1x256xf32>
    %114 = arith.addf %103, %113 : vector<1x256xf32>
    %c9_33 = arith.constant 9 : index
    %115 = memref.load %arg1[%c9_33] : memref<98xf32, #tpu.memory_space<smem>>
    %c58 = arith.constant 58 : index
    %116 = memref.load %arg1[%c58] : memref<98xf32, #tpu.memory_space<smem>>
    %c33_i32 = arith.constant 33 : i32
    %117 = tpu.dynamic_rotate %3 by %c33_i32 dim 1 : vector<1x256xf32>, i32 -> vector<1x256xf32>
    %c33_i32_34 = arith.constant 33 : i32
    %118 = tpu.dynamic_rotate %5 by %c33_i32_34 dim 1 : vector<1x256xf32>, i32 -> vector<1x256xf32>
    %119 = vector.broadcast %115 : f32 to vector<1x256xf32>
    %120 = arith.mulf %119, %117 : vector<1x256xf32>
    %121 = vector.broadcast %116 : f32 to vector<1x256xf32>
    %122 = arith.mulf %121, %118 : vector<1x256xf32>
    %123 = arith.addf %120, %122 : vector<1x256xf32>
    %124 = arith.mulf %123, %8 : vector<1x256xf32>
    %125 = arith.addf %114, %124 : vector<1x256xf32>
    %c10 = arith.constant 10 : index
    %126 = memref.load %arg1[%c10] : memref<98xf32, #tpu.memory_space<smem>>
    %c59 = arith.constant 59 : index
    %127 = memref.load %arg1[%c59] : memref<98xf32, #tpu.memory_space<smem>>
    %c32_i32 = arith.constant 32 : i32
    %128 = tpu.dynamic_rotate %3 by %c32_i32 dim 1 : vector<1x256xf32>, i32 -> vector<1x256xf32>
    %c32_i32_35 = arith.constant 32 : i32
    %129 = tpu.dynamic_rotate %5 by %c32_i32_35 dim 1 : vector<1x256xf32>, i32 -> vector<1x256xf32>
    %130 = vector.broadcast %126 : f32 to vector<1x256xf32>
    %131 = arith.mulf %130, %128 : vector<1x256xf32>
    %132 = vector.broadcast %127 : f32 to vector<1x256xf32>
    %133 = arith.mulf %132, %129 : vector<1x256xf32>
    %134 = arith.addf %131, %133 : vector<1x256xf32>
    %135 = arith.addf %125, %134 : vector<1x256xf32>
    %c11_36 = arith.constant 11 : index
    %136 = memref.load %arg1[%c11_36] : memref<98xf32, #tpu.memory_space<smem>>
    %c60 = arith.constant 60 : index
    %137 = memref.load %arg1[%c60] : memref<98xf32, #tpu.memory_space<smem>>
    %c31_i32 = arith.constant 31 : i32
    %138 = tpu.dynamic_rotate %3 by %c31_i32 dim 1 : vector<1x256xf32>, i32 -> vector<1x256xf32>
    %c31_i32_37 = arith.constant 31 : i32
    %139 = tpu.dynamic_rotate %5 by %c31_i32_37 dim 1 : vector<1x256xf32>, i32 -> vector<1x256xf32>
    %140 = vector.broadcast %136 : f32 to vector<1x256xf32>
    %141 = arith.mulf %140, %138 : vector<1x256xf32>
    %142 = vector.broadcast %137 : f32 to vector<1x256xf32>
    %143 = arith.mulf %142, %139 : vector<1x256xf32>
    %144 = arith.addf %141, %143 : vector<1x256xf32>
    %145 = arith.mulf %144, %9 : vector<1x256xf32>
    %146 = arith.addf %135, %145 : vector<1x256xf32>
    %c12_38 = arith.constant 12 : index
    %147 = memref.load %arg1[%c12_38] : memref<98xf32, #tpu.memory_space<smem>>
    %c61 = arith.constant 61 : index
    %148 = memref.load %arg1[%c61] : memref<98xf32, #tpu.memory_space<smem>>
    %c30_i32 = arith.constant 30 : i32
    %149 = tpu.dynamic_rotate %3 by %c30_i32 dim 1 : vector<1x256xf32>, i32 -> vector<1x256xf32>
    %c30_i32_39 = arith.constant 30 : i32
    %150 = tpu.dynamic_rotate %5 by %c30_i32_39 dim 1 : vector<1x256xf32>, i32 -> vector<1x256xf32>
    %151 = vector.broadcast %147 : f32 to vector<1x256xf32>
    %152 = arith.mulf %151, %149 : vector<1x256xf32>
    %153 = vector.broadcast %148 : f32 to vector<1x256xf32>
    %154 = arith.mulf %153, %150 : vector<1x256xf32>
    %155 = arith.addf %152, %154 : vector<1x256xf32>
    %156 = arith.mulf %155, %10 : vector<1x256xf32>
    %157 = arith.addf %146, %156 : vector<1x256xf32>
    %c13_40 = arith.constant 13 : index
    %158 = memref.load %arg1[%c13_40] : memref<98xf32, #tpu.memory_space<smem>>
    %c62 = arith.constant 62 : index
    %159 = memref.load %arg1[%c62] : memref<98xf32, #tpu.memory_space<smem>>
    %c29_i32 = arith.constant 29 : i32
    %160 = tpu.dynamic_rotate %3 by %c29_i32 dim 1 : vector<1x256xf32>, i32 -> vector<1x256xf32>
    %c29_i32_41 = arith.constant 29 : i32
    %161 = tpu.dynamic_rotate %5 by %c29_i32_41 dim 1 : vector<1x256xf32>, i32 -> vector<1x256xf32>
    %162 = vector.broadcast %158 : f32 to vector<1x256xf32>
    %163 = arith.mulf %162, %160 : vector<1x256xf32>
    %164 = vector.broadcast %159 : f32 to vector<1x256xf32>
    %165 = arith.mulf %164, %161 : vector<1x256xf32>
    %166 = arith.addf %163, %165 : vector<1x256xf32>
    %167 = arith.mulf %166, %11 : vector<1x256xf32>
    %168 = arith.addf %157, %167 : vector<1x256xf32>
    %169 = arith.mulf %168, %13 : vector<1x256xf32>
    %170 = arith.addf %93, %169 : vector<1x256xf32>
    %c14 = arith.constant 14 : index
    %171 = memref.load %arg1[%c14] : memref<98xf32, #tpu.memory_space<smem>>
    %c63 = arith.constant 63 : index
    %172 = memref.load %arg1[%c63] : memref<98xf32, #tpu.memory_space<smem>>
    %c19_i32 = arith.constant 19 : i32
    %173 = tpu.dynamic_rotate %3 by %c19_i32 dim 1 : vector<1x256xf32>, i32 -> vector<1x256xf32>
    %c19_i32_42 = arith.constant 19 : i32
    %174 = tpu.dynamic_rotate %5 by %c19_i32_42 dim 1 : vector<1x256xf32>, i32 -> vector<1x256xf32>
    %175 = vector.broadcast %171 : f32 to vector<1x256xf32>
    %176 = arith.mulf %175, %173 : vector<1x256xf32>
    %177 = vector.broadcast %172 : f32 to vector<1x256xf32>
    %178 = arith.mulf %177, %174 : vector<1x256xf32>
    %179 = arith.addf %176, %178 : vector<1x256xf32>
    %180 = arith.mulf %179, %6 : vector<1x256xf32>
    %c15 = arith.constant 15 : index
    %181 = memref.load %arg1[%c15] : memref<98xf32, #tpu.memory_space<smem>>
    %c64 = arith.constant 64 : index
    %182 = memref.load %arg1[%c64] : memref<98xf32, #tpu.memory_space<smem>>
    %c18_i32 = arith.constant 18 : i32
    %183 = tpu.dynamic_rotate %3 by %c18_i32 dim 1 : vector<1x256xf32>, i32 -> vector<1x256xf32>
    %c18_i32_43 = arith.constant 18 : i32
    %184 = tpu.dynamic_rotate %5 by %c18_i32_43 dim 1 : vector<1x256xf32>, i32 -> vector<1x256xf32>
    %185 = vector.broadcast %181 : f32 to vector<1x256xf32>
    %186 = arith.mulf %185, %183 : vector<1x256xf32>
    %187 = vector.broadcast %182 : f32 to vector<1x256xf32>
    %188 = arith.mulf %187, %184 : vector<1x256xf32>
    %189 = arith.addf %186, %188 : vector<1x256xf32>
    %190 = arith.mulf %189, %7 : vector<1x256xf32>
    %191 = arith.addf %180, %190 : vector<1x256xf32>
    %c16 = arith.constant 16 : index
    %192 = memref.load %arg1[%c16] : memref<98xf32, #tpu.memory_space<smem>>
    %c65 = arith.constant 65 : index
    %193 = memref.load %arg1[%c65] : memref<98xf32, #tpu.memory_space<smem>>
    %c17_i32 = arith.constant 17 : i32
    %194 = tpu.dynamic_rotate %3 by %c17_i32 dim 1 : vector<1x256xf32>, i32 -> vector<1x256xf32>
    %c17_i32_44 = arith.constant 17 : i32
    %195 = tpu.dynamic_rotate %5 by %c17_i32_44 dim 1 : vector<1x256xf32>, i32 -> vector<1x256xf32>
    %196 = vector.broadcast %192 : f32 to vector<1x256xf32>
    %197 = arith.mulf %196, %194 : vector<1x256xf32>
    %198 = vector.broadcast %193 : f32 to vector<1x256xf32>
    %199 = arith.mulf %198, %195 : vector<1x256xf32>
    %200 = arith.addf %197, %199 : vector<1x256xf32>
    %201 = arith.mulf %200, %8 : vector<1x256xf32>
    %202 = arith.addf %191, %201 : vector<1x256xf32>
    %c17 = arith.constant 17 : index
    %203 = memref.load %arg1[%c17] : memref<98xf32, #tpu.memory_space<smem>>
    %c66 = arith.constant 66 : index
    %204 = memref.load %arg1[%c66] : memref<98xf32, #tpu.memory_space<smem>>
    %c16_i32 = arith.constant 16 : i32
    %205 = tpu.dynamic_rotate %3 by %c16_i32 dim 1 : vector<1x256xf32>, i32 -> vector<1x256xf32>
    %c16_i32_45 = arith.constant 16 : i32
    %206 = tpu.dynamic_rotate %5 by %c16_i32_45 dim 1 : vector<1x256xf32>, i32 -> vector<1x256xf32>
    %207 = vector.broadcast %203 : f32 to vector<1x256xf32>
    %208 = arith.mulf %207, %205 : vector<1x256xf32>
    %209 = vector.broadcast %204 : f32 to vector<1x256xf32>
    %210 = arith.mulf %209, %206 : vector<1x256xf32>
    %211 = arith.addf %208, %210 : vector<1x256xf32>
    %212 = arith.addf %202, %211 : vector<1x256xf32>
    %c18 = arith.constant 18 : index
    %213 = memref.load %arg1[%c18] : memref<98xf32, #tpu.memory_space<smem>>
    %c67 = arith.constant 67 : index
    %214 = memref.load %arg1[%c67] : memref<98xf32, #tpu.memory_space<smem>>
    %c15_i32 = arith.constant 15 : i32
    %215 = tpu.dynamic_rotate %3 by %c15_i32 dim 1 : vector<1x256xf32>, i32 -> vector<1x256xf32>
    %c15_i32_46 = arith.constant 15 : i32
    %216 = tpu.dynamic_rotate %5 by %c15_i32_46 dim 1 : vector<1x256xf32>, i32 -> vector<1x256xf32>
    %217 = vector.broadcast %213 : f32 to vector<1x256xf32>
    %218 = arith.mulf %217, %215 : vector<1x256xf32>
    %219 = vector.broadcast %214 : f32 to vector<1x256xf32>
    %220 = arith.mulf %219, %216 : vector<1x256xf32>
    %221 = arith.addf %218, %220 : vector<1x256xf32>
    %222 = arith.mulf %221, %9 : vector<1x256xf32>
    %223 = arith.addf %212, %222 : vector<1x256xf32>
    %c19 = arith.constant 19 : index
    %224 = memref.load %arg1[%c19] : memref<98xf32, #tpu.memory_space<smem>>
    %c68 = arith.constant 68 : index
    %225 = memref.load %arg1[%c68] : memref<98xf32, #tpu.memory_space<smem>>
    %c14_i32 = arith.constant 14 : i32
    %226 = tpu.dynamic_rotate %3 by %c14_i32 dim 1 : vector<1x256xf32>, i32 -> vector<1x256xf32>
    %c14_i32_47 = arith.constant 14 : i32
    %227 = tpu.dynamic_rotate %5 by %c14_i32_47 dim 1 : vector<1x256xf32>, i32 -> vector<1x256xf32>
    %228 = vector.broadcast %224 : f32 to vector<1x256xf32>
    %229 = arith.mulf %228, %226 : vector<1x256xf32>
    %230 = vector.broadcast %225 : f32 to vector<1x256xf32>
    %231 = arith.mulf %230, %227 : vector<1x256xf32>
    %232 = arith.addf %229, %231 : vector<1x256xf32>
    %233 = arith.mulf %232, %10 : vector<1x256xf32>
    %234 = arith.addf %223, %233 : vector<1x256xf32>
    %c20 = arith.constant 20 : index
    %235 = memref.load %arg1[%c20] : memref<98xf32, #tpu.memory_space<smem>>
    %c69 = arith.constant 69 : index
    %236 = memref.load %arg1[%c69] : memref<98xf32, #tpu.memory_space<smem>>
    %c13_i32 = arith.constant 13 : i32
    %237 = tpu.dynamic_rotate %3 by %c13_i32 dim 1 : vector<1x256xf32>, i32 -> vector<1x256xf32>
    %c13_i32_48 = arith.constant 13 : i32
    %238 = tpu.dynamic_rotate %5 by %c13_i32_48 dim 1 : vector<1x256xf32>, i32 -> vector<1x256xf32>
    %239 = vector.broadcast %235 : f32 to vector<1x256xf32>
    %240 = arith.mulf %239, %237 : vector<1x256xf32>
    %241 = vector.broadcast %236 : f32 to vector<1x256xf32>
    %242 = arith.mulf %241, %238 : vector<1x256xf32>
    %243 = arith.addf %240, %242 : vector<1x256xf32>
    %244 = arith.mulf %243, %11 : vector<1x256xf32>
    %245 = arith.addf %234, %244 : vector<1x256xf32>
    %246 = arith.mulf %245, %14 : vector<1x256xf32>
    %247 = arith.addf %170, %246 : vector<1x256xf32>
    %c21 = arith.constant 21 : index
    %248 = memref.load %arg1[%c21] : memref<98xf32, #tpu.memory_space<smem>>
    %c70 = arith.constant 70 : index
    %249 = memref.load %arg1[%c70] : memref<98xf32, #tpu.memory_space<smem>>
    %c3_i32 = arith.constant 3 : i32
    %250 = tpu.dynamic_rotate %3 by %c3_i32 dim 1 : vector<1x256xf32>, i32 -> vector<1x256xf32>
    %c3_i32_49 = arith.constant 3 : i32
    %251 = tpu.dynamic_rotate %5 by %c3_i32_49 dim 1 : vector<1x256xf32>, i32 -> vector<1x256xf32>
    %252 = vector.broadcast %248 : f32 to vector<1x256xf32>
    %253 = arith.mulf %252, %250 : vector<1x256xf32>
    %254 = vector.broadcast %249 : f32 to vector<1x256xf32>
    %255 = arith.mulf %254, %251 : vector<1x256xf32>
    %256 = arith.addf %253, %255 : vector<1x256xf32>
    %257 = arith.mulf %256, %6 : vector<1x256xf32>
    %c22 = arith.constant 22 : index
    %258 = memref.load %arg1[%c22] : memref<98xf32, #tpu.memory_space<smem>>
    %c71 = arith.constant 71 : index
    %259 = memref.load %arg1[%c71] : memref<98xf32, #tpu.memory_space<smem>>
    %c2_i32 = arith.constant 2 : i32
    %260 = tpu.dynamic_rotate %3 by %c2_i32 dim 1 : vector<1x256xf32>, i32 -> vector<1x256xf32>
    %c2_i32_50 = arith.constant 2 : i32
    %261 = tpu.dynamic_rotate %5 by %c2_i32_50 dim 1 : vector<1x256xf32>, i32 -> vector<1x256xf32>
    %262 = vector.broadcast %258 : f32 to vector<1x256xf32>
    %263 = arith.mulf %262, %260 : vector<1x256xf32>
    %264 = vector.broadcast %259 : f32 to vector<1x256xf32>
    %265 = arith.mulf %264, %261 : vector<1x256xf32>
    %266 = arith.addf %263, %265 : vector<1x256xf32>
    %267 = arith.mulf %266, %7 : vector<1x256xf32>
    %268 = arith.addf %257, %267 : vector<1x256xf32>
    %c23 = arith.constant 23 : index
    %269 = memref.load %arg1[%c23] : memref<98xf32, #tpu.memory_space<smem>>
    %c72 = arith.constant 72 : index
    %270 = memref.load %arg1[%c72] : memref<98xf32, #tpu.memory_space<smem>>
    %c1_i32 = arith.constant 1 : i32
    %271 = tpu.dynamic_rotate %3 by %c1_i32 dim 1 : vector<1x256xf32>, i32 -> vector<1x256xf32>
    %c1_i32_51 = arith.constant 1 : i32
    %272 = tpu.dynamic_rotate %5 by %c1_i32_51 dim 1 : vector<1x256xf32>, i32 -> vector<1x256xf32>
    %273 = vector.broadcast %269 : f32 to vector<1x256xf32>
    %274 = arith.mulf %273, %271 : vector<1x256xf32>
    %275 = vector.broadcast %270 : f32 to vector<1x256xf32>
    %276 = arith.mulf %275, %272 : vector<1x256xf32>
    %277 = arith.addf %274, %276 : vector<1x256xf32>
    %278 = arith.mulf %277, %8 : vector<1x256xf32>
    %279 = arith.addf %268, %278 : vector<1x256xf32>
    %c24 = arith.constant 24 : index
    %280 = memref.load %arg1[%c24] : memref<98xf32, #tpu.memory_space<smem>>
    %c73 = arith.constant 73 : index
    %281 = memref.load %arg1[%c73] : memref<98xf32, #tpu.memory_space<smem>>
    %282 = vector.broadcast %280 : f32 to vector<1x256xf32>
    %283 = arith.mulf %282, %3 : vector<1x256xf32>
    %284 = vector.broadcast %281 : f32 to vector<1x256xf32>
    %285 = arith.mulf %284, %5 : vector<1x256xf32>
    %286 = arith.addf %283, %285 : vector<1x256xf32>
    %287 = arith.addf %279, %286 : vector<1x256xf32>
    %c25 = arith.constant 25 : index
    %288 = memref.load %arg1[%c25] : memref<98xf32, #tpu.memory_space<smem>>
    %c74 = arith.constant 74 : index
    %289 = memref.load %arg1[%c74] : memref<98xf32, #tpu.memory_space<smem>>
    %c255_i32 = arith.constant 255 : i32
    %290 = tpu.dynamic_rotate %3 by %c255_i32 dim 1 : vector<1x256xf32>, i32 -> vector<1x256xf32>
    %c255_i32_52 = arith.constant 255 : i32
    %291 = tpu.dynamic_rotate %5 by %c255_i32_52 dim 1 : vector<1x256xf32>, i32 -> vector<1x256xf32>
    %292 = vector.broadcast %288 : f32 to vector<1x256xf32>
    %293 = arith.mulf %292, %290 : vector<1x256xf32>
    %294 = vector.broadcast %289 : f32 to vector<1x256xf32>
    %295 = arith.mulf %294, %291 : vector<1x256xf32>
    %296 = arith.addf %293, %295 : vector<1x256xf32>
    %297 = arith.mulf %296, %9 : vector<1x256xf32>
    %298 = arith.addf %287, %297 : vector<1x256xf32>
    %c26 = arith.constant 26 : index
    %299 = memref.load %arg1[%c26] : memref<98xf32, #tpu.memory_space<smem>>
    %c75 = arith.constant 75 : index
    %300 = memref.load %arg1[%c75] : memref<98xf32, #tpu.memory_space<smem>>
    %c254_i32 = arith.constant 254 : i32
    %301 = tpu.dynamic_rotate %3 by %c254_i32 dim 1 : vector<1x256xf32>, i32 -> vector<1x256xf32>
    %c254_i32_53 = arith.constant 254 : i32
    %302 = tpu.dynamic_rotate %5 by %c254_i32_53 dim 1 : vector<1x256xf32>, i32 -> vector<1x256xf32>
    %303 = vector.broadcast %299 : f32 to vector<1x256xf32>
    %304 = arith.mulf %303, %301 : vector<1x256xf32>
    %305 = vector.broadcast %300 : f32 to vector<1x256xf32>
    %306 = arith.mulf %305, %302 : vector<1x256xf32>
    %307 = arith.addf %304, %306 : vector<1x256xf32>
    %308 = arith.mulf %307, %10 : vector<1x256xf32>
    %309 = arith.addf %298, %308 : vector<1x256xf32>
    %c27 = arith.constant 27 : index
    %310 = memref.load %arg1[%c27] : memref<98xf32, #tpu.memory_space<smem>>
    %c76 = arith.constant 76 : index
    %311 = memref.load %arg1[%c76] : memref<98xf32, #tpu.memory_space<smem>>
    %c253_i32 = arith.constant 253 : i32
    %312 = tpu.dynamic_rotate %3 by %c253_i32 dim 1 : vector<1x256xf32>, i32 -> vector<1x256xf32>
    %c253_i32_54 = arith.constant 253 : i32
    %313 = tpu.dynamic_rotate %5 by %c253_i32_54 dim 1 : vector<1x256xf32>, i32 -> vector<1x256xf32>
    %314 = vector.broadcast %310 : f32 to vector<1x256xf32>
    %315 = arith.mulf %314, %312 : vector<1x256xf32>
    %316 = vector.broadcast %311 : f32 to vector<1x256xf32>
    %317 = arith.mulf %316, %313 : vector<1x256xf32>
    %318 = arith.addf %315, %317 : vector<1x256xf32>
    %319 = arith.mulf %318, %11 : vector<1x256xf32>
    %320 = arith.addf %309, %319 : vector<1x256xf32>
    %321 = arith.addf %247, %320 : vector<1x256xf32>
    %c28 = arith.constant 28 : index
    %322 = memref.load %arg1[%c28] : memref<98xf32, #tpu.memory_space<smem>>
    %c77 = arith.constant 77 : index
    %323 = memref.load %arg1[%c77] : memref<98xf32, #tpu.memory_space<smem>>
    %c243_i32 = arith.constant 243 : i32
    %324 = tpu.dynamic_rotate %3 by %c243_i32 dim 1 : vector<1x256xf32>, i32 -> vector<1x256xf32>
    %c243_i32_55 = arith.constant 243 : i32
    %325 = tpu.dynamic_rotate %5 by %c243_i32_55 dim 1 : vector<1x256xf32>, i32 -> vector<1x256xf32>
    %326 = vector.broadcast %322 : f32 to vector<1x256xf32>
    %327 = arith.mulf %326, %324 : vector<1x256xf32>
    %328 = vector.broadcast %323 : f32 to vector<1x256xf32>
    %329 = arith.mulf %328, %325 : vector<1x256xf32>
    %330 = arith.addf %327, %329 : vector<1x256xf32>
    %331 = arith.mulf %330, %6 : vector<1x256xf32>
    %c29 = arith.constant 29 : index
    %332 = memref.load %arg1[%c29] : memref<98xf32, #tpu.memory_space<smem>>
    %c78 = arith.constant 78 : index
    %333 = memref.load %arg1[%c78] : memref<98xf32, #tpu.memory_space<smem>>
    %c242_i32 = arith.constant 242 : i32
    %334 = tpu.dynamic_rotate %3 by %c242_i32 dim 1 : vector<1x256xf32>, i32 -> vector<1x256xf32>
    %c242_i32_56 = arith.constant 242 : i32
    %335 = tpu.dynamic_rotate %5 by %c242_i32_56 dim 1 : vector<1x256xf32>, i32 -> vector<1x256xf32>
    %336 = vector.broadcast %332 : f32 to vector<1x256xf32>
    %337 = arith.mulf %336, %334 : vector<1x256xf32>
    %338 = vector.broadcast %333 : f32 to vector<1x256xf32>
    %339 = arith.mulf %338, %335 : vector<1x256xf32>
    %340 = arith.addf %337, %339 : vector<1x256xf32>
    %341 = arith.mulf %340, %7 : vector<1x256xf32>
    %342 = arith.addf %331, %341 : vector<1x256xf32>
    %c30 = arith.constant 30 : index
    %343 = memref.load %arg1[%c30] : memref<98xf32, #tpu.memory_space<smem>>
    %c79 = arith.constant 79 : index
    %344 = memref.load %arg1[%c79] : memref<98xf32, #tpu.memory_space<smem>>
    %c241_i32 = arith.constant 241 : i32
    %345 = tpu.dynamic_rotate %3 by %c241_i32 dim 1 : vector<1x256xf32>, i32 -> vector<1x256xf32>
    %c241_i32_57 = arith.constant 241 : i32
    %346 = tpu.dynamic_rotate %5 by %c241_i32_57 dim 1 : vector<1x256xf32>, i32 -> vector<1x256xf32>
    %347 = vector.broadcast %343 : f32 to vector<1x256xf32>
    %348 = arith.mulf %347, %345 : vector<1x256xf32>
    %349 = vector.broadcast %344 : f32 to vector<1x256xf32>
    %350 = arith.mulf %349, %346 : vector<1x256xf32>
    %351 = arith.addf %348, %350 : vector<1x256xf32>
    %352 = arith.mulf %351, %8 : vector<1x256xf32>
    %353 = arith.addf %342, %352 : vector<1x256xf32>
    %c31 = arith.constant 31 : index
    %354 = memref.load %arg1[%c31] : memref<98xf32, #tpu.memory_space<smem>>
    %c80 = arith.constant 80 : index
    %355 = memref.load %arg1[%c80] : memref<98xf32, #tpu.memory_space<smem>>
    %c240_i32 = arith.constant 240 : i32
    %356 = tpu.dynamic_rotate %3 by %c240_i32 dim 1 : vector<1x256xf32>, i32 -> vector<1x256xf32>
    %c240_i32_58 = arith.constant 240 : i32
    %357 = tpu.dynamic_rotate %5 by %c240_i32_58 dim 1 : vector<1x256xf32>, i32 -> vector<1x256xf32>
    %358 = vector.broadcast %354 : f32 to vector<1x256xf32>
    %359 = arith.mulf %358, %356 : vector<1x256xf32>
    %360 = vector.broadcast %355 : f32 to vector<1x256xf32>
    %361 = arith.mulf %360, %357 : vector<1x256xf32>
    %362 = arith.addf %359, %361 : vector<1x256xf32>
    %363 = arith.addf %353, %362 : vector<1x256xf32>
    %c32 = arith.constant 32 : index
    %364 = memref.load %arg1[%c32] : memref<98xf32, #tpu.memory_space<smem>>
    %c81 = arith.constant 81 : index
    %365 = memref.load %arg1[%c81] : memref<98xf32, #tpu.memory_space<smem>>
    %c239_i32 = arith.constant 239 : i32
    %366 = tpu.dynamic_rotate %3 by %c239_i32 dim 1 : vector<1x256xf32>, i32 -> vector<1x256xf32>
    %c239_i32_59 = arith.constant 239 : i32
    %367 = tpu.dynamic_rotate %5 by %c239_i32_59 dim 1 : vector<1x256xf32>, i32 -> vector<1x256xf32>
    %368 = vector.broadcast %364 : f32 to vector<1x256xf32>
    %369 = arith.mulf %368, %366 : vector<1x256xf32>
    %370 = vector.broadcast %365 : f32 to vector<1x256xf32>
    %371 = arith.mulf %370, %367 : vector<1x256xf32>
    %372 = arith.addf %369, %371 : vector<1x256xf32>
    %373 = arith.mulf %372, %9 : vector<1x256xf32>
    %374 = arith.addf %363, %373 : vector<1x256xf32>
    %c33 = arith.constant 33 : index
    %375 = memref.load %arg1[%c33] : memref<98xf32, #tpu.memory_space<smem>>
    %c82 = arith.constant 82 : index
    %376 = memref.load %arg1[%c82] : memref<98xf32, #tpu.memory_space<smem>>
    %c238_i32 = arith.constant 238 : i32
    %377 = tpu.dynamic_rotate %3 by %c238_i32 dim 1 : vector<1x256xf32>, i32 -> vector<1x256xf32>
    %c238_i32_60 = arith.constant 238 : i32
    %378 = tpu.dynamic_rotate %5 by %c238_i32_60 dim 1 : vector<1x256xf32>, i32 -> vector<1x256xf32>
    %379 = vector.broadcast %375 : f32 to vector<1x256xf32>
    %380 = arith.mulf %379, %377 : vector<1x256xf32>
    %381 = vector.broadcast %376 : f32 to vector<1x256xf32>
    %382 = arith.mulf %381, %378 : vector<1x256xf32>
    %383 = arith.addf %380, %382 : vector<1x256xf32>
    %384 = arith.mulf %383, %10 : vector<1x256xf32>
    %385 = arith.addf %374, %384 : vector<1x256xf32>
    %c34 = arith.constant 34 : index
    %386 = memref.load %arg1[%c34] : memref<98xf32, #tpu.memory_space<smem>>
    %c83 = arith.constant 83 : index
    %387 = memref.load %arg1[%c83] : memref<98xf32, #tpu.memory_space<smem>>
    %c237_i32 = arith.constant 237 : i32
    %388 = tpu.dynamic_rotate %3 by %c237_i32 dim 1 : vector<1x256xf32>, i32 -> vector<1x256xf32>
    %c237_i32_61 = arith.constant 237 : i32
    %389 = tpu.dynamic_rotate %5 by %c237_i32_61 dim 1 : vector<1x256xf32>, i32 -> vector<1x256xf32>
    %390 = vector.broadcast %386 : f32 to vector<1x256xf32>
    %391 = arith.mulf %390, %388 : vector<1x256xf32>
    %392 = vector.broadcast %387 : f32 to vector<1x256xf32>
    %393 = arith.mulf %392, %389 : vector<1x256xf32>
    %394 = arith.addf %391, %393 : vector<1x256xf32>
    %395 = arith.mulf %394, %11 : vector<1x256xf32>
    %396 = arith.addf %385, %395 : vector<1x256xf32>
    %397 = arith.mulf %396, %15 : vector<1x256xf32>
    %398 = arith.addf %321, %397 : vector<1x256xf32>
    %c35 = arith.constant 35 : index
    %399 = memref.load %arg1[%c35] : memref<98xf32, #tpu.memory_space<smem>>
    %c84 = arith.constant 84 : index
    %400 = memref.load %arg1[%c84] : memref<98xf32, #tpu.memory_space<smem>>
    %c227_i32 = arith.constant 227 : i32
    %401 = tpu.dynamic_rotate %3 by %c227_i32 dim 1 : vector<1x256xf32>, i32 -> vector<1x256xf32>
    %c227_i32_62 = arith.constant 227 : i32
    %402 = tpu.dynamic_rotate %5 by %c227_i32_62 dim 1 : vector<1x256xf32>, i32 -> vector<1x256xf32>
    %403 = vector.broadcast %399 : f32 to vector<1x256xf32>
    %404 = arith.mulf %403, %401 : vector<1x256xf32>
    %405 = vector.broadcast %400 : f32 to vector<1x256xf32>
    %406 = arith.mulf %405, %402 : vector<1x256xf32>
    %407 = arith.addf %404, %406 : vector<1x256xf32>
    %408 = arith.mulf %407, %6 : vector<1x256xf32>
    %c36 = arith.constant 36 : index
    %409 = memref.load %arg1[%c36] : memref<98xf32, #tpu.memory_space<smem>>
    %c85 = arith.constant 85 : index
    %410 = memref.load %arg1[%c85] : memref<98xf32, #tpu.memory_space<smem>>
    %c226_i32 = arith.constant 226 : i32
    %411 = tpu.dynamic_rotate %3 by %c226_i32 dim 1 : vector<1x256xf32>, i32 -> vector<1x256xf32>
    %c226_i32_63 = arith.constant 226 : i32
    %412 = tpu.dynamic_rotate %5 by %c226_i32_63 dim 1 : vector<1x256xf32>, i32 -> vector<1x256xf32>
    %413 = vector.broadcast %409 : f32 to vector<1x256xf32>
    %414 = arith.mulf %413, %411 : vector<1x256xf32>
    %415 = vector.broadcast %410 : f32 to vector<1x256xf32>
    %416 = arith.mulf %415, %412 : vector<1x256xf32>
    %417 = arith.addf %414, %416 : vector<1x256xf32>
    %418 = arith.mulf %417, %7 : vector<1x256xf32>
    %419 = arith.addf %408, %418 : vector<1x256xf32>
    %c37 = arith.constant 37 : index
    %420 = memref.load %arg1[%c37] : memref<98xf32, #tpu.memory_space<smem>>
    %c86 = arith.constant 86 : index
    %421 = memref.load %arg1[%c86] : memref<98xf32, #tpu.memory_space<smem>>
    %c225_i32 = arith.constant 225 : i32
    %422 = tpu.dynamic_rotate %3 by %c225_i32 dim 1 : vector<1x256xf32>, i32 -> vector<1x256xf32>
    %c225_i32_64 = arith.constant 225 : i32
    %423 = tpu.dynamic_rotate %5 by %c225_i32_64 dim 1 : vector<1x256xf32>, i32 -> vector<1x256xf32>
    %424 = vector.broadcast %420 : f32 to vector<1x256xf32>
    %425 = arith.mulf %424, %422 : vector<1x256xf32>
    %426 = vector.broadcast %421 : f32 to vector<1x256xf32>
    %427 = arith.mulf %426, %423 : vector<1x256xf32>
    %428 = arith.addf %425, %427 : vector<1x256xf32>
    %429 = arith.mulf %428, %8 : vector<1x256xf32>
    %430 = arith.addf %419, %429 : vector<1x256xf32>
    %c38 = arith.constant 38 : index
    %431 = memref.load %arg1[%c38] : memref<98xf32, #tpu.memory_space<smem>>
    %c87 = arith.constant 87 : index
    %432 = memref.load %arg1[%c87] : memref<98xf32, #tpu.memory_space<smem>>
    %c224_i32 = arith.constant 224 : i32
    %433 = tpu.dynamic_rotate %3 by %c224_i32 dim 1 : vector<1x256xf32>, i32 -> vector<1x256xf32>
    %c224_i32_65 = arith.constant 224 : i32
    %434 = tpu.dynamic_rotate %5 by %c224_i32_65 dim 1 : vector<1x256xf32>, i32 -> vector<1x256xf32>
    %435 = vector.broadcast %431 : f32 to vector<1x256xf32>
    %436 = arith.mulf %435, %433 : vector<1x256xf32>
    %437 = vector.broadcast %432 : f32 to vector<1x256xf32>
    %438 = arith.mulf %437, %434 : vector<1x256xf32>
    %439 = arith.addf %436, %438 : vector<1x256xf32>
    %440 = arith.addf %430, %439 : vector<1x256xf32>
    %c39 = arith.constant 39 : index
    %441 = memref.load %arg1[%c39] : memref<98xf32, #tpu.memory_space<smem>>
    %c88 = arith.constant 88 : index
    %442 = memref.load %arg1[%c88] : memref<98xf32, #tpu.memory_space<smem>>
    %c223_i32 = arith.constant 223 : i32
    %443 = tpu.dynamic_rotate %3 by %c223_i32 dim 1 : vector<1x256xf32>, i32 -> vector<1x256xf32>
    %c223_i32_66 = arith.constant 223 : i32
    %444 = tpu.dynamic_rotate %5 by %c223_i32_66 dim 1 : vector<1x256xf32>, i32 -> vector<1x256xf32>
    %445 = vector.broadcast %441 : f32 to vector<1x256xf32>
    %446 = arith.mulf %445, %443 : vector<1x256xf32>
    %447 = vector.broadcast %442 : f32 to vector<1x256xf32>
    %448 = arith.mulf %447, %444 : vector<1x256xf32>
    %449 = arith.addf %446, %448 : vector<1x256xf32>
    %450 = arith.mulf %449, %9 : vector<1x256xf32>
    %451 = arith.addf %440, %450 : vector<1x256xf32>
    %c40 = arith.constant 40 : index
    %452 = memref.load %arg1[%c40] : memref<98xf32, #tpu.memory_space<smem>>
    %c89 = arith.constant 89 : index
    %453 = memref.load %arg1[%c89] : memref<98xf32, #tpu.memory_space<smem>>
    %c222_i32 = arith.constant 222 : i32
    %454 = tpu.dynamic_rotate %3 by %c222_i32 dim 1 : vector<1x256xf32>, i32 -> vector<1x256xf32>
    %c222_i32_67 = arith.constant 222 : i32
    %455 = tpu.dynamic_rotate %5 by %c222_i32_67 dim 1 : vector<1x256xf32>, i32 -> vector<1x256xf32>
    %456 = vector.broadcast %452 : f32 to vector<1x256xf32>
    %457 = arith.mulf %456, %454 : vector<1x256xf32>
    %458 = vector.broadcast %453 : f32 to vector<1x256xf32>
    %459 = arith.mulf %458, %455 : vector<1x256xf32>
    %460 = arith.addf %457, %459 : vector<1x256xf32>
    %461 = arith.mulf %460, %10 : vector<1x256xf32>
    %462 = arith.addf %451, %461 : vector<1x256xf32>
    %c41 = arith.constant 41 : index
    %463 = memref.load %arg1[%c41] : memref<98xf32, #tpu.memory_space<smem>>
    %c90 = arith.constant 90 : index
    %464 = memref.load %arg1[%c90] : memref<98xf32, #tpu.memory_space<smem>>
    %c221_i32 = arith.constant 221 : i32
    %465 = tpu.dynamic_rotate %3 by %c221_i32 dim 1 : vector<1x256xf32>, i32 -> vector<1x256xf32>
    %c221_i32_68 = arith.constant 221 : i32
    %466 = tpu.dynamic_rotate %5 by %c221_i32_68 dim 1 : vector<1x256xf32>, i32 -> vector<1x256xf32>
    %467 = vector.broadcast %463 : f32 to vector<1x256xf32>
    %468 = arith.mulf %467, %465 : vector<1x256xf32>
    %469 = vector.broadcast %464 : f32 to vector<1x256xf32>
    %470 = arith.mulf %469, %466 : vector<1x256xf32>
    %471 = arith.addf %468, %470 : vector<1x256xf32>
    %472 = arith.mulf %471, %11 : vector<1x256xf32>
    %473 = arith.addf %462, %472 : vector<1x256xf32>
    %474 = arith.mulf %473, %16 : vector<1x256xf32>
    %475 = arith.addf %398, %474 : vector<1x256xf32>
    %c42 = arith.constant 42 : index
    %476 = memref.load %arg1[%c42] : memref<98xf32, #tpu.memory_space<smem>>
    %c91 = arith.constant 91 : index
    %477 = memref.load %arg1[%c91] : memref<98xf32, #tpu.memory_space<smem>>
    %c211_i32 = arith.constant 211 : i32
    %478 = tpu.dynamic_rotate %3 by %c211_i32 dim 1 : vector<1x256xf32>, i32 -> vector<1x256xf32>
    %c211_i32_69 = arith.constant 211 : i32
    %479 = tpu.dynamic_rotate %5 by %c211_i32_69 dim 1 : vector<1x256xf32>, i32 -> vector<1x256xf32>
    %480 = vector.broadcast %476 : f32 to vector<1x256xf32>
    %481 = arith.mulf %480, %478 : vector<1x256xf32>
    %482 = vector.broadcast %477 : f32 to vector<1x256xf32>
    %483 = arith.mulf %482, %479 : vector<1x256xf32>
    %484 = arith.addf %481, %483 : vector<1x256xf32>
    %485 = arith.mulf %484, %6 : vector<1x256xf32>
    %c43 = arith.constant 43 : index
    %486 = memref.load %arg1[%c43] : memref<98xf32, #tpu.memory_space<smem>>
    %c92 = arith.constant 92 : index
    %487 = memref.load %arg1[%c92] : memref<98xf32, #tpu.memory_space<smem>>
    %c210_i32 = arith.constant 210 : i32
    %488 = tpu.dynamic_rotate %3 by %c210_i32 dim 1 : vector<1x256xf32>, i32 -> vector<1x256xf32>
    %c210_i32_70 = arith.constant 210 : i32
    %489 = tpu.dynamic_rotate %5 by %c210_i32_70 dim 1 : vector<1x256xf32>, i32 -> vector<1x256xf32>
    %490 = vector.broadcast %486 : f32 to vector<1x256xf32>
    %491 = arith.mulf %490, %488 : vector<1x256xf32>
    %492 = vector.broadcast %487 : f32 to vector<1x256xf32>
    %493 = arith.mulf %492, %489 : vector<1x256xf32>
    %494 = arith.addf %491, %493 : vector<1x256xf32>
    %495 = arith.mulf %494, %7 : vector<1x256xf32>
    %496 = arith.addf %485, %495 : vector<1x256xf32>
    %c44 = arith.constant 44 : index
    %497 = memref.load %arg1[%c44] : memref<98xf32, #tpu.memory_space<smem>>
    %c93 = arith.constant 93 : index
    %498 = memref.load %arg1[%c93] : memref<98xf32, #tpu.memory_space<smem>>
    %c209_i32 = arith.constant 209 : i32
    %499 = tpu.dynamic_rotate %3 by %c209_i32 dim 1 : vector<1x256xf32>, i32 -> vector<1x256xf32>
    %c209_i32_71 = arith.constant 209 : i32
    %500 = tpu.dynamic_rotate %5 by %c209_i32_71 dim 1 : vector<1x256xf32>, i32 -> vector<1x256xf32>
    %501 = vector.broadcast %497 : f32 to vector<1x256xf32>
    %502 = arith.mulf %501, %499 : vector<1x256xf32>
    %503 = vector.broadcast %498 : f32 to vector<1x256xf32>
    %504 = arith.mulf %503, %500 : vector<1x256xf32>
    %505 = arith.addf %502, %504 : vector<1x256xf32>
    %506 = arith.mulf %505, %8 : vector<1x256xf32>
    %507 = arith.addf %496, %506 : vector<1x256xf32>
    %c45 = arith.constant 45 : index
    %508 = memref.load %arg1[%c45] : memref<98xf32, #tpu.memory_space<smem>>
    %c94 = arith.constant 94 : index
    %509 = memref.load %arg1[%c94] : memref<98xf32, #tpu.memory_space<smem>>
    %c208_i32 = arith.constant 208 : i32
    %510 = tpu.dynamic_rotate %3 by %c208_i32 dim 1 : vector<1x256xf32>, i32 -> vector<1x256xf32>
    %c208_i32_72 = arith.constant 208 : i32
    %511 = tpu.dynamic_rotate %5 by %c208_i32_72 dim 1 : vector<1x256xf32>, i32 -> vector<1x256xf32>
    %512 = vector.broadcast %508 : f32 to vector<1x256xf32>
    %513 = arith.mulf %512, %510 : vector<1x256xf32>
    %514 = vector.broadcast %509 : f32 to vector<1x256xf32>
    %515 = arith.mulf %514, %511 : vector<1x256xf32>
    %516 = arith.addf %513, %515 : vector<1x256xf32>
    %517 = arith.addf %507, %516 : vector<1x256xf32>
    %c46 = arith.constant 46 : index
    %518 = memref.load %arg1[%c46] : memref<98xf32, #tpu.memory_space<smem>>
    %c95 = arith.constant 95 : index
    %519 = memref.load %arg1[%c95] : memref<98xf32, #tpu.memory_space<smem>>
    %c207_i32 = arith.constant 207 : i32
    %520 = tpu.dynamic_rotate %3 by %c207_i32 dim 1 : vector<1x256xf32>, i32 -> vector<1x256xf32>
    %c207_i32_73 = arith.constant 207 : i32
    %521 = tpu.dynamic_rotate %5 by %c207_i32_73 dim 1 : vector<1x256xf32>, i32 -> vector<1x256xf32>
    %522 = vector.broadcast %518 : f32 to vector<1x256xf32>
    %523 = arith.mulf %522, %520 : vector<1x256xf32>
    %524 = vector.broadcast %519 : f32 to vector<1x256xf32>
    %525 = arith.mulf %524, %521 : vector<1x256xf32>
    %526 = arith.addf %523, %525 : vector<1x256xf32>
    %527 = arith.mulf %526, %9 : vector<1x256xf32>
    %528 = arith.addf %517, %527 : vector<1x256xf32>
    %c47 = arith.constant 47 : index
    %529 = memref.load %arg1[%c47] : memref<98xf32, #tpu.memory_space<smem>>
    %c96 = arith.constant 96 : index
    %530 = memref.load %arg1[%c96] : memref<98xf32, #tpu.memory_space<smem>>
    %c206_i32 = arith.constant 206 : i32
    %531 = tpu.dynamic_rotate %3 by %c206_i32 dim 1 : vector<1x256xf32>, i32 -> vector<1x256xf32>
    %c206_i32_74 = arith.constant 206 : i32
    %532 = tpu.dynamic_rotate %5 by %c206_i32_74 dim 1 : vector<1x256xf32>, i32 -> vector<1x256xf32>
    %533 = vector.broadcast %529 : f32 to vector<1x256xf32>
    %534 = arith.mulf %533, %531 : vector<1x256xf32>
    %535 = vector.broadcast %530 : f32 to vector<1x256xf32>
    %536 = arith.mulf %535, %532 : vector<1x256xf32>
    %537 = arith.addf %534, %536 : vector<1x256xf32>
    %538 = arith.mulf %537, %10 : vector<1x256xf32>
    %539 = arith.addf %528, %538 : vector<1x256xf32>
    %c48 = arith.constant 48 : index
    %540 = memref.load %arg1[%c48] : memref<98xf32, #tpu.memory_space<smem>>
    %c97 = arith.constant 97 : index
    %541 = memref.load %arg1[%c97] : memref<98xf32, #tpu.memory_space<smem>>
    %c205_i32 = arith.constant 205 : i32
    %542 = tpu.dynamic_rotate %3 by %c205_i32 dim 1 : vector<1x256xf32>, i32 -> vector<1x256xf32>
    %c205_i32_75 = arith.constant 205 : i32
    %543 = tpu.dynamic_rotate %5 by %c205_i32_75 dim 1 : vector<1x256xf32>, i32 -> vector<1x256xf32>
    %544 = vector.broadcast %540 : f32 to vector<1x256xf32>
    %545 = arith.mulf %544, %542 : vector<1x256xf32>
    %546 = vector.broadcast %541 : f32 to vector<1x256xf32>
    %547 = arith.mulf %546, %543 : vector<1x256xf32>
    %548 = arith.addf %545, %547 : vector<1x256xf32>
    %549 = arith.mulf %548, %11 : vector<1x256xf32>
    %550 = arith.addf %539, %549 : vector<1x256xf32>
    %551 = arith.mulf %550, %17 : vector<1x256xf32>
    %552 = arith.addf %475, %551 : vector<1x256xf32>
    %c0_76 = arith.constant 0 : index
    %553 = memref.load %arg2[%c0_76] : memref<1xf32, #tpu.memory_space<smem>>
    %554 = vector.broadcast %553 : f32 to vector<1x256xf32>
    %555 = arith.addf %552, %554 : vector<1x256xf32>
    %cst_77 = arith.constant 0.000000e+00 : f32
    %556 = vector.broadcast %cst_77 : f32 to vector<1x256xf32>
    %557 = arith.subf %556, %555 : vector<1x256xf32>
    %558 = math.exp %557 : vector<1x256xf32>
    %cst_78 = arith.constant 1.000000e+00 : f32
    %559 = vector.broadcast %cst_78 : f32 to vector<1x256xf32>
    %560 = arith.addf %559, %558 : vector<1x256xf32>
    %561 = tpu.reciprocal %560 : vector<1x256xf32> -> vector<1x256xf32>
    %c0_79 = arith.constant 0 : index
    %c0_80 = arith.constant 0 : index
    %c0_81 = arith.constant 0 : index
    %562 = vector.load %arg4[%c0_79, %c0_80, %c0_81] : memref<1x4x256xf32, #tpu.memory_space<vmem>>, vector<1x4x256xf32>
    %563 = vector.shape_cast %562 : vector<1x4x256xf32> to vector<4x256xf32>
    %564 = vector.broadcast %561 : vector<1x256xf32> to vector<4x256xf32>
    %565 = arith.mulf %563, %564 : vector<4x256xf32>
    %c0_82 = arith.constant 0 : index
    %c0_83 = arith.constant 0 : index
    %c0_84 = arith.constant 0 : index
    %566 = vector.load %arg5[%c0_82, %c0_83, %c0_84] : memref<1x4x256xf32, #tpu.memory_space<vmem>>, vector<1x4x256xf32>
    %567 = vector.shape_cast %566 : vector<1x4x256xf32> to vector<4x256xf32>
    %568 = vector.shape_cast %565 : vector<4x256xf32> to vector<1x4x256xf32>
    tpu.vector_store %arg5[%c0_82, %c0_83, %c0_84], %568 {strides = array<i32>} : memref<1x4x256xf32, #tpu.memory_space<vmem>>, vector<1x4x256xf32>,
    return
  }
  func.func @transform_0(%arg0: i32) -> i32 {
    %c0_i32 = arith.constant 0 : i32
    %c0_i32_0 = arith.constant 0 : i32
    return %c0_i32 : i32
  }
  func.func @transform_1(%arg0: i32) -> i32 {
    %c0_i32 = arith.constant 0 : i32
    %c0_i32_0 = arith.constant 0 : i32
    return %c0_i32 : i32
  }
  func.func @transform_2(%arg0: i32) -> (i32, i32) {
    %c0_i32 = arith.constant 0 : i32
    %c0_i32_0 = arith.constant 0 : i32
    %c0_i32_1 = arith.constant 0 : i32
    return %c0_i32, %c0_i32_0 : i32, i32
  }
  func.func @transform_3(%arg0: i32) -> (i32, i32, i32) {
    %c0_i32 = arith.constant 0 : i32
    %c0_i32_0 = arith.constant 0 : i32
    %c0_i32_1 = arith.constant 0 : i32
    return %arg0, %c0_i32, %c0_i32_0 : i32, i32, i32
  }
  func.func @transform_4(%arg0: i32) -> (i32, i32, i32) {
    %c0_i32 = arith.constant 0 : i32
    %c0_i32_0 = arith.constant 0 : i32
    %c0_i32_1 = arith.constant 0 : i32
    return %arg0, %c0_i32, %c0_i32_0 : i32, i32, i32
  }
}

</mosaic_0001>

<bundles_post_ra>
// kernel: tpu_custom_call.1
= control target key start
LH: loop header
LB: loop body
LE: loop exit
PB: predicated region body
PF: predicated region fallthrough
CT: control target
= control target key end

     0   :  { %s4342_s0 = inlined_call_operand.vmem [shape: f32[98], index: 0, kind: input, shape index: {}]   ;;  %s4343_s1 = inlined_call_operand.<no memory space> [shape: f32[1], index: 1, kind: input, shape index: {}]   ;;  %s4344_s2 = inlined_call_operand.hbm [shape: f32[14,256], index: 2, kind: input, shape index: {}]   ;;  %s4345_s3 = inlined_call_operand.hbm [shape: f32[2,4,256], index: 3, kind: input, shape index: {}]   ;;  %s4346_s4 = inlined_call_operand.hbm [shape: f32[2,4,256], index: 4, kind: output, shape index: {}]  }
   0x1   :  { %4457 = sst [smem:[#allocation101_spill]] %s4342_s0 }
   0x2   :  { %4458 = sst [smem:[#allocation102_spill]] %s4344_s2 }
   0x3   :  { %4459 = sst [smem:[#allocation103_spill]] %s4345_s3 }
   0x4   :  { %4460 = sst [smem:[#allocation104_spill]] %s4346_s4 }
   0x5   :  { %9 = sst [smem:[#allocation2]] %s4343_s1 }
   0x6   :  { %10 = vsyncpa [#allocation6], 0 }
   0x7   :  { %11 = vsyncpa [#allocation4], 0 }
   0x8   :  { %12 = vsyncpa [#allocation9], 0 }
   0x9   :  { %14 = vsyncpa [#allocation9 + $0x1], 0 }
   0xa   :  { %15 = vsyncpa [#allocation5], 0 }
   0xb   :  { %17 = vsyncpa [#allocation5 + $0x1], 0  ;;  %s2352_s17 = smov 0   ;;  %s2354_s18 = smov 0  }
   0xc   :  { %s2356_s19 = smov 0   ;;  %s2358_s20 = smov 0  }
   0xd LB: > { %4461 = sst [smem:[#allocation15_spill]] %s2256_s17  ;;  %s2373_s1 = sadd.s32 4294967295, %s2268_s20   ;;  %s2268_s20 = sphi %s2358_s20, %s4739_s20   ;;  %s2264_s19 = sphi %s2356_s19, %s4742_s19   ;;  %s2260_s18 = sphi %s2354_s18, %s4741_s18   ;;  %s2256_s17 = sphi %s2352_s17, %s4740_s17  }
   0xe   : > { %4462 = sst [smem:[#allocation16_spill]] %s2260_s18  ;;  %s1877_s21 = sadd.s32 4294967294, %s2268_s20  }
   0xf   : > { %4463 = sst [smem:[#allocation17_spill]] %s2264_s19  ;;  %p106_p0 = scmp.ne.s32.totalorder %s2260_s18, %s2256_s17 }
  0x10   : > { %4464 = sst [smem:[#allocation18_spill]] %s2268_s20  ;;  %p4347_p1 = scmp.eq.s32.totalorder %s2373_s1, 0 }
  0x11   : > { %4465 = sst [smem:[#allocation19_spill]] %s2373_s1  ;;  %p136_p3 = scmp.eq.s32.totalorder %s1877_s21, 1 }
  0x12   : > { %p2382_p4 = por %p4347_p1, %p106_p0  ;;  %p1878_p5 = scmp.ge.s32.totalorder %s2268_s20, 1 }
  0x13   : > { %p2387_p6 = por %p136_p3, %p106_p0  ;;  %p143_p7 = scmp.lt.s32.totalorder %s2268_s20, 3 }
  0x14   : > { %s4466_s22 = scalar_select %p2382_p4, 1, 0 }
  0x15   : > { %s4467_s23 = scalar_select %p2387_p6, 1, 0 }
  0x16   : > { %s4469_s0 = sld [smem:[#allocation101_spill]]  ;;  %p2395_p8 = pnand %p1878_p5, %p143_p7 }
  0x17   : > { %4468 = sst [smem:[#allocation20_spill]] %s4467_s23  ;;  %s2270_s28 = smov [#allocation7]  }
  0x18   : > { %p2006_p10 = pneg %p2395_p8  ;;  %s169_s29 = sshll.u32 %s2270_s28, 4  ;;  %s2408_s29 = int_to_ptr.vmem [resolvable:$true] %s169_s29 }
  0x1a   : > { %p2404_p11 = pnand %p2006_p10, %p4347_p1 }
  0x1c   : > { %s156_s26 = sshll.u32 %s4469_s0, 4  ;;  %p2123_p13 = pneg %p2404_p11  ;;  %s157_s26 = int_to_ptr.vmem [resolvable:$true] %s156_s26 }
  0x1d   : > { %s2121_s5 = scalar_lea.vmem %s157_s26, 16  ;;  %p2129_p5 = scmp.lt.s32.totalorder %s157_s26, %s157_s26 }
  0x1e   : > { %p2122_p12 = scmp.ne.s32.totalorder %s157_s26, %s2121_s5  ;;  %p2130_p7 = scmp.lt.s32.totalorder %s2121_s5, %s2121_s5 }
  0x20   : > { %p2124_p0 = pnand %p2123_p13, %p2122_p12  ;;  %p2131_p9 = por %p2130_p7, %p2129_p5 }
  0x22   : > { %p2125_p3 = pneg %p2124_p0 }
  0x24   : > { %p2132_p2 = pnand %p2131_p9, %p2125_p3 }
  0x26   : > { %2135 = shalt.err (!%p2132_p2)
}
  0x27   : > { %s2271_s6 = smov [#allocation3]   ;;  %s4472_s2 = sld [smem:[#allocation102_spill]] }
  0x28   : > { %2009 = dma.vmem_to_smem (!%p2404_p11), %s157_s26, 16, %s2271_s6, [#allocation6]  }
  0x2d   : > { %s2136_s9 = scalar_lea.hbm %s4472_s2, 512 }
  0x2e   : > { %p2137_p10 = scmp.ne.s32.totalorder %s4472_s2, %s2136_s9  ;;  %p2143_p2 = scmp.lt.u32.totalorder %s2136_s9, %s4472_s2 }
  0x30   : > { %p2139_p12 = pnand %p2137_p10, %p2123_p13 }
  0x32   : > { %p2140_p0 = pneg %p2139_p12 }
  0x34   : > { %p2145_p9 = pnand %p2143_p2, %p2140_p0 }
  0x36   : > { %2148 = shalt.err (!%p2145_p9)
}
  0x37   : > { %s2149_s14 = scalar_lea.vmem %s2408_s29, 512  ;;  %p2157_p1 = scmp.lt.s32.totalorder %s2408_s29, %s2408_s29 }
  0x38   : > { %p2150_p3 = scmp.ne.s32.totalorder %s2408_s29, %s2149_s14  ;;  %p2158_p10 = scmp.lt.s32.totalorder %s2149_s14, %s2149_s14 }
  0x3a   : > { %p2152_p5 = pnand %p2150_p3, %p2123_p13  ;;  %p2159_p12 = por %p2158_p10, %p2157_p1 }
  0x3c   : > { %p2153_p7 = pneg %p2152_p5 }
  0x3e   : > { %p2160_p6 = pnand %p2159_p12, %p2153_p7 }
  0x40   : > { %2163 = shalt.err (!%p2160_p6)
}
  0x41   : > { %s2272_s15 = smov 256   ;;  %s2273_s16 = smov 16  }
  0x42   : > { %2012 = dma.hbm_to_vmem [thread:$0]  (!%p2404_p11), %s4472_s2, 512, %s2408_s29, [#allocation4], %s2272_s15, %s2272_s15, %s2273_s16  }
  0x43   : > { %s2443_s25 = sadd.s32 1, %s2268_s20   ;;  %s93_s26 = sadd.s32 1, %s2264_s19 }
  0x44   : > { %4473 = sst [smem:[#allocation21_spill]] %s2443_s25  ;;  %s90_s28 = ssub.s32 %s2268_s20, %s2443_s25 }
  0x45   : > { %p100_p1 = scmp.ne.s32.totalorder %s2264_s19, %s2260_s18  ;;  %p91_p6 = scmp.eq.s32.totalorder %s90_s28, 0 }
  0x46   : > { %p101_p13 = scmp.eq.s32.totalorder %s2268_s20, 0  ;;  %p4474_p0 = scmp.eq.s32.totalorder %s2373_s1, 1 }
  0x47   : > { %p2023_p9 = scmp.lt.s32.totalorder %s2268_s20, 2  ;;  %s183_s30 = sand.u32 1, %s2264_s19  }
  0x48   : > { %p2453_p2 = por %p4474_p0, %p100_p1  ;;  %p102_p3 = por %p101_p13, %p100_p1 }
  0x49   : > { %s2459_s6 = scalar_select %p91_p6, %s2264_s19, %s93_s26  }
  0x4a   : > { %s4475_s5 = scalar_select %p2453_p2, 1, 0 }
  0x4b   : > { %4477 = sst [smem:[#allocation23_spill]] %s2459_s6  ;;  %s1882_s7 = sshll.u32 %s183_s30, 3 }
  0x4c   : > { %4476 = sst [smem:[#allocation22_spill]] %s4475_s5  ;;  %s1992_s29 = sshll.u32 %s2268_s20, 7 }
  0x4d   : > { %s4478_s3 = sld [smem:[#allocation103_spill]]  ;;  %s187_s11 = scalar_lea.vmem [#allocation8], %s1882_s7 }
  0x4e   : > { %s195_s12 = sshll.u32 %s187_s11, 4  ;;  %p2470_p11 = pnand %p2023_p9, %p102_p3  ;;  %s2468_s12 = int_to_ptr.vmem [resolvable:$true] %s195_s12 }
  0x4f   : > { %s184_s14 = scalar_lea.sflag [#allocation9], %s183_s30 }
  0x50   : > { %p2166_p7 = pneg %p2470_p11 }
  0x53   : > { %s2466_s10 = scalar_lea.hbm %s4478_s3, %s1992_s29  ;;  %s2169_s24 = scalar_lea.hbm %s4478_s3, 256 }
  0x54   : > { %s2164_s15 = scalar_lea.hbm %s2466_s10, 128  ;;  %p2170_p1 = scmp.lt.u32.totalorder %s2466_s10, %s4478_s3 }
  0x55   : > { %p2165_p5 = scmp.ne.s32.totalorder %s2466_s10, %s2164_s15  ;;  %p2171_p6 = scmp.lt.u32.totalorder %s2169_s24, %s2164_s15 }
  0x56   : > { %p2173_p0 = scmp.lt.u32.totalorder %s2164_s15, %s2466_s10 }
  0x57   : > { %p2167_p10 = pnand %p2166_p7, %p2165_p5  ;;  %p2172_p13 = por %p2171_p6, %p2170_p1 }
  0x59   : > { %p2168_p12 = pneg %p2167_p10  ;;  %p2174_p9 = por %p2173_p0, %p2172_p13 }
  0x5b   : > { %p2175_p3 = pnand %p2174_p9, %p2168_p12 }
  0x5d   : > { %2178 = shalt.err (!%p2175_p3)
}
  0x5e   : > { %s2179_s30 = scalar_lea.vmem %s2468_s12, 128  ;;  %s2274_s7 = smov [#allocation8]  }
  0x5f   : > { %p2180_p5 = scmp.ne.s32.totalorder %s2468_s12, %s2179_s30  ;;  %s2184_s29 = sshll.u32 %s2274_s7, 4  ;;  %s2185_s29 = int_to_ptr.vmem [resolvable:$false] %s2184_s29 }
  0x60   : > { %s2186_s8 = scalar_lea.vmem %s2185_s29, 256  ;;  %p2187_p4 = scmp.lt.s32.totalorder %s2468_s12, %s2185_s29 }
  0x61   : > { %p2182_p10 = pnand %p2180_p5, %p2166_p7  ;;  %p2188_p1 = scmp.lt.s32.totalorder %s2186_s8, %s2179_s30 }
  0x63   : > { %p2183_p2 = pneg %p2182_p10  ;;  %p2189_p6 = por %p2188_p1, %p2187_p4 }
  0x65   : > { %p2190_p13 = pnand %p2189_p6, %p2183_p2 }
  0x67   : > { %2193 = shalt.err (!%p2190_p13)
}
  0x68   : > { %2016 = dma.hbm_to_vmem [thread:$0]  (!%p2470_p11), %s2466_s10, 128, %s2468_s12, %s184_s14  }
  0x69   : > { %204 = sbr.rel (%p2395_p8) target bundleno = 714 (0x2ca), region = 36 }
  0x70   : > { %p4480_p7 = scmp.eq.s32.totalorder %s2373_s1, 0 }
  0x72   : > { %2239 = dma.done.wait (%p4480_p7), [#allocation6], 16   ;;  %p4481_p12 = pmov %p4480_p7 }
  0x73   : > { %p4482_p0 = pmov %p4480_p7 }
  0x74   : > { %2241 = vsyncadd (%p4481_p12), [#allocation6], 4294967280 }
  0x75   : > { %2243 = dma.done.wait (%p4482_p0), [#allocation4], 512   ;;  %p4483_p4 = pmov %p4482_p0 }
  0x76   : > { %s2510_s9 = sand.u32 1, %s2260_s18   ;;  %p4486_p8 = scmp.ne.s32.totalorder %s4466_s22, 0 }
  0x77   : > { %2245 = vsyncadd (%p4483_p4), [#allocation4], 4294966784  ;;  %4484 = sst [smem:[#allocation24_spill]] %s2510_s9  ;;  %s4375_s27 = sshll.u32 %s2510_s9, 3 }
  0x78   : > { %s215_s10 = scalar_lea.sflag [#allocation9], %s2510_s9  ;;  %s2516_s11 = scalar_lea.vmem [#allocation8], %s4375_s27 }
  0x79   : > { %4485 = sst [smem:[#allocation25_spill]] %s2516_s11 }
  0x7a   : > { %2247 = dma.done.wait (%p4486_p8), %s215_s10, 128  }
  0x7b   : > { %2249 = vsyncadd (%p4486_p8), %s215_s10, 4294967168 }
  0x7c   : > { %223 = sfence }
  0x7d   : > { %v244_v0 = vld [vmem:[%s2516_s11] sm:$0xff]  ;;  %vm248_vm0 = vcmask 1043456   ;;  %s2275_s22 = smov 51   ;;  %s2276_s12 = smov 50  }
  0x7e   : > { %v263_v1 = vsel %vm248_vm0, %v244_v0, 0.0  ;;  %v249_v2 = vsel %vm248_vm0, %v244_v0, -inf  ;;  %v246_v3 = vcombine.high %v244_v0, %v244_v0  ;;  %s2277_s13 = smov 49   ;;  %s2278_s14 = smov 48  }
  0x7f   : > { %v264_v4 = vrot.slane %v263_v1, 4  ;;  %v250_v5 = vrot.slane %v249_v2, 4  ;;  %s2279_s15 = smov 47   ;;  %s2280_s16 = smov 46  }
  0x80   : > { %v270_v6 = vsel %vm248_vm0, %v246_v3, 0.0  ;;  %v256_v7 = vsel %vm248_vm0, %v246_v3, -inf  ;;  %s2281_s21 = smov 45   ;;  %s2282_s24 = smov 35  }
  0x81   : > { %v265_v8 = vadd.f32 %v264_v4, %v263_v1  ;;  %v251_v9 = vmax.f32 %v249_v2, %v250_v5  ;;  %v271_v10 = vrot.slane %v270_v6, 4  ;;  %v257_v11 = vrot.slane %v256_v7, 4  ;;  %s2283_s26 = smov 34   ;;  %s2284_s28 = smov 33  }
  0x82   : > { %s2285_s30 = smov 32   ;;  %s2286_s7 = smov 31  }
  0x83   : > { %v266_v12 = vrot.slane %v265_v8, 2  ;;  %v252_v13 = vrot.slane %v251_v9, 2  ;;  %v272_v14 = vadd.f32 %v271_v10, %v270_v6  ;;  %v258_v15 = vmax.f32 %v256_v7, %v257_v11  ;;  %s2287_s29 = smov 30   ;;  %s2288_s8 = smov 29  }
  0x84   : > { %s2289_s10 = smov 19   ;;  %s2865_s27 = sld [smem:[#allocation3 + $0x7]] }
  0x85   : > { %v267_v16 = vadd.f32 %v266_v12, %v265_v8  ;;  %v253_v17 = vmax.f32 %v251_v9, %v252_v13  ;;  %v273_v18 = vrot.slane %v272_v14, 2  ;;  %v259_v19 = vrot.slane %v258_v15, 2  ;;  %s2869_s0 = sld [smem:[#allocation3 + $0x38]]  ;;  %s2310_s3 = smov 97  }
  0x86   : > { %s2871_s2 = sld [smem:[#allocation3 + $0x8]]  ;;  %s2880_s6 = sld [smem:[#allocation3 + $0x9]] }
  0x87   : > { %v268_v20 = vrot.slane %v267_v16, 1  ;;  %v254_v21 = vrot.slane %v253_v17, 1  ;;  %v274_v22 = vadd.f32 %v273_v18, %v272_v14  ;;  %v260_v23 = vmax.f32 %v258_v15, %v259_v19  ;;  %s2883_s19 = sld [smem:[#allocation3 + $0x3a]]  ;;  %s2889_s25 = sld [smem:[#allocation3 + $0x3b]] }
  0x88   : > { %s2885_s18 = sld [smem:[#allocation3 + $0xa]]  ;;  %s2891_s20 = sld [smem:[#allocation3 + $0xb]] }
  0x89   : > { %v2523_v24 = vadd.f32 %v268_v20, %v267_v16  ;;  %v2525_v25 = vmax.f32 %v253_v17, %v254_v21  ;;  %v275_v26 = vrot.slane %v274_v22, 1  ;;  %v261_v28 = vrot.slane %v260_v23, 1  ;;  %s2898_s23 = sld [smem:[#allocation3 + $0x3c]]  ;;  %s2911_s4 = sld [smem:[#allocation3 + $0x3d]] }
  0x8a   : > { %s2900_s17 = sld [smem:[#allocation3 + $0xc]]  ;;  %s2922_s5 = sld [smem:[#allocation3 + $0xd]] }
  0x8b   : > { %311 = vrot.lane.b32.xlu1 %v2523_v24, %s2275_s22  ;;  %302 = vrot.lane.b32.xlu0 %v2525_v25, %s2275_s22  ;;  %v2529_v27 = vadd.f32 %v275_v26, %v274_v22  ;;  %v2533_v29 = vmax.f32 %v260_v23, %v261_v28  ;;  %4554 = sst [smem:[#allocation93_spill]] %s2869_s0  ;;  %s2924_s11 = sld [smem:[#allocation3 + $0x3e]] }
  0x8c   : > { %4557 = sst [smem:[#allocation96_spill]] %s2880_s6  ;;  %s2938_s9 = sld [smem:[#allocation3 + $0x3f]] }
  0x8d   : > { %s4427_s1 = smov 83   ;;  %s2991_s0 = sld [smem:[#allocation3 + $0x17]] }
  0x8e   : > { %4558 = sst [smem:[#allocation97_spill]] %s2885_s18  ;;  %s3000_s6 = sld [smem:[#allocation3 + $0x48]] }
  0x8f   : > { %340 = vrot.lane.b32.xlu0 %v2525_v25, %s2276_s12  ;;  %313 = vrot.lane.b32.xlu1 %v2529_v27, %s2275_s22  ;;  %4559 = sst [smem:[#allocation98_spill]] %s2891_s20  ;;  %s3010_s20 = sld [smem:[#allocation3 + $0x18]] }
  0x90   : > { %s3012_s18 = sld [smem:[#allocation3 + $0x49]] }
  0x93   : > { %347 = vrot.lane.b32.xlu0 %v2523_v24, %s2276_s12  ;;  %342 = vrot.lane.b32.xlu1 %v2533_v29, %s2276_s12 }
  0x97   : > { %378 = vrot.lane.b32.xlu0 %v2525_v25, %s2277_s13  ;;  %349 = vrot.lane.b32.xlu1 %v2529_v27, %s2276_s12  ;;  %s2291_s12 = smov 17  }
  0x9b   : > { %380 = vrot.lane.b32.xlu1 %v2533_v29, %s2277_s13  ;;  %304 = vrot.lane.b32.xlu0 %v2533_v29, %s2275_s22  ;;  %s2290_s22 = smov 18  }
  0x9f   : > { %387 = vrot.lane.b32.xlu1 %v2529_v27, %s2277_s13  ;;  %385 = vrot.lane.b32.xlu0 %v2523_v24, %s2277_s13  ;;  %s2292_s13 = smov 16  }
  0xa3   : > { %418 = vrot.lane.b32.xlu1 %v2533_v29, %s2278_s14  ;;  %416 = vrot.lane.b32.xlu0 %v2525_v25, %s2278_s14 }
  0xa7   : > { %425 = vrot.lane.b32.xlu1 %v2529_v27, %s2278_s14  ;;  %423 = vrot.lane.b32.xlu0 %v2523_v24, %s2278_s14  ;;  %s2293_s14 = smov 15  }
  0xab   : > { %443 = vrot.lane.b32.xlu1 %v2533_v29, %s2279_s15  ;;  %441 = vrot.lane.b32.xlu0 %v2525_v25, %s2279_s15 }
  0xaf   : > { %450 = vrot.lane.b32.xlu1 %v2529_v27, %s2279_s15  ;;  %448 = vrot.lane.b32.xlu0 %v2523_v24, %s2279_s15  ;;  %s2294_s15 = smov 14  }
  0xb3   : > { %481 = vrot.lane.b32.xlu1 %v2533_v29, %s2280_s16  ;;  %479 = vrot.lane.b32.xlu0 %v2525_v25, %s2280_s16 }
  0xb7   : > { %488 = vrot.lane.b32.xlu1 %v2529_v27, %s2280_s16  ;;  %486 = vrot.lane.b32.xlu0 %v2523_v24, %s2280_s16  ;;  %s2295_s16 = smov 13  }
  0xbb   : > { %519 = vrot.lane.b32.xlu1 %v2533_v29, %s2281_s21  ;;  %517 = vrot.lane.b32.xlu0 %v2525_v25, %s2281_s21 }
  0xbf   : > { %526 = vrot.lane.b32.xlu1 %v2529_v27, %s2281_s21  ;;  %524 = vrot.lane.b32.xlu0 %v2523_v24, %s2281_s21  ;;  %s2296_s21 = smov 3  }
  0xc3   : > { %570 = vrot.lane.b32.xlu1 %v2533_v29, %s2282_s24  ;;  %568 = vrot.lane.b32.xlu0 %v2525_v25, %s2282_s24 }
  0xc7   : > { %577 = vrot.lane.b32.xlu1 %v2529_v27, %s2282_s24  ;;  %575 = vrot.lane.b32.xlu0 %v2523_v24, %s2282_s24  ;;  %s2297_s24 = smov 2  }
  0xcb   : > { %595 = vrot.lane.b32.xlu1 %v2533_v29, %s2283_s26  ;;  %593 = vrot.lane.b32.xlu0 %v2525_v25, %s2283_s26 }
  0xcf   : > { %602 = vrot.lane.b32.xlu1 %v2529_v27, %s2283_s26  ;;  %600 = vrot.lane.b32.xlu0 %v2523_v24, %s2283_s26  ;;  %s2298_s26 = smov 1  }
  0xd3   : > { %622 = vrot.lane.b32.xlu1 %v2533_v29, %s2284_s28  ;;  %620 = vrot.lane.b32.xlu0 %v2525_v25, %s2284_s28 }
  0xd7   : > { %629 = vrot.lane.b32.xlu1 %v2529_v27, %s2284_s28  ;;  %627 = vrot.lane.b32.xlu0 %v2523_v24, %s2284_s28  ;;  %s2299_s28 = smov 127  }
  0xdb   : > { %649 = vrot.lane.b32.xlu1 %v2533_v29, %s2285_s30  ;;  %647 = vrot.lane.b32.xlu0 %v2525_v25, %s2285_s30 }
  0xdf   : > { %656 = vrot.lane.b32.xlu1 %v2529_v27, %s2285_s30  ;;  %654 = vrot.lane.b32.xlu0 %v2523_v24, %s2285_s30  ;;  %s2300_s30 = smov 126  }
  0xe3   : > { %674 = vrot.lane.b32.xlu1 %v2533_v29, %s2286_s7  ;;  %672 = vrot.lane.b32.xlu0 %v2525_v25, %s2286_s7 }
  0xe7   : > { %681 = vrot.lane.b32.xlu1 %v2529_v27, %s2286_s7  ;;  %679 = vrot.lane.b32.xlu0 %v2523_v24, %s2286_s7  ;;  %s2301_s7 = smov 125  }
  0xeb   : > { %701 = vrot.lane.b32.xlu1 %v2533_v29, %s2287_s29  ;;  %699 = vrot.lane.b32.xlu0 %v2525_v25, %s2287_s29 }
  0xef   : > { %708 = vrot.lane.b32.xlu1 %v2529_v27, %s2287_s29  ;;  %706 = vrot.lane.b32.xlu0 %v2523_v24, %s2287_s29  ;;  %s2302_s29 = smov 115  }
  0xf3   : > { %728 = vrot.lane.b32.xlu1 %v2533_v29, %s2288_s8  ;;  %726 = vrot.lane.b32.xlu0 %v2525_v25, %s2288_s8 }
  0xf7   : > { %735 = vrot.lane.b32.xlu1 %v2529_v27, %s2288_s8  ;;  %733 = vrot.lane.b32.xlu0 %v2523_v24, %s2288_s8  ;;  %s2303_s8 = smov 114  }
  0xfb   : > { %770 = vrot.lane.b32.xlu1 %v2533_v29, %s2289_s10  ;;  %768 = vrot.lane.b32.xlu0 %v2525_v25, %s2289_s10 }
  0xfd   : > { %v2589_v30 = vpop.permute.xlu1 %311  ;;  %v2591_v31 = vpop.permute.xlu0 %302 }
  0xff   : > { %777 = vrot.lane.b32.xlu1 %v2529_v27, %s2289_s10  ;;  %775 = vrot.lane.b32.xlu0 %v2523_v24, %s2289_s10  ;;  %s2304_s10 = smov 113  }
 0x101   : > { %v2595_v32 = vpop.permute.xlu0 %340  ;;  %v2597_v33 = vpop.permute.xlu1 %313 }
 0x103   : > { %795 = vrot.lane.b32.xlu1 %v2533_v29, %s2290_s22  ;;  %793 = vrot.lane.b32.xlu0 %v2525_v25, %s2290_s22 }
 0x105   : > { %v2601_v34 = vpop.permute.xlu0 %347  ;;  %v2603_v35 = vpop.permute.xlu1 %342 }
 0x107   : > { %802 = vrot.lane.b32.xlu1 %v2529_v27, %s2290_s22  ;;  %800 = vrot.lane.b32.xlu0 %v2523_v24, %s2290_s22  ;;  %s2305_s22 = smov 112  }
 0x109   : > { %v2607_v36 = vpop.permute.xlu0 %378  ;;  %v2609_v37 = vpop.permute.xlu1 %349 }
 0x10b   : > { %822 = vrot.lane.b32.xlu1 %v2533_v29, %s2291_s12  ;;  %820 = vrot.lane.b32.xlu0 %v2525_v25, %s2291_s12 }
 0x10d   : > { %v2613_v38 = vpop.permute.xlu1 %380  ;;  %v2615_v39 = vpop.permute.xlu0 %304 }
 0x10f   : > { %829 = vrot.lane.b32.xlu1 %v2529_v27, %s2291_s12  ;;  %827 = vrot.lane.b32.xlu0 %v2523_v24, %s2291_s12  ;;  %s2306_s12 = smov 111  }
 0x111   : > { %v2619_v40 = vpop.permute.xlu1 %387  ;;  %v2621_v41 = vpop.permute.xlu0 %385 }
 0x113   : > { %849 = vrot.lane.b32.xlu1 %v2533_v29, %s2292_s13  ;;  %847 = vrot.lane.b32.xlu0 %v2525_v25, %s2292_s13 }
 0x115   : > { %v2625_v42 = vpop.permute.xlu1 %418  ;;  %v2627_v43 = vpop.permute.xlu0 %416 }
 0x117   : > { %856 = vrot.lane.b32.xlu1 %v2529_v27, %s2292_s13  ;;  %854 = vrot.lane.b32.xlu0 %v2523_v24, %s2292_s13  ;;  %s2307_s13 = smov 110  }
 0x119   : > { %v2631_v44 = vpop.permute.xlu1 %425  ;;  %v2633_v45 = vpop.permute.xlu0 %423 }
 0x11b   : > { %874 = vrot.lane.b32.xlu1 %v2533_v29, %s2293_s14  ;;  %872 = vrot.lane.b32.xlu0 %v2525_v25, %s2293_s14 }
 0x11d   : > { %v2637_v46 = vpop.permute.xlu1 %443  ;;  %v2639_v47 = vpop.permute.xlu0 %441 }
 0x11f   : > { %881 = vrot.lane.b32.xlu1 %v2529_v27, %s2293_s14  ;;  %879 = vrot.lane.b32.xlu0 %v2523_v24, %s2293_s14  ;;  %s2308_s14 = smov 99  }
 0x121   : > { %v2643_v48 = vpop.permute.xlu1 %450  ;;  %v2645_v49 = vpop.permute.xlu0 %448 }
 0x123   : > { %901 = vrot.lane.b32.xlu1 %v2533_v29, %s2294_s15  ;;  %899 = vrot.lane.b32.xlu0 %v2525_v25, %s2294_s15 }
 0x125   : > { %v2649_v50 = vpop.permute.xlu1 %481  ;;  %v2651_v51 = vpop.permute.xlu0 %479 }
 0x127   : > { %908 = vrot.lane.b32.xlu1 %v2529_v27, %s2294_s15  ;;  %906 = vrot.lane.b32.xlu0 %v2523_v24, %s2294_s15  ;;  %s2827_s15 = sld [smem:[#allocation3 + $0x31]] }
 0x129   : > { %v2655_v52 = vpop.permute.xlu1 %488  ;;  %v2657_v53 = vpop.permute.xlu0 %486 }
 0x12a   : > { %4487 = vst [vmem:[#allocation26_spill] sm:$0xff] %v2655_v52  ;;  %4488 = vst [vmem:[#allocation27_spill] sm:$0xff] %v2657_v53 }
 0x12b   : > { %928 = vrot.lane.b32.xlu1 %v2533_v29, %s2295_s16  ;;  %926 = vrot.lane.b32.xlu0 %v2525_v25, %s2295_s16 }
 0x12d   : > { %v2661_v54 = vpop.permute.xlu1 %519  ;;  %v2663_v55 = vpop.permute.xlu0 %517 }
 0x12e   : > { %4489 = vst [vmem:[#allocation28_spill] sm:$0xff] %v2661_v54  ;;  %4490 = vst [vmem:[#allocation29_spill] sm:$0xff] %v2663_v55  ;;  %v1033_v55 = vstv %s2991_s0  ;;  %s3059_s0 = sld [smem:[#allocation3 + $0x4a]] }
 0x12f   : > { %935 = vrot.lane.b32.xlu1 %v2529_v27, %s2295_s16  ;;  %933 = vrot.lane.b32.xlu0 %v2523_v24, %s2295_s16  ;;  %s2829_s16 = sld [smem:[#allocation3 + $0x1]] }
 0x131   : > { %v2667_v56 = vpop.permute.xlu1 %526  ;;  %v2669_v57 = vpop.permute.xlu0 %524 }
 0x132   : > { %4491 = vst [vmem:[#allocation30_spill] sm:$0xff] %v2667_v56  ;;  %4492 = vst [vmem:[#allocation31_spill] sm:$0xff] %v2669_v57 }
 0x133   : > { %970 = vrot.lane.b32.xlu1 %v2533_v29, %s2296_s21  ;;  %968 = vrot.lane.b32.xlu0 %v2525_v25, %s2296_s21 }
 0x135   : > { %v2673_v58 = vpop.permute.xlu1 %570  ;;  %v2675_v59 = vpop.permute.xlu0 %568 }
 0x136   : > { %4493 = vst [vmem:[#allocation32_spill] sm:$0xff] %v2673_v58  ;;  %4494 = vst [vmem:[#allocation33_spill] sm:$0xff] %v2675_v59 }
 0x137   : > { %977 = vrot.lane.b32.xlu1 %v2529_v27, %s2296_s21  ;;  %975 = vrot.lane.b32.xlu0 %v2523_v24, %s2296_s21  ;;  %s2309_s21 = smov 98  }
 0x139   : > { %v2679_v60 = vpop.permute.xlu1 %577  ;;  %v2681_v61 = vpop.permute.xlu0 %575 }
 0x13a   : > { %4495 = vst [vmem:[#allocation34_spill] sm:$0xff] %v2679_v60  ;;  %4496 = vst [vmem:[#allocation35_spill] sm:$0xff] %v2681_v61 }
 0x13b   : > { %995 = vrot.lane.b32.xlu1 %v2533_v29, %s2297_s24  ;;  %993 = vrot.lane.b32.xlu0 %v2525_v25, %s2297_s24 }
 0x13d   : > { %v2685_v62 = vpop.permute.xlu1 %595  ;;  %v2687_v63 = vpop.permute.xlu0 %593 }
 0x13e   : > { %4497 = vst [vmem:[#allocation36_spill] sm:$0xff] %v2685_v62  ;;  %4498 = vst [vmem:[#allocation37_spill] sm:$0xff] %v2687_v63 }
 0x13f   : > { %1002 = vrot.lane.b32.xlu1 %v2529_v27, %s2297_s24  ;;  %1000 = vrot.lane.b32.xlu0 %v2523_v24, %s2297_s24  ;;  %s2832_s24 = sld [smem:[#allocation3 + $0x32]] }
 0x141   : > { %v2691_v0 = vpop.permute.xlu1 %602  ;;  %v2693_v1 = vpop.permute.xlu0 %600 }
 0x142   : > { %4499 = vst [vmem:[#allocation38_spill] sm:$0xff] %v2691_v0  ;;  %4500 = vst [vmem:[#allocation39_spill] sm:$0xff] %v2693_v1 }
 0x143   : > { %1022 = vrot.lane.b32.xlu1 %v2533_v29, %s2298_s26  ;;  %1020 = vrot.lane.b32.xlu0 %v2525_v25, %s2298_s26 }
 0x145   : > { %v2697_v2 = vpop.permute.xlu1 %622  ;;  %v2699_v3 = vpop.permute.xlu0 %620 }
 0x146   : > { %4501 = vst [vmem:[#allocation40_spill] sm:$0xff] %v2697_v2  ;;  %4502 = vst [vmem:[#allocation41_spill] sm:$0xff] %v2699_v3 }
 0x147   : > { %1029 = vrot.lane.b32.xlu1 %v2529_v27, %s2298_s26  ;;  %1027 = vrot.lane.b32.xlu0 %v2523_v24, %s2298_s26  ;;  %s2834_s26 = sld [smem:[#allocation3 + $0x2]] }
 0x149   : > { %v2703_v4 = vpop.permute.xlu1 %629  ;;  %v2705_v5 = vpop.permute.xlu0 %627 }
 0x14a   : > { %4503 = vst [vmem:[#allocation42_spill] sm:$0xff] %v2703_v4  ;;  %4504 = vst [vmem:[#allocation43_spill] sm:$0xff] %v2705_v5  ;;  %v2948_v4 = vld [vmem:[#allocation7 + $0x7] ss:$8 sm:$0x3] }
 0x14b   : > { %1061 = vrot.lane.b32.xlu1 %v2533_v29, %s2299_s28  ;;  %1059 = vrot.lane.b32.xlu0 %v2525_v25, %s2299_s28  ;;  %4560 = vst [vmem:[#allocation99_spill] sm:$0xff] %v2948_v4 }
 0x14d   : > { %v2709_v6 = vpop.permute.xlu1 %649  ;;  %v2711_v7 = vpop.permute.xlu0 %647 }
 0x14e   : > { %4505 = vst [vmem:[#allocation44_spill] sm:$0xff] %v2709_v6  ;;  %4506 = vst [vmem:[#allocation45_spill] sm:$0xff] %v2711_v7 }
 0x14f   : > { %1068 = vrot.lane.b32.xlu1 %v2529_v27, %s2299_s28  ;;  %1066 = vrot.lane.b32.xlu0 %v2523_v24, %s2299_s28  ;;  %s2837_s28 = sld [smem:[#allocation3]] }
 0x151   : > { %v2715_v8 = vpop.permute.xlu1 %656  ;;  %v2717_v9 = vpop.permute.xlu0 %654 }
 0x152   : > { %4507 = vst [vmem:[#allocation46_spill] sm:$0xff] %v2715_v8  ;;  %4508 = vst [vmem:[#allocation47_spill] sm:$0xff] %v2717_v9 }
 0x153   : > { %1088 = vrot.lane.b32.xlu1 %v2533_v29, %s2300_s30  ;;  %1086 = vrot.lane.b32.xlu0 %v2525_v25, %s2300_s30 }
 0x155   : > { %v2721_v10 = vpop.permute.xlu1 %674  ;;  %v2723_v11 = vpop.permute.xlu0 %672 }
 0x156   : > { %4509 = vst [vmem:[#allocation48_spill] sm:$0xff] %v2721_v10  ;;  %4510 = vst [vmem:[#allocation49_spill] sm:$0xff] %v2723_v11 }
 0x157   : > { %1095 = vrot.lane.b32.xlu1 %v2529_v27, %s2300_s30  ;;  %1093 = vrot.lane.b32.xlu0 %v2523_v24, %s2300_s30  ;;  %s2839_s30 = sld [smem:[#allocation3 + $0x33]] }
 0x159   : > { %v2727_v12 = vpop.permute.xlu1 %681  ;;  %v2729_v13 = vpop.permute.xlu0 %679 }
 0x15a   : > { %4511 = vst [vmem:[#allocation50_spill] sm:$0xff] %v2727_v12  ;;  %4512 = vst [vmem:[#allocation51_spill] sm:$0xff] %v2729_v13 }
 0x15b   : > { %1115 = vrot.lane.b32.xlu1 %v2533_v29, %s2301_s7  ;;  %1113 = vrot.lane.b32.xlu0 %v2525_v25, %s2301_s7 }
 0x15d   : > { %v2733_v14 = vpop.permute.xlu1 %701  ;;  %v2735_v15 = vpop.permute.xlu0 %699 }
 0x15e   : > { %4513 = vst [vmem:[#allocation52_spill] sm:$0xff] %v2733_v14  ;;  %4514 = vst [vmem:[#allocation53_spill] sm:$0xff] %v2735_v15  ;;  %v285_v14 = vld [vmem:[#allocation7 + $0x5] ss:$8 sm:$0x3] }
 0x15f   : > { %1122 = vrot.lane.b32.xlu1 %v2529_v27, %s2301_s7  ;;  %1120 = vrot.lane.b32.xlu0 %v2523_v24, %s2301_s7  ;;  %s2843_s7 = sld [smem:[#allocation3 + $0x3]] }
 0x161   : > { %v2739_v16 = vpop.permute.xlu1 %708  ;;  %v2741_v17 = vpop.permute.xlu0 %706 }
 0x162   : > { %4515 = vst [vmem:[#allocation54_spill] sm:$0xff] %v2739_v16  ;;  %4516 = vst [vmem:[#allocation55_spill] sm:$0xff] %v2741_v17  ;;  %v283_v17 = vld [vmem:[#allocation7 + $0x4] ss:$8 sm:$0x3] }
 0x163   : > { %1144 = vrot.lane.b32.xlu1 %v2533_v29, %s2302_s29  ;;  %1142 = vrot.lane.b32.xlu0 %v2525_v25, %s2302_s29 }
 0x165   : > { %v2745_v18 = vpop.permute.xlu1 %728  ;;  %v2747_v19 = vpop.permute.xlu0 %726  ;;  %4546 = sst [smem:[#allocation85_spill]] %s2843_s7  ;;  %s2952_s7 = sld [smem:[#allocation3 + $0x47]] }
 0x166   : > { %4517 = vst [vmem:[#allocation56_spill] sm:$0xff] %v2745_v18  ;;  %4518 = vst [vmem:[#allocation57_spill] sm:$0xff] %v2747_v19 }
 0x167   : > { %1151 = vrot.lane.b32.xlu1 %v2529_v27, %s2302_s29  ;;  %1149 = vrot.lane.b32.xlu0 %v2523_v24, %s2302_s29  ;;  %s2845_s29 = sld [smem:[#allocation3 + $0x34]] }
 0x169   : > { %v2751_v20 = vpop.permute.xlu1 %735  ;;  %v2753_v21 = vpop.permute.xlu0 %733 }
 0x16a   : > { %4519 = vst [vmem:[#allocation58_spill] sm:$0xff] %v2751_v20  ;;  %4520 = vst [vmem:[#allocation59_spill] sm:$0xff] %v2753_v21 }
 0x16b   : > { %1169 = vrot.lane.b32.xlu1 %v2533_v29, %s2303_s8  ;;  %1167 = vrot.lane.b32.xlu0 %v2525_v25, %s2303_s8 }
 0x16d   : > { %v2757_v22 = vpop.permute.xlu1 %770  ;;  %v2759_v23 = vpop.permute.xlu0 %768  ;;  %4547 = sst [smem:[#allocation86_spill]] %s2845_s29  ;;  %s2964_s29 = sld [smem:[#allocation3 + $0x46]] }
 0x16e   : > { %4521 = vst [vmem:[#allocation60_spill] sm:$0xff] %v2757_v22  ;;  %4522 = vst [vmem:[#allocation61_spill] sm:$0xff] %v2759_v23 }
 0x16f   : > { %1176 = vrot.lane.b32.xlu1 %v2529_v27, %s2303_s8  ;;  %1174 = vrot.lane.b32.xlu0 %v2523_v24, %s2303_s8  ;;  %s2849_s8 = sld [smem:[#allocation3 + $0x4]] }
 0x171   : > { %v2763_v26 = vpop.permute.xlu1 %777  ;;  %v2765_v28 = vpop.permute.xlu0 %775 }
 0x172   : > { %4523 = vst [vmem:[#allocation62_spill] sm:$0xff] %v2763_v26  ;;  %4524 = vst [vmem:[#allocation63_spill] sm:$0xff] %v2765_v28 }
 0x173   : > { %1196 = vrot.lane.b32.xlu1 %v2533_v29, %s2304_s10  ;;  %1194 = vrot.lane.b32.xlu0 %v2525_v25, %s2304_s10  ;;  %v984_v56 = vstv %s2964_s29  ;;  %s3050_s29 = sld [smem:[#allocation3 + $0x19]] }
 0x175   : > { %v2769_v20 = vpop.permute.xlu1 %795  ;;  %v2771_v21 = vpop.permute.xlu0 %793  ;;  %4549 = sst [smem:[#allocation88_spill]] %s2849_s8 }
 0x176   : > { %4525 = vst [vmem:[#allocation64_spill] sm:$0xff] %v2769_v20  ;;  %4526 = vst [vmem:[#allocation65_spill] sm:$0xff] %v2771_v21  ;;  %s2962_s8 = sld [smem:[#allocation3 + $0x15]] }
 0x177   : > { %1203 = vrot.lane.b32.xlu1 %v2529_v27, %s2304_s10  ;;  %1201 = vrot.lane.b32.xlu0 %v2523_v24, %s2304_s10  ;;  %s2851_s10 = sld [smem:[#allocation3 + $0x35]] }
 0x179   : > { %v2775_v23 = vpop.permute.xlu1 %802  ;;  %v2777_v22 = vpop.permute.xlu0 %800 }
 0x17a   : > { %4527 = vst [vmem:[#allocation66_spill] sm:$0xff] %v2775_v23  ;;  %4528 = vst [vmem:[#allocation67_spill] sm:$0xff] %v2777_v22 }
 0x17b   : > { %1223 = vrot.lane.b32.xlu1 %v2533_v29, %s2305_s22  ;;  %1221 = vrot.lane.b32.xlu0 %v2525_v25, %s2305_s22 }
 0x17c   : > { %v981_v59 = vstv %s2962_s8  ;;  %s3101_s8 = sld [smem:[#allocation3 + $0x1a]] }
 0x17d   : > { %v2781_v26 = vpop.permute.xlu1 %822  ;;  %v2783_v28 = vpop.permute.xlu0 %820 }
 0x17e   : > { %4529 = vst [vmem:[#allocation68_spill] sm:$0xff] %v2781_v26  ;;  %4530 = vst [vmem:[#allocation69_spill] sm:$0xff] %v2783_v28 }
 0x17f   : > { %1230 = vrot.lane.b32.xlu1 %v2529_v27, %s2305_s22  ;;  %1228 = vrot.lane.b32.xlu0 %v2523_v24, %s2305_s22  ;;  %s2854_s22 = sld [smem:[#allocation3 + $0x5]] }
 0x181   : > { %v2787_v21 = vpop.permute.xlu1 %829  ;;  %v2789_v20 = vpop.permute.xlu0 %827 }
 0x182   : > { %4531 = vst [vmem:[#allocation70_spill] sm:$0xff] %v2787_v21  ;;  %4532 = vst [vmem:[#allocation71_spill] sm:$0xff] %v2789_v20 }
 0x183   : > { %1248 = vrot.lane.b32.xlu1 %v2533_v29, %s2306_s12  ;;  %1246 = vrot.lane.b32.xlu0 %v2525_v25, %s2306_s12 }
 0x185   : > { %v2793_v22 = vpop.permute.xlu1 %849  ;;  %v2795_v23 = vpop.permute.xlu0 %847  ;;  %4550 = sst [smem:[#allocation89_spill]] %s2854_s22 }
 0x186   : > { %4533 = vst [vmem:[#allocation72_spill] sm:$0xff] %v2793_v22  ;;  %4534 = vst [vmem:[#allocation73_spill] sm:$0xff] %v2795_v23  ;;  %s2976_s22 = sld [smem:[#allocation3 + $0x16]] }
 0x187   : > { %1255 = vrot.lane.b32.xlu1 %v2529_v27, %s2306_s12  ;;  %1253 = vrot.lane.b32.xlu0 %v2523_v24, %s2306_s12  ;;  %s2857_s12 = sld [smem:[#allocation3 + $0x36]] }
 0x189   : > { %v2799_v28 = vpop.permute.xlu1 %856  ;;  %v2801_v26 = vpop.permute.xlu0 %854 }
 0x18a   : > { %4535 = vst [vmem:[#allocation74_spill] sm:$0xff] %v2799_v28  ;;  %4536 = vst [vmem:[#allocation75_spill] sm:$0xff] %v2801_v26 }
 0x18b   : > { %1275 = vrot.lane.b32.xlu1 %v2533_v29, %s2307_s13  ;;  %1273 = vrot.lane.b32.xlu0 %v2525_v25, %s2307_s13 }
 0x18c   : > { %v1006_v60 = vstv %s2976_s22  ;;  %s3103_s22 = sld [smem:[#allocation3 + $0x4b]] }
 0x18d   : > { %v2805_v20 = vpop.permute.xlu1 %874  ;;  %v2807_v21 = vpop.permute.xlu0 %872 }
 0x18e   : > { %4537 = vst [vmem:[#allocation76_spill] sm:$0xff] %v2805_v20  ;;  %4538 = vst [vmem:[#allocation77_spill] sm:$0xff] %v2807_v21 }
 0x18f   : > { %1282 = vrot.lane.b32.xlu1 %v2529_v27, %s2307_s13  ;;  %1280 = vrot.lane.b32.xlu0 %v2523_v24, %s2307_s13  ;;  %s2859_s13 = sld [smem:[#allocation3 + $0x6]] }
 0x191   : > { %v2811_v23 = vpop.permute.xlu1 %881  ;;  %v2813_v22 = vpop.permute.xlu0 %879 }
 0x192   : > { %4539 = vst [vmem:[#allocation78_spill] sm:$0xff] %v2811_v23  ;;  %4540 = vst [vmem:[#allocation79_spill] sm:$0xff] %v2813_v22  ;;  %v279_v22 = vld [vmem:[#allocation7 + $0x1] ss:$8 sm:$0x3] }
 0x193   : > { %1344 = vrot.lane.b32.xlu1 %v2533_v29, %s2308_s14  ;;  %1342 = vrot.lane.b32.xlu0 %v2525_v25, %s2308_s14 }
 0x195   : > { %v2817_v26 = vpop.permute.xlu1 %901  ;;  %v2819_v28 = vpop.permute.xlu0 %899  ;;  %4551 = sst [smem:[#allocation90_spill]] %s2859_s13  ;;  %s4561_s13 = smov 83  }
 0x196   : > { %4541 = vst [vmem:[#allocation80_spill] sm:$0xff] %v2817_v26  ;;  %4542 = vst [vmem:[#allocation81_spill] sm:$0xff] %v2819_v28  ;;  %v306_v26 = vlaneseq }
 0x197   : > { %1351 = vrot.lane.b32.xlu1 %v2529_v27, %s2308_s14  ;;  %1349 = vrot.lane.b32.xlu0 %v2523_v24, %s2308_s14  ;;  %s2863_s14 = sld [smem:[#allocation3 + $0x37]] }
 0x198   : > { %v2895_v16 = vand.u32 127, %v306_v26 }
 0x199   : > { %v2823_v21 = vpop.permute.xlu1 %908  ;;  %v2825_v20 = vpop.permute.xlu0 %906 }
 0x19a   : > { %4543 = vst [vmem:[#allocation82_spill] sm:$0xff] %v2823_v21  ;;  %4544 = vst [vmem:[#allocation83_spill] sm:$0xff] %v2825_v20  ;;  %v327_v21 = vshrl.u32 %v306_v26, 7  ;;  %v287_v26 = vld [vmem:[#allocation7 + $0x6] ss:$8 sm:$0x3] }
 0x19b   : > { %1369 = vrot.lane.b32.xlu1 %v2533_v29, %s2309_s21  ;;  %1367 = vrot.lane.b32.xlu0 %v2525_v25, %s2309_s21  ;;  %vm997_vm1 = vcmp.lt.s32.totalorder %v2895_v16, 2  ;;  %vm972_vm2 = vcmp.lt.s32.totalorder %v2895_v16, 3  ;;  %vm1024_vm3 = vcmp.lt.s32.totalorder %v2895_v16, 1  ;;  %vm308_vm4 = vcmp.lt.s32.totalorder %v2895_v16, 51 }
 0x19c   : > { %v2874_v23 = vsub.s32 0, %v327_v21  ;;  %v2876_v19 = vsub.s32 1, %v327_v21  ;;  %vm1063_vm5 = vcmp.lt.s32.totalorder %v2895_v16, 127  ;;  %vm344_vm6 = vcmp.lt.s32.totalorder %v2895_v16, 50 }
 0x19d   : > { %v2841_v28 = vpop.permute.xlu1 %928  ;;  %v2847_v20 = vpop.permute.xlu0 %926  ;;  %vm1090_vm7 = vcmp.lt.s32.totalorder %v2895_v16, 126  ;;  %vm382_vm8 = vcmp.lt.s32.totalorder %v2895_v16, 49  ;;  %vm1117_vm9 = vcmp.lt.s32.totalorder %v2895_v16, 125  ;;  %vm420_vm10 = vcmp.lt.s32.totalorder %v2895_v16, 48 }
 0x19e   : > { %4545 = vst [vmem:[#allocation84_spill] sm:$0xff] %v2841_v28  ;;  %4548 = vst [vmem:[#allocation87_spill] sm:$0xff] %v2847_v20  ;;  %v2906_v12 = vrot.slane %v279_v22, %v2874_v23  ;;  %v2909_v13 = vrot.slane %v279_v22, %v2876_v19  ;;  %v2943_v2 = vrot.slane %v283_v17, %v2874_v23  ;;  %vm445_vm11 = vcmp.lt.s32.totalorder %v2895_v16, 47 }
 0x19f   : > { %1376 = vrot.lane.b32.xlu1 %v2529_v27, %s2309_s21  ;;  %1374 = vrot.lane.b32.xlu0 %v2523_v24, %s2309_s21  ;;  %4555 = vst [vmem:[#allocation94_spill] sm:$0xff] %v2874_v23  ;;  %4556 = vst [vmem:[#allocation95_spill] sm:$0xff] %v2876_v19  ;;  %s2878_s21 = sld [smem:[#allocation3 + $0x39]]  ;;  %v2946_v10 = vrot.slane %v283_v17, %v2876_v19  ;;  %v2957_v9 = vrot.slane %v285_v14, %v2874_v23  ;;  %vm1146_vm12 = vcmp.lt.s32.totalorder %v2895_v16, 115 }
 0x1a0   : > { %v2960_v17 = vrot.slane %v285_v14, %v2876_v19  ;;  %v2971_v3 = vrot.slane %v287_v26, %v2874_v23  ;;  %v2974_v5 = vrot.slane %v287_v26, %v2876_v19  ;;  %vm483_vm13 = vcmp.lt.s32.totalorder %v2895_v16, 46 }
 0x1a1   : > { %v2861_v28 = vpop.permute.xlu1 %935  ;;  %v2867_v20 = vpop.permute.xlu0 %933  ;;  %vm1171_vm14 = vcmp.lt.s32.totalorder %v2895_v16, 114  ;;  %vm1198_vm15 = vcmp.lt.s32.totalorder %v2895_v16, 113  ;;  %vm521_vm0 = vcmp.lt.s32.totalorder %v2895_v16, 45 }
 0x1a2   : > { %4552 = vst [vmem:[#allocation91_spill] sm:$0xff] %v2861_v28  ;;  %4553 = vst [vmem:[#allocation92_spill] sm:$0xff] %v2867_v20  ;;  %v277_v28 = vld [vmem:[#allocation7] ss:$8 sm:$0x3] }
 0x1a3   : > { %1396 = vrot.lane.b32.xlu1 %v2533_v29, %s2310_s3  ;;  %1394 = vrot.lane.b32.xlu0 %v2525_v25, %s2310_s3  ;;  %v281_v20 = vld [vmem:[#allocation7 + $0x2] ss:$8 sm:$0x3]  ;;  %v2917_v6 = vrot.slane %v277_v28, %v2874_v23  ;;  %v2920_v11 = vrot.slane %v277_v28, %v2876_v19 }
 0x1a4   : > { %v2930_v8 = vrot.slane %v281_v20, %v2874_v23  ;;  %v2933_v15 = vrot.slane %v281_v20, %v2876_v19  ;;  %v1009_v20 = vstv %s2952_s7  ;;  %s3046_s7 = sld [smem:[#allocation3 + $0x40]] }
 0x1a5   : > { %v2887_v18 = vpop.permute.xlu1 %970  ;;  %v2893_v21 = vpop.permute.xlu0 %968 }
 0x1a7   : > { %1403 = vrot.lane.b32.xlu1 %v2529_v27, %s2310_s3  ;;  %1401 = vrot.lane.b32.xlu0 %v2523_v24, %s2310_s3  ;;  %s2936_s3 = sld [smem:[#allocation3 + $0xe]] }
 0x1a9   : > { %v2926_v22 = vpop.permute.xlu1 %977  ;;  %v976_v28 = vpop.permute.xlu0 %975 }
 0x1aa   : > { %v979_v58 = vsel %vm972_vm2, %v976_v28, %v2926_v22  ;;  %v980_v26 = vsel %vm972_vm2, %v2926_v22, %v976_v28  ;;  %v973_v22 = vsel %vm972_vm2, %v2893_v21, %v2887_v18  ;;  %v974_v28 = vsel %vm972_vm2, %v2887_v18, %v2893_v21 }
 0x1ab   : > { %1544 = vrot.lane.b32.xlu1 %v2533_v29, %s4427_s1  ;;  %1542 = vrot.lane.b32.xlu0 %v2525_v25, %s4427_s1  ;;  %s2987_s1 = sld [smem:[#allocation3 + $0xf]]  ;;  %v986_v57 = vmul.f32 %v984_v56, %v979_v58  ;;  %v1036_v18 = vstv %s3000_s6  ;;  %s2313_s6 = smov 81   ;;  %vm1225_vm2 = vcmp.lt.s32.totalorder %v2895_v16, 112 }
 0x1ad   : > { %v996_v14 = vpop.permute.xlu1 %995  ;;  %v994_v7 = vpop.permute.xlu0 %993 }
 0x1af   : > { %1551 = vrot.lane.b32.xlu1 %v2529_v27, %s4561_s13  ;;  %1549 = vrot.lane.b32.xlu0 %v2523_v24, %s4561_s13  ;;  %s2312_s13 = smov 82  }
 0x1b1   : > { %v1003_v23 = vpop.permute.xlu1 %1002  ;;  %v1001_v1 = vpop.permute.xlu0 %1000 }
 0x1b2   : > { %v1004_v61 = vsel %vm997_vm1, %v1001_v1, %v1003_v23  ;;  %v1005_v63 = vsel %vm997_vm1, %v1003_v23, %v1001_v1  ;;  %v998_v1 = vsel %vm997_vm1, %v994_v7, %v996_v14  ;;  %v999_v23 = vsel %vm997_vm1, %v996_v14, %v994_v7 }
 0x1b3   : > { %1569 = vrot.lane.b32.xlu1 %v2533_v29, %s2312_s13  ;;  %1567 = vrot.lane.b32.xlu0 %v2525_v25, %s2312_s13  ;;  %v1010_v62 = vmul.f32 %v1009_v20, %v1005_v63  ;;  %v1011_v4 = vmul.f32 %v1009_v20, %v1004_v61  ;;  %v985_v14 = vmul.f32 %v984_v56, %v980_v26  ;;  %vm572_vm1 = vcmp.lt.s32.totalorder %v2895_v16, 35 }
 0x1b4   : > { %v1007_v54 = vmul.f32 %v1006_v60, %v999_v23  ;;  %v1008_v52 = vmul.f32 %v1006_v60, %v998_v1  ;;  %v982_v61 = vmul.f32 %v981_v59, %v974_v28  ;;  %v983_v63 = vmul.f32 %v981_v59, %v973_v22 }
 0x1b5   : > { %v1023_v0 = vpop.permute.xlu1 %1022  ;;  %v1021_v19 = vpop.permute.xlu0 %1020  ;;  %v1047_v60 = vstv %s3010_s20  ;;  %v1050_v1 = vstv %s3012_s18  ;;  %s3070_s18 = sld [smem:[#allocation3 + $0x10]]  ;;  %s3072_s20 = sld [smem:[#allocation3 + $0x41]] }
 0x1b6   : > { %v1025_v21 = vsel %vm1024_vm3, %v1021_v19, %v1023_v0  ;;  %v1026_v56 = vsel %vm1024_vm3, %v1023_v0, %v1021_v19  ;;  %v1012_v20 = vadd.f32 %v1010_v62, %v1007_v54  ;;  %v1013_v26 = vadd.f32 %v1011_v4, %v1008_v52 }
 0x1b7   : > { %1576 = vrot.lane.b32.xlu1 %v2529_v27, %s2312_s13  ;;  %1574 = vrot.lane.b32.xlu0 %v2523_v24, %s2312_s13  ;;  %v987_v7 = vadd.f32 %v985_v14, %v982_v61  ;;  %v988_v53 = vadd.f32 %v986_v57, %v983_v63  ;;  %v1034_v0 = vmul.f32 %v1033_v55, %v1026_v56  ;;  %s2314_s13 = smov 96  }
 0x1b8   : > { %v1035_v19 = vmul.f32 %v1033_v55, %v1025_v21  ;;  %v1048_v62 = vmul.f32 %v1047_v60, %v2525_v25  ;;  %v1051_v4 = vmul.f32 %v1050_v1, %v2523_v24  ;;  %v1052_v28 = vmul.f32 %v1050_v1, %v2529_v27 }
 0x1b9   : > { %v1030_v58 = vpop.permute.xlu1 %1029  ;;  %v1028_v23 = vpop.permute.xlu0 %1027  ;;  %v1049_v14 = vmul.f32 %v1047_v60, %v2533_v29  ;;  %v1014_v55 = vmul.f32 %v1012_v20, %v2906_v12  ;;  %v1015_v61 = vmul.f32 %v1013_v26, %v2909_v13  ;;  %v989_v60 = vmul.f32 %v987_v7, %v2917_v6 }
 0x1ba   : > { %v1031_v59 = vsel %vm1024_vm3, %v1028_v23, %v1030_v58  ;;  %v1032_v22 = vsel %vm1024_vm3, %v1030_v58, %v1028_v23  ;;  %v1072_v58 = vstv %s3050_s29  ;;  %v990_v20 = vmul.f32 %v988_v53, %v2920_v11  ;;  %s3123_s29 = sld [smem:[#allocation3 + $0x11]] }
 0x1bb   : > { %1596 = vrot.lane.b32.xlu1 %v2533_v29, %s2313_s6  ;;  %v1037_v52 = vmul.f32 %v1036_v18, %v1032_v22  ;;  %v1038_v54 = vmul.f32 %v1036_v18, %v1031_v59  ;;  %1594 = vrot.lane.b32.xlu0 %v2525_v25, %s2313_s6  ;;  %v315_v22 = vsel %vm308_vm4, %v2589_v30, %v2597_v33  ;;  %vm597_vm3 = vcmp.lt.s32.totalorder %v2895_v16, 34 }
 0x1bc   : > { %v1053_v7 = vadd.f32 %v1051_v4, %v1048_v62  ;;  %v1016_v53 = vadd.f32 %v1014_v55, %v989_v60 }
 0x1bd   : > { %v1062_v57 = vpop.permute.xlu1 %1061  ;;  %v1039_v18 = vadd.f32 %v1037_v52, %v1034_v0  ;;  %v1040_v63 = vadd.f32 %v1038_v54, %v1035_v19  ;;  %v1060_v21 = vpop.permute.xlu0 %1059  ;;  %v316_v0 = vsel %vm308_vm4, %v2597_v33, %v2589_v30  ;;  %v1075_v52 = vstv %s3059_s0  ;;  %s3157_s0 = sld [smem:[#allocation3 + $0x1b]] }
 0x1be   : > { %v1064_v23 = vsel %vm1063_vm5, %v1060_v21, %v1062_v57  ;;  %v1065_v59 = vsel %vm1063_vm5, %v1062_v57, %v1060_v21  ;;  %v1017_v54 = vadd.f32 %v1015_v61, %v990_v20 }
 0x1bf   : > { %1603 = vrot.lane.b32.xlu1 %v2529_v27, %s2313_s6  ;;  %v1041_v26 = vmul.f32 %v1039_v18, %v2930_v8  ;;  %v1042_v1 = vmul.f32 %v1040_v63, %v2933_v15  ;;  %1601 = vrot.lane.b32.xlu0 %v2523_v24, %s2313_s6  ;;  %v1054_v18 = vadd.f32 %v1052_v28, %v1049_v14  ;;  %v4562_v28 = vstv %s2827_s15  ;;  %s3133_s15 = sld [smem:[#allocation3 + $0x42]]  ;;  %s3159_s6 = sld [smem:[#allocation3 + $0x4c]] }
 0x1c0   : > { %v1073_v63 = vmul.f32 %v1072_v58, %v1064_v23  ;;  %v1074_v21 = vmul.f32 %v1072_v58, %v1065_v59  ;;  %v3114_v14 = vmul.f32 %v4562_v28, %v316_v0  ;;  %v4563_v23 = vmov %v4562_v28  ;;  %4564 = sst [smem:[#allocation100_spill]] %s3123_s29 }
 0x1c1   : > { %v1069_v19 = vpop.permute.xlu1 %1068  ;;  %v1067_v57 = vpop.permute.xlu0 %1066  ;;  %v1043_v62 = vadd.f32 %v1041_v26, %v1016_v53  ;;  %v1044_v4 = vadd.f32 %v1042_v1, %v1017_v54  ;;  %v3118_v58 = vmul.f32 %v4563_v23, %v315_v22  ;;  %v346_v26 = vsel %vm344_vm6, %v2603_v35, %v2595_v32 }
 0x1c2   : > { %v1070_v30 = vsel %vm1063_vm5, %v1067_v57, %v1069_v19  ;;  %v1071_v33 = vsel %vm1063_vm5, %v1069_v19, %v1067_v57  ;;  %v352_v1 = vsel %vm344_vm6, %v2609_v37, %v2601_v34  ;;  %v351_v53 = vsel %vm344_vm6, %v2601_v34, %v2609_v37 }
 0x1c3   : > { %1423 = vrot.lane.b32.xlu1 %v2533_v29, %s2314_s13  ;;  %v1076_v55 = vmul.f32 %v1075_v52, %v1070_v30  ;;  %v1077_v61 = vmul.f32 %v1075_v52, %v1071_v33  ;;  %1421 = vrot.lane.b32.xlu0 %v2525_v25, %s2314_s13  ;;  %v345_v52 = vsel %vm344_vm6, %v2595_v32, %v2603_v35  ;;  %v4565_v35 = vstv %s2829_s16  ;;  %s3191_s16 = sld [smem:[#allocation3 + $0x12]] }
 0x1c4   : > { %v354_v33 = vmul.f32 %v4565_v35, %v346_v26  ;;  %v4566_v34 = vstv %s2832_s24  ;;  %v1102_v28 = vstv %s3103_s22  ;;  %s3193_s24 = sld [smem:[#allocation3 + $0x43]]  ;;  %s3217_s22 = sld [smem:[#allocation3 + $0x4d]]  ;;  %vm624_vm5 = vcmp.lt.s32.totalorder %v2895_v16, 33 }
 0x1c5   : > { %v1089_v20 = vpop.permute.xlu1 %1088  ;;  %v1078_v22 = vadd.f32 %v1076_v55, %v1073_v63  ;;  %v1079_v0 = vadd.f32 %v1077_v61, %v1074_v21  ;;  %v1087_v19 = vpop.permute.xlu0 %1086  ;;  %v1055_v63 = vadd.f32 %v1053_v7, %v1043_v62  ;;  %v1056_v21 = vadd.f32 %v1054_v18, %v1044_v4 }
 0x1c6   : > { %v1091_v54 = vsel %vm1090_vm7, %v1087_v19, %v1089_v20  ;;  %v1092_v57 = vsel %vm1090_vm7, %v1089_v20, %v1087_v19  ;;  %v357_v37 = vmul.f32 %v4566_v34, %v352_v1  ;;  %v1099_v55 = vstv %s3101_s8  ;;  %s2315_s8 = smov 95  }
 0x1c7   : > { %1430 = vrot.lane.b32.xlu1 %v2529_v27, %s2314_s13  ;;  %v1080_v30 = vmul.f32 %v1078_v22, %v2943_v2  ;;  %v1081_v32 = vmul.f32 %v1079_v0, %v2946_v10  ;;  %1428 = vrot.lane.b32.xlu0 %v2523_v24, %s2314_s13  ;;  %v309_v7 = vsel %vm308_vm4, %v2591_v31, %v2615_v39  ;;  %s2316_s13 = smov 109   ;;  %vm1277_vm6 = vcmp.lt.s32.totalorder %v2895_v16, 110 }
 0x1c8   : > { %v310_v18 = vsel %vm308_vm4, %v2615_v39, %v2591_v31  ;;  %v4567_v20 = vmov %v4566_v34  ;;  %v1100_v31 = vmul.f32 %v1099_v55, %v1091_v54  ;;  %v1101_v39 = vmul.f32 %v1099_v55, %v1092_v57 }
 0x1c9   : > { %v1096_v61 = vpop.permute.xlu1 %1095  ;;  %v1082_v62 = vadd.f32 %v1080_v30, %v1055_v63  ;;  %v1083_v4 = vadd.f32 %v1081_v32, %v1056_v21  ;;  %v1094_v23 = vpop.permute.xlu0 %1093  ;;  %v358_v26 = vmul.f32 %v4567_v20, %v351_v53  ;;  %v4568_v63 = vmov %v4565_v35 }
 0x1ca   : > { %v1097_v1 = vsel %vm1090_vm7, %v1094_v23, %v1096_v61  ;;  %v1098_v22 = vsel %vm1090_vm7, %v1096_v61, %v1094_v23  ;;  %v355_v53 = vmul.f32 %v4568_v63, %v345_v52  ;;  %v4569_v21 = vstv %s2837_s28  ;;  %s3215_s28 = sld [smem:[#allocation3 + $0x1c]] }
 0x1cb   : > { %1448 = vrot.lane.b32.xlu1 %v2533_v29, %s2315_s8  ;;  %v1103_v0 = vmul.f32 %v1102_v28, %v1097_v1  ;;  %v1104_v19 = vmul.f32 %v1102_v28, %v1098_v22  ;;  %1446 = vrot.lane.b32.xlu0 %v2525_v25, %s2315_s8  ;;  %v318_v30 = vmul.f32 %v4569_v21, %v310_v18  ;;  %v860_v34 = vstv %s3123_s29  ;;  %s3331_s29 = sld [smem:[#allocation3 + $0x4f]] }
 0x1cc   : > { %v4570_v32 = vmov %v4569_v21  ;;  %v359_v61 = vadd.f32 %v357_v37, %v354_v33  ;;  %v863_v23 = vstv %s3133_s15  ;;  %v360_v54 = vadd.f32 %v358_v26, %v355_v53  ;;  %s4089_s15 = sld [smem:[#allocation3 + $0x58]] }
 0x1cd   : > { %v319_v35 = vmul.f32 %v4570_v32, %v309_v7  ;;  %v1116_v20 = vpop.permute.xlu1 %1115  ;;  %v1105_v59 = vadd.f32 %v1103_v0, %v1100_v31  ;;  %v1106_v60 = vadd.f32 %v1104_v19, %v1101_v39  ;;  %v1114_v56 = vpop.permute.xlu0 %1113  ;;  %v390_v57 = vsel %vm382_vm8, %v2619_v40, %v2621_v41 }
 0x1ce   : > { %v1118_v52 = vsel %vm1117_vm9, %v1114_v56, %v1116_v20  ;;  %v1119_v33 = vsel %vm1117_vm9, %v1116_v20, %v1114_v56  ;;  %v383_v37 = vsel %vm382_vm8, %v2607_v36, %v2613_v38  ;;  %v389_v55 = vsel %vm382_vm8, %v2621_v41, %v2619_v40 }
 0x1cf   : > { %1455 = vrot.lane.b32.xlu1 %v2529_v27, %s2315_s8  ;;  %v1107_v28 = vmul.f32 %v1105_v59, %v2957_v9  ;;  %v1108_v7 = vmul.f32 %v1106_v60, %v2960_v17  ;;  %1453 = vrot.lane.b32.xlu0 %v2523_v24, %s2315_s8  ;;  %v323_v56 = vadd.f32 %v3114_v14, %v318_v30  ;;  %v1126_v26 = vstv %s3157_s0  ;;  %s3268_s0 = sld [smem:[#allocation3 + $0x13]] }
 0x1d0   : > { %v324_v18 = vadd.f32 %v3118_v58, %v319_v35  ;;  %v1129_v22 = vstv %s3159_s6  ;;  %v384_v40 = vsel %vm382_vm8, %v2613_v38, %v2607_v36  ;;  %v4571_v41 = vstv %s2839_s30  ;;  %s3257_s30 = sld [smem:[#allocation3 + $0x4e]]  ;;  %s2317_s6 = smov 94  }
 0x1d1   : > { %v1123_v1 = vpop.permute.xlu1 %1122  ;;  %v395_v59 = vmul.f32 %v4571_v41, %v390_v57  ;;  %v1109_v60 = vadd.f32 %v1107_v28, %v1082_v62  ;;  %v1110_v14 = vadd.f32 %v1108_v7, %v1083_v4  ;;  %v1121_v31 = vpop.permute.xlu0 %1120  ;;  %v4572_v58 = vmov %v4571_v41  ;;  %s4575_s8 = sld [smem:[#allocation85_spill]] }
 0x1d2   : > { %v396_v39 = vmul.f32 %v4572_v58, %v389_v55  ;;  %v1124_v0 = vsel %vm1117_vm9, %v1121_v31, %v1123_v1  ;;  %v1125_v19 = vsel %vm1117_vm9, %v1123_v1, %v1121_v31  ;;  %v1127_v36 = vmul.f32 %v1126_v26, %v1118_v52 }
 0x1d3   : > { %1302 = vrot.lane.b32.xlu1 %v2533_v29, %s2316_s13  ;;  %v1128_v38 = vmul.f32 %v1126_v26, %v1119_v33  ;;  %v1130_v62 = vmul.f32 %v1129_v22, %v1124_v0  ;;  %v1131_v4 = vmul.f32 %v1129_v22, %v1125_v19  ;;  %1300 = vrot.lane.b32.xlu0 %v2525_v25, %s2316_s13  ;;  %v4573_v35 = vstv %s2834_s26  ;;  %s3255_s26 = sld [smem:[#allocation3 + $0x1d]] }
 0x1d4   : > { %v372_v63 = vmul.f32 %v2906_v12, %v359_v61  ;;  %v373_v53 = vmul.f32 %v2909_v13, %v360_v54  ;;  %v336_v21 = vmul.f32 %v2917_v6, %v323_v56  ;;  %v337_v30 = vmul.f32 %v2920_v11, %v324_v18 }
 0x1d5   : > { %v1145_v32 = vpop.permute.xlu1 %1144  ;;  %v392_v20 = vmul.f32 %v4573_v35, %v384_v40  ;;  %v4574_v57 = vmov %v4573_v35  ;;  %v1132_v52 = vadd.f32 %v1130_v62, %v1127_v36  ;;  %v1133_v33 = vadd.f32 %v1131_v4, %v1128_v38  ;;  %v1143_v28 = vpop.permute.xlu0 %1142 }
 0x1d6   : > { %v393_v55 = vmul.f32 %v4574_v57, %v383_v37  ;;  %v885_v7 = vstv %s3191_s16  ;;  %v888_v26 = vstv %s3193_s24  ;;  %v1147_v61 = vsel %vm1146_vm12, %v1143_v28, %v1145_v32  ;;  %s4097_s16 = sld [smem:[#allocation3 + $0x28]]  ;;  %s4099_s24 = sld [smem:[#allocation3 + $0x59]] }
 0x1d7   : > { %v1148_v54 = vsel %vm1146_vm12, %v1145_v32, %v1143_v28  ;;  %1309 = vrot.lane.b32.xlu1 %v2529_v27, %s2316_s13  ;;  %v397_v56 = vadd.f32 %v395_v59, %v392_v20  ;;  %v1134_v1 = vmul.f32 %v1132_v52, %v2971_v3  ;;  %v1135_v37 = vmul.f32 %v1133_v33, %v2974_v5 }
 0x1d8   : > { %v398_v18 = vadd.f32 %v396_v39, %v393_v55  ;;  %1307 = vrot.lane.b32.xlu0 %v2523_v24, %s2316_s13  ;;  %v374_v22 = vadd.f32 %v372_v63, %v336_v21  ;;  %v375_v40 = vadd.f32 %v373_v53, %v337_v30  ;;  %v1155_v41 = vstv %s3215_s28  ;;  %s4576_s28 = sld [smem:[#allocation86_spill]]  ;;  %s3329_s13 = sld [smem:[#allocation3 + $0x1e]] }
 0x1d9   : > { %v1152_v31 = vpop.permute.xlu1 %1151  ;;  %v1158_v58 = vstv %s3217_s22  ;;  %v421_v59 = vsel %vm420_vm10, %v2627_v43, %v2625_v42  ;;  %v422_v39 = vsel %vm420_vm10, %v2625_v42, %v2627_v43  ;;  %v3270_v0 = vadd.f32 %v1134_v1, %v1109_v60  ;;  %v1150_v36 = vpop.permute.xlu0 %1149  ;;  %s4577_s22 = sld [smem:[#allocation88_spill]] }
 0x1da   : > { %v3272_v19 = vadd.f32 %v1135_v37, %v1110_v14  ;;  %v453_v38 = vsel %vm445_vm11, %v2643_v48, %v2645_v49  ;;  %v1153_v62 = vsel %vm1146_vm12, %v1150_v36, %v1152_v31  ;;  %v1154_v42 = vsel %vm1146_vm12, %v1152_v31, %v1150_v36 }
 0x1db   : > { %1475 = vrot.lane.b32.xlu1 %v2533_v29, %s2317_s6  ;;  %v1156_v43 = vmul.f32 %v1155_v41, %v1147_v61  ;;  %v1157_v60 = vmul.f32 %v1155_v41, %v1148_v54  ;;  %v1159_v14 = vmul.f32 %v1158_v58, %v1153_v62  ;;  %v1160_v4 = vmul.f32 %v1158_v58, %v1154_v42 }
 0x1dc   : > { %1473 = vrot.lane.b32.xlu0 %v2525_v25, %s2317_s6  ;;  %v410_v63 = vmul.f32 %v2930_v8, %v397_v56  ;;  %v411_v53 = vmul.f32 %v2933_v15, %v398_v18  ;;  %v427_v21 = vsel %vm420_vm10, %v2633_v45, %v2631_v44  ;;  %v428_v30 = vsel %vm420_vm10, %v2631_v44, %v2633_v45 }
 0x1dd   : > { %v1170_v32 = vpop.permute.xlu1 %1169  ;;  %v447_v35 = vsel %vm445_vm11, %v2637_v46, %v2639_v47  ;;  %v452_v20 = vsel %vm445_vm11, %v2645_v49, %v2643_v48  ;;  %v1161_v57 = vadd.f32 %v1159_v14, %v1156_v43  ;;  %v1162_v55 = vadd.f32 %v1160_v4, %v1157_v60  ;;  %v1168_v52 = vpop.permute.xlu0 %1167  ;;  %v4670_v60 = vld [vmem:[#allocation66_spill] sm:$0xff] }
 0x1de   : > { %v446_v44 = vsel %vm445_vm11, %v2639_v47, %v2637_v46  ;;  %v4578_v45 = vstv %s2851_s10  ;;  %v1172_v28 = vsel %vm1171_vm14, %v1168_v52, %v1170_v32  ;;  %v1173_v61 = vsel %vm1171_vm14, %v1170_v32, %v1168_v52  ;;  %s2318_s10 = smov 80  }
 0x1df   : > { %v458_v33 = vmul.f32 %v4578_v45, %v453_v38  ;;  %1482 = vrot.lane.b32.xlu1 %v2529_v27, %s2317_s6  ;;  %v4579_v48 = vstv %s4575_s8  ;;  %v4581_v18 = vstv %s4576_s28  ;;  %v4583_v47 = vstv %s4577_s22  ;;  %s4588_s8 = sld [smem:[#allocation89_spill]]  ;;  %s3390_s28 = sld [smem:[#allocation3 + $0x1f]] }
 0x1e0   : > { %v430_v49 = vmul.f32 %v4579_v48, %v422_v39  ;;  %v4580_v54 = vmov %v4579_v48  ;;  %v433_v1 = vmul.f32 %v4581_v18, %v428_v30  ;;  %v4582_v37 = vmov %v4581_v18  ;;  %1480 = vrot.lane.b32.xlu0 %v2523_v24, %s2317_s6  ;;  %s3371_s6 = sld [smem:[#allocation3 + $0x45]]  ;;  %s3392_s22 = sld [smem:[#allocation3 + $0x50]] }
 0x1e1   : > { %v431_v56 = vmul.f32 %v4580_v54, %v421_v59  ;;  %v434_v46 = vmul.f32 %v4582_v37, %v427_v21  ;;  %v455_v41 = vmul.f32 %v4583_v47, %v447_v35  ;;  %v4584_v31 = vmov %v4578_v45  ;;  %v1177_v38 = vpop.permute.xlu1 %1176  ;;  %v1175_v14 = vpop.permute.xlu0 %1174 }
 0x1e2   : > { %v459_v58 = vmul.f32 %v4584_v31, %v452_v20  ;;  %v1180_v36 = vstv %s3255_s26  ;;  %v1183_v62 = vstv %s3257_s30  ;;  %v3333_v39 = vadd.f32 %v410_v63, %v374_v22  ;;  %s3354_s26 = sld [smem:[#allocation3 + $0x44]] }
 0x1e3   : > { %v3335_v59 = vadd.f32 %v411_v53, %v375_v40  ;;  %v4585_v42 = vmov %v4583_v47  ;;  %v460_v4 = vadd.f32 %v458_v33, %v455_v41  ;;  %v1178_v21 = vsel %vm1171_vm14, %v1175_v14, %v1177_v38  ;;  %1623 = vrot.lane.b32.xlu1 %v2533_v29, %s2318_s10  ;;  %v4586_v33 = vld [vmem:[#allocation27_spill] sm:$0xff]  ;;  %s3364_s30 = sld [smem:[#allocation3 + $0x14]] }
 0x1e4   : > { %v456_v43 = vmul.f32 %v4585_v42, %v446_v44  ;;  %v1179_v30 = vsel %vm1171_vm14, %v1177_v38, %v1175_v14  ;;  %v1181_v22 = vmul.f32 %v1180_v36, %v1172_v28  ;;  %v1182_v40 = vmul.f32 %v1180_v36, %v1173_v61  ;;  %1621 = vrot.lane.b32.xlu0 %v2525_v25, %s2318_s10  ;;  %v4587_v28 = vld [vmem:[#allocation26_spill] sm:$0xff] }
 0x1e5   : > { %v1184_v63 = vmul.f32 %v1183_v62, %v1178_v21  ;;  %v1185_v53 = vmul.f32 %v1183_v62, %v1179_v30  ;;  %v435_v32 = vadd.f32 %v433_v1, %v430_v49  ;;  %v436_v35 = vadd.f32 %v434_v46, %v431_v56  ;;  %v1197_v44 = vpop.permute.xlu1 %1196  ;;  %v1195_v54 = vpop.permute.xlu0 %1194 }
 0x1e6   : > { %v461_v20 = vadd.f32 %v459_v58, %v456_v43  ;;  %v484_v52 = vsel %vm483_vm13, %v2651_v51, %v2649_v50  ;;  %v485_v45 = vsel %vm483_vm13, %v2649_v50, %v2651_v51  ;;  %v491_v61 = vsel %vm483_vm13, %v4587_v28, %v4586_v33 }
 0x1e7   : > { %v1186_v48 = vadd.f32 %v1184_v63, %v1181_v22  ;;  %v1187_v49 = vadd.f32 %v1185_v53, %v1182_v40  ;;  %v473_v56 = vmul.f32 %v2943_v2, %v460_v4  ;;  %v490_v50 = vsel %vm483_vm13, %v4586_v33, %v4587_v28  ;;  %1630 = vrot.lane.b32.xlu1 %v2529_v27, %s2318_s10 }
 0x1e8   : > { %v1199_v51 = vsel %vm1198_vm15, %v1195_v54, %v1197_v44  ;;  %v1200_v18 = vsel %vm1198_vm15, %v1197_v44, %v1195_v54  ;;  %v1163_v1 = vmul.f32 %v1161_v57, %v2917_v6  ;;  %v1164_v37 = vmul.f32 %v1162_v55, %v2920_v11  ;;  %1628 = vrot.lane.b32.xlu0 %v2523_v24, %s2318_s10  ;;  %s4597_s10 = sld [smem:[#allocation90_spill]] }
 0x1e9   : > { %v1188_v46 = vmul.f32 %v1186_v48, %v2906_v12  ;;  %v1189_v47 = vmul.f32 %v1187_v49, %v2909_v13  ;;  %v474_v41 = vmul.f32 %v2946_v10, %v461_v20  ;;  %v4589_v31 = vstv %s2857_s12  ;;  %v1204_v38 = vpop.permute.xlu1 %1203  ;;  %v1202_v21 = vpop.permute.xlu0 %1201  ;;  %s3435_s12 = sld [smem:[#allocation3 + $0x20]] }
 0x1ea   : > { %v496_v58 = vmul.f32 %v4589_v31, %v491_v61  ;;  %v1207_v36 = vstv %s3329_s13  ;;  %v1210_v62 = vstv %s3331_s29  ;;  %v4590_v57 = vstv %s4588_s8  ;;  %s2319_s29 = smov 79   ;;  %s3437_s13 = sld [smem:[#allocation3 + $0x51]] }
 0x1eb   : > { %v493_v55 = vmul.f32 %v4590_v57, %v485_v45  ;;  %v4591_v42 = vmov %v4589_v31  ;;  %v1190_v14 = vadd.f32 %v1188_v46, %v1163_v1  ;;  %v1191_v4 = vadd.f32 %v1189_v47, %v1164_v37  ;;  %1648 = vrot.lane.b32.xlu1 %v2533_v29, %s2319_s29  ;;  %s2320_s8 = smov 93  }
 0x1ec   : > { %v497_v43 = vmul.f32 %v4591_v42, %v490_v50  ;;  %v4592_v30 = vmov %v4590_v57  ;;  %v1205_v40 = vsel %vm1198_vm15, %v1202_v21, %v1204_v38  ;;  %v1206_v63 = vsel %vm1198_vm15, %v1204_v38, %v1202_v21  ;;  %1646 = vrot.lane.b32.xlu0 %v2525_v25, %s2319_s29  ;;  %v4596_v42 = vld [vmem:[#allocation30_spill] sm:$0xff] }
 0x1ed   : > { %v494_v22 = vmul.f32 %v4592_v30, %v484_v52  ;;  %v1208_v53 = vmul.f32 %v1207_v36, %v1199_v51  ;;  %v1209_v20 = vmul.f32 %v1207_v36, %v1200_v18  ;;  %v1211_v44 = vmul.f32 %v1210_v62, %v1205_v40  ;;  %v1224_v48 = vpop.permute.xlu1 %1223  ;;  %v1222_v37 = vpop.permute.xlu0 %1221 }
 0x1ee   : > { %v1212_v45 = vmul.f32 %v1210_v62, %v1206_v63  ;;  %v437_v52 = vadd.f32 %v435_v32, %v3333_v39  ;;  %v438_v33 = vadd.f32 %v436_v35, %v3335_v59  ;;  %v498_v28 = vadd.f32 %v496_v58, %v493_v55  ;;  %v4593_v32 = vld [vmem:[#allocation28_spill] sm:$0xff]  ;;  %v4594_v35 = vld [vmem:[#allocation29_spill] sm:$0xff]  ;;  %v4595_v55 = vld [vmem:[#allocation31_spill] sm:$0xff] }
 0x1ef   : > { %v499_v49 = vadd.f32 %v497_v43, %v494_v22  ;;  %v1213_v50 = vadd.f32 %v1211_v44, %v1208_v53  ;;  %v1226_v46 = vsel %vm1225_vm2, %v1222_v37, %v1224_v48  ;;  %v1227_v39 = vsel %vm1225_vm2, %v1224_v48, %v1222_v37  ;;  %1655 = vrot.lane.b32.xlu1 %v2529_v27, %s2319_s29  ;;  %v4601_v37 = vld [vmem:[#allocation33_spill] sm:$0xff] }
 0x1f0   : > { %v1214_v1 = vadd.f32 %v1212_v45, %v1209_v20  ;;  %v475_v51 = vadd.f32 %v473_v56, %v437_v52  ;;  %v3419_v59 = vadd.f32 %v474_v41, %v438_v33  ;;  %v522_v47 = vsel %vm521_vm0, %v4594_v35, %v4593_v32  ;;  %1653 = vrot.lane.b32.xlu0 %v2523_v24, %s2319_s29  ;;  %s2321_s29 = smov 78  }
 0x1f1   : > { %v1215_v56 = vmul.f32 %v1213_v50, %v2930_v8  ;;  %v511_v58 = vmul.f32 %v2957_v9, %v498_v28  ;;  %v523_v36 = vsel %vm521_vm0, %v4593_v32, %v4594_v35  ;;  %v1234_v41 = vstv %s3390_s28  ;;  %v1231_v38 = vpop.permute.xlu1 %1230  ;;  %v1229_v22 = vpop.permute.xlu0 %1228  ;;  %v4602_v32 = vld [vmem:[#allocation32_spill] sm:$0xff]  ;;  %v4603_v35 = vld [vmem:[#allocation35_spill] sm:$0xff]  ;;  %s4605_s28 = sld [smem:[#allocation93_spill]] }
 0x1f2   : > { %v1216_v31 = vmul.f32 %v1214_v1, %v2933_v15  ;;  %v1237_v62 = vstv %s3392_s22  ;;  %v3440_v57 = vmul.f32 %v2960_v17, %v499_v49  ;;  %v529_v43 = vsel %vm521_vm0, %v4596_v42, %v4595_v55  ;;  %s3502_s22 = sld [smem:[#allocation3 + $0x52]] }
 0x1f3   : > { %v1217_v21 = vadd.f32 %v1215_v56, %v1190_v14  ;;  %v528_v40 = vsel %vm521_vm0, %v4595_v55, %v4596_v42  ;;  %v1232_v63 = vsel %vm1225_vm2, %v1229_v22, %v1231_v38  ;;  %v1233_v53 = vsel %vm1225_vm2, %v1231_v38, %v1229_v22  ;;  %1502 = vrot.lane.b32.xlu1 %v2533_v29, %s2320_s8  ;;  %v4607_v42 = vld [vmem:[#allocation39_spill] sm:$0xff] }
 0x1f4   : > { %v1218_v30 = vadd.f32 %v1216_v31, %v1191_v4  ;;  %vm1250_vm4 = vcmp.lt.s32.totalorder %v2895_v16, 111  ;;  %v1235_v14 = vmul.f32 %v1234_v41, %v1226_v46  ;;  %v1236_v4 = vmul.f32 %v1234_v41, %v1227_v39  ;;  %1500 = vrot.lane.b32.xlu0 %v2525_v25, %s2320_s8  ;;  %v4604_v39 = vld [vmem:[#allocation34_spill] sm:$0xff] }
 0x1f5   : > { %v1238_v20 = vmul.f32 %v1237_v62, %v1232_v63  ;;  %v1239_v44 = vmul.f32 %v1237_v62, %v1233_v53  ;;  %v3457_v45 = vadd.f32 %v511_v58, %v475_v51  ;;  %v4598_v52 = vstv %s4597_s10  ;;  %v1249_v1 = vpop.permute.xlu1 %1248  ;;  %v1247_v31 = vpop.permute.xlu0 %1246  ;;  %s4632_s10 = sld [smem:[#allocation97_spill]] }
 0x1f6   : > { %v531_v33 = vmul.f32 %v4598_v52, %v523_v36  ;;  %v4599_v28 = vmov %v4598_v52  ;;  %v4600_v49 = vstv %s2863_s14  ;;  %v574_v46 = vsel %vm572_vm1, %v4602_v32, %v4601_v37  ;;  %s3500_s14 = sld [smem:[#allocation3 + $0x21]] }
 0x1f7   : > { %v532_v48 = vmul.f32 %v4599_v28, %v522_v47  ;;  %v534_v50 = vmul.f32 %v4600_v49, %v529_v43  ;;  %v580_v56 = vsel %vm572_vm1, %v4604_v39, %v4603_v35  ;;  %v1240_v51 = vadd.f32 %v1238_v20, %v1235_v14  ;;  %1509 = vrot.lane.b32.xlu1 %v2529_v27, %s2320_s8  ;;  %v4608_v43 = vld [vmem:[#allocation38_spill] sm:$0xff] }
 0x1f8   : > { %v1241_v47 = vadd.f32 %v1239_v44, %v1236_v4  ;;  %v4606_v58 = vmov %v4600_v49  ;;  %v579_v41 = vsel %vm572_vm1, %v4603_v35, %v4604_v39  ;;  %v1251_v38 = vsel %vm1250_vm4, %v1247_v31, %v1249_v1  ;;  %1507 = vrot.lane.b32.xlu0 %v2523_v24, %s2320_s8  ;;  %s4636_s8 = sld [smem:[#allocation98_spill]] }
 0x1f9   : > { %v535_v36 = vmul.f32 %v4606_v58, %v528_v40  ;;  %v1252_v62 = vsel %vm1250_vm4, %v1249_v1, %v1247_v31  ;;  %v573_v55 = vsel %vm572_vm1, %v4601_v37, %v4602_v32  ;;  %v605_v22 = vsel %vm597_vm3, %v4608_v43, %v4607_v42  ;;  %v1256_v52 = vpop.permute.xlu1 %1255  ;;  %v4612_v37 = vld [vmem:[#allocation36_spill] sm:$0xff]  ;;  %v4613_v32 = vld [vmem:[#allocation37_spill] sm:$0xff]  ;;  %v1254_v35 = vpop.permute.xlu0 %1253 }
 0x1fa   : > { %v1242_v40 = vadd.f32 %v1240_v51, %v1217_v21  ;;  %v1243_v63 = vadd.f32 %v1241_v47, %v1218_v30  ;;  %v4609_v53 = vstv %s2865_s27  ;;  %v4610_v4 = vstv %s4605_s28  ;;  %s3558_s27 = sld [smem:[#allocation3 + $0x54]]  ;;  %s3667_s28 = sld [smem:[#allocation3 + $0x25]] }
 0x1fb   : > { %v582_v14 = vmul.f32 %v4609_v53, %v574_v46  ;;  %v585_v20 = vmul.f32 %v4610_v4, %v580_v56  ;;  %v1259_v44 = vstv %s3435_s12  ;;  %v1262_v28 = vstv %s3437_s13  ;;  %1675 = vrot.lane.b32.xlu1 %v2533_v29, %s2321_s29  ;;  %s2322_s12 = smov 77   ;;  %s3611_s13 = sld [smem:[#allocation3 + $0x55]] }
 0x1fc   : > { %v4611_v49 = vmov %v4610_v4  ;;  %v598_v21 = vsel %vm597_vm3, %v4613_v32, %v4612_v37  ;;  %v599_v30 = vsel %vm597_vm3, %v4612_v37, %v4613_v32  ;;  %v604_v46 = vsel %vm597_vm3, %v4607_v42, %v4608_v43  ;;  %1673 = vrot.lane.b32.xlu0 %v2525_v25, %s2321_s29 }
 0x1fd   : > { %v586_v1 = vmul.f32 %v4611_v49, %v579_v41  ;;  %v4614_v39 = vstv %s2878_s21  ;;  %v1257_v51 = vsel %vm1250_vm4, %v1254_v35, %v1256_v52  ;;  %v1258_v47 = vsel %vm1250_vm4, %v1256_v52, %v1254_v35  ;;  %v1276_v52 = vpop.permute.xlu1 %1275  ;;  %s4623_s21 = sld [smem:[#allocation96_spill]] }
 0x1fe   : > { %v610_v56 = vmul.f32 %v4614_v39, %v605_v22  ;;  %v1260_v31 = vmul.f32 %v1259_v44, %v1251_v38  ;;  %v1261_v58 = vmul.f32 %v1259_v44, %v1252_v62  ;;  %v1263_v41 = vmul.f32 %v1262_v28, %v1257_v51  ;;  %v1274_v44 = vpop.permute.xlu0 %1273 }
 0x1ff   : > { %v1264_v42 = vmul.f32 %v1262_v28, %v1258_v47  ;;  %v536_v43 = vadd.f32 %v534_v50, %v531_v33  ;;  %v3527_v22 = vadd.f32 %v535_v36, %v532_v48  ;;  %v583_v4 = vmul.f32 %v4609_v53, %v573_v55  ;;  %1682 = vrot.lane.b32.xlu1 %v2529_v27, %s2321_s29  ;;  %v4618_v55 = vld [vmem:[#allocation43_spill] sm:$0xff]  ;;  %v4621_v47 = vld [vmem:[#allocation41_spill] sm:$0xff] }
 0x200   : > { %v4615_v49 = vmov %v4614_v39  ;;  %v587_v32 = vadd.f32 %v585_v20, %v582_v14  ;;  %v4616_v35 = vstv %s2871_s2  ;;  %vm651_vm7 = vcmp.lt.s32.totalorder %v2895_v16, 32  ;;  %v4619_v14 = vld [vmem:[#allocation42_spill] sm:$0xff]  ;;  %1680 = vrot.lane.b32.xlu0 %v2523_v24, %s2321_s29  ;;  %s3556_s2 = sld [smem:[#allocation3 + $0x23]]  ;;  %s4149_s29 = sld [smem:[#allocation3 + $0x5a]] }
 0x201   : > { %v611_v37 = vmul.f32 %v4615_v49, %v604_v46  ;;  %v607_v39 = vmul.f32 %v4616_v35, %v599_v30  ;;  %v1265_v38 = vadd.f32 %v1263_v41, %v1260_v31  ;;  %v1266_v62 = vadd.f32 %v1264_v42, %v1261_v58  ;;  %v4620_v46 = vld [vmem:[#allocation40_spill] sm:$0xff] }
 0x202   : > { %v588_v28 = vadd.f32 %v586_v1, %v583_v4  ;;  %v4617_v51 = vmov %v4616_v35  ;;  %v1278_v48 = vsel %vm1277_vm6, %v1274_v44, %v1276_v52  ;;  %v1279_v50 = vsel %vm1277_vm6, %v1276_v52, %v1274_v44 }
 0x203   : > { %v608_v33 = vmul.f32 %v4617_v51, %v598_v21  ;;  %v612_v36 = vadd.f32 %v610_v56, %v607_v39  ;;  %v632_v20 = vsel %vm624_vm5, %v4619_v14, %v4618_v55  ;;  %v1267_v30 = vmul.f32 %v1265_v38, %v2943_v2  ;;  %v1283_v56 = vpop.permute.xlu1 %1282  ;;  %1702 = vrot.lane.b32.xlu1 %v2533_v29, %s2322_s12 }
 0x204   : > { %v1268_v1 = vmul.f32 %v1266_v62, %v2946_v10  ;;  %v625_v31 = vsel %vm624_vm5, %v4621_v47, %v4620_v46  ;;  %v1286_v58 = vstv %s3500_s14  ;;  %v1289_v41 = vstv %s3502_s22  ;;  %1700 = vrot.lane.b32.xlu0 %v2525_v25, %s2322_s12  ;;  %s3669_s14 = sld [smem:[#allocation3 + $0x56]]  ;;  %s4136_s22 = sld [smem:[#allocation3 + $0x29]] }
 0x205   : > { %v613_v21 = vadd.f32 %v611_v37, %v608_v33  ;;  %v626_v42 = vsel %vm624_vm5, %v4620_v46, %v4621_v47  ;;  %v631_v53 = vsel %vm624_vm5, %v4618_v55, %v4619_v14  ;;  %vm676_vm8 = vcmp.lt.s32.totalorder %v2895_v16, 31  ;;  %v1281_v37 = vpop.permute.xlu0 %1280 }
 0x206   : > { %v1269_v4 = vadd.f32 %v1267_v30, %v1242_v40  ;;  %v1270_v49 = vadd.f32 %v1268_v1, %v1243_v63  ;;  %v4622_v52 = vstv %s2883_s19  ;;  %v1284_v39 = vsel %vm1277_vm6, %v1281_v37, %v1283_v56  ;;  %s3609_s19 = sld [smem:[#allocation3 + $0x24]] }
 0x207   : > { %v637_v35 = vmul.f32 %v4622_v52, %v632_v20  ;;  %v1285_v38 = vsel %vm1277_vm6, %v1283_v56, %v1281_v37  ;;  %vm1346_vm9 = vcmp.lt.s32.totalorder %v2895_v16, 99  ;;  %v1287_v62 = vmul.f32 %v1286_v58, %v1278_v48  ;;  %v1345_v30 = vpop.permute.xlu1 %1344  ;;  %v4628_v56 = vld [vmem:[#allocation46_spill] sm:$0xff]  ;;  %1709 = vrot.lane.b32.xlu1 %v2529_v27, %s2322_s12 }
 0x208   : > { %v1288_v40 = vmul.f32 %v1286_v58, %v1279_v50  ;;  %v1290_v63 = vmul.f32 %v1289_v41, %v1284_v39  ;;  %v1291_v44 = vmul.f32 %v1289_v41, %v1285_v38  ;;  %v3579_v51 = vmul.f32 %v2971_v3, %v536_v43  ;;  %v4627_v43 = vld [vmem:[#allocation47_spill] sm:$0xff]  ;;  %1707 = vrot.lane.b32.xlu0 %v2523_v24, %s2322_s12  ;;  %v4630_v39 = vld [vmem:[#allocation45_spill] sm:$0xff]  ;;  %s4253_s12 = sld [smem:[#allocation3 + $0x61]] }
 0x209   : > { %v589_v33 = vmul.f32 %v587_v32, %v2917_v6  ;;  %v590_v55 = vmul.f32 %v588_v28, %v2920_v11  ;;  %v4624_v14 = vmov %v4622_v52  ;;  %v614_v29 = vmul.f32 %v612_v36, %v2906_v12  ;;  %v1343_v47 = vpop.permute.xlu0 %1342  ;;  %v4629_v52 = vld [vmem:[#allocation44_spill] sm:$0xff] }
 0x20a   : > { %v638_v20 = vmul.f32 %v4624_v14, %v631_v53  ;;  %v4625_v1 = vstv %s4623_s21  ;;  %v1292_v48 = vadd.f32 %v1290_v63, %v1287_v62  ;;  %v1293_v50 = vadd.f32 %v1291_v44, %v1288_v40  ;;  %s4251_s21 = sld [smem:[#allocation3 + $0x30]] }
 0x20b   : > { %v634_v46 = vmul.f32 %v4625_v1, %v626_v42  ;;  %v4626_v25 = vmov %v4625_v1  ;;  %v659_v32 = vsel %vm651_vm7, %v4628_v56, %v4627_v43  ;;  %v1347_v28 = vsel %vm1346_vm9, %v1343_v47, %v1345_v30  ;;  %v1352_v40 = vpop.permute.xlu1 %1351 }
 0x20c   : > { %v635_v58 = vmul.f32 %v4626_v25, %v625_v31  ;;  %v1348_v36 = vsel %vm1346_vm9, %v1345_v30, %v1343_v47  ;;  %v615_v41 = vmul.f32 %v613_v21, %v2909_v13  ;;  %v1294_v53 = vmul.f32 %v1292_v48, %v2957_v9  ;;  %v4634_v30 = vld [vmem:[#allocation50_spill] sm:$0xff] }
 0x20d   : > { %v639_v42 = vadd.f32 %v637_v35, %v634_v46  ;;  %v1295_v31 = vmul.f32 %v1293_v50, %v2960_v17  ;;  %v652_v38 = vsel %vm651_vm7, %v4630_v39, %v4629_v52  ;;  %v1355_v62 = vstv %s3556_s2  ;;  %v1350_v14 = vpop.permute.xlu0 %1349  ;;  %s4163_s2 = sld [smem:[#allocation3 + $0x2f]] }
 0x20e   : > { %v640_v37 = vadd.f32 %v638_v20, %v635_v58  ;;  %v1358_v63 = vstv %s3558_s27  ;;  %v653_v27 = vsel %vm651_vm7, %v4629_v52, %v4630_v39  ;;  %v4631_v21 = vstv %s2889_s25  ;;  %v4633_v20 = vld [vmem:[#allocation51_spill] sm:$0xff]  ;;  %v4637_v39 = vld [vmem:[#allocation49_spill] sm:$0xff]  ;;  %s4165_s27 = sld [smem:[#allocation3 + $0x60]] }
 0x20f   : > { %v664_v24 = vmul.f32 %v4631_v21, %v659_v32  ;;  %vm703_vm10 = vcmp.lt.s32.totalorder %v2895_v16, 30  ;;  %v3620_v35 = vadd.f32 %v1294_v53, %v1269_v4  ;;  %v3622_v44 = vadd.f32 %v1295_v31, %v1270_v49  ;;  %v1370_v52 = vpop.permute.xlu1 %1369 }
 0x210   : > { %v684_v1 = vsel %vm676_vm8, %v4634_v30, %v4633_v20  ;;  %v1353_v46 = vsel %vm1346_vm9, %v1350_v14, %v1352_v40  ;;  %v1354_v48 = vsel %vm1346_vm9, %v1352_v40, %v1350_v14  ;;  %vm1371_vm11 = vcmp.lt.s32.totalorder %v2895_v16, 98 }
 0x211   : > { %v1356_v50 = vmul.f32 %v1355_v62, %v1347_v28  ;;  %v1357_v4 = vmul.f32 %v1355_v62, %v1348_v36  ;;  %v1359_v47 = vmul.f32 %v1358_v63, %v1353_v46  ;;  %v1360_v49 = vmul.f32 %v1358_v63, %v1354_v48  ;;  %v4638_v28 = vld [vmem:[#allocation48_spill] sm:$0xff]  ;;  %v1368_v40 = vpop.permute.xlu0 %1367 }
 0x212   : > { %v641_v25 = vmul.f32 %v639_v42, %v2930_v8  ;;  %v642_v58 = vmul.f32 %v640_v37, %v2933_v15  ;;  %v4635_v32 = vstv %s4632_s10  ;;  %v658_v31 = vsel %vm651_vm7, %v4627_v43, %v4628_v56 }
 0x213   : > { %v661_v53 = vmul.f32 %v4635_v32, %v653_v27  ;;  %v678_v36 = vsel %vm676_vm8, %v4638_v28, %v4637_v39  ;;  %v683_v42 = vsel %vm676_vm8, %v4633_v20, %v4634_v30  ;;  %v1361_v37 = vadd.f32 %v1359_v47, %v1356_v50 }
 0x214   : > { %v1362_v62 = vadd.f32 %v1360_v49, %v1357_v4  ;;  %v677_v43 = vsel %vm676_vm8, %v4637_v39, %v4638_v28  ;;  %v4639_v56 = vstv %s2898_s23  ;;  %v1372_v27 = vsel %vm1371_vm11, %v1368_v40, %v1370_v52  ;;  %v1377_v39 = vpop.permute.xlu1 %1376  ;;  %s3713_s23 = sld [smem:[#allocation3 + $0x2a]] }
 0x215   : > { %v689_v63 = vmul.f32 %v4639_v56, %v684_v1  ;;  %v1373_v21 = vsel %vm1371_vm11, %v1370_v52, %v1368_v40  ;;  %v616_v14 = vadd.f32 %v614_v29, %v589_v33  ;;  %v617_v20 = vadd.f32 %v615_v41, %v590_v55  ;;  %v1375_v29 = vpop.permute.xlu0 %1374 }
 0x216   : > { %v4640_v30 = vstv %s2889_s25  ;;  %v666_v48 = vadd.f32 %v664_v24, %v661_v53  ;;  %v4641_v50 = vstv %s4636_s8  ;;  %v4642_v47 = vmov %v4639_v56  ;;  %s3715_s25 = sld [smem:[#allocation3 + $0x5b]]  ;;  %s4729_s8 = sld [smem:[#allocation25_spill]] }
 0x217   : > { %v665_v46 = vmul.f32 %v4640_v30, %v658_v31  ;;  %v686_v4 = vmul.f32 %v4641_v50, %v678_v36  ;;  %v690_v49 = vmul.f32 %v4642_v47, %v683_v42  ;;  %v1380_v32 = vstv %s3609_s19  ;;  %v4647_v30 = vld [vmem:[#allocation54_spill] sm:$0xff]  ;;  %s1740_s19 = sld [smem:[#allocation2]] }
 0x218   : > { %v1383_v28 = vstv %s3611_s13  ;;  %v4643_v1 = vstv %s4632_s10  ;;  %v643_v54 = vadd.f32 %v641_v25, %v616_v14  ;;  %v644_v52 = vadd.f32 %v642_v58, %v617_v20  ;;  %v4646_v14 = vld [vmem:[#allocation53_spill] sm:$0xff]  ;;  %v1397_v20 = vpop.permute.xlu1 %1396  ;;  %s4727_s13 = sld [smem:[#allocation19_spill]]  ;;  %s4728_s10 = sld [smem:[#allocation24_spill]] }
 0x219   : > { %v662_v56 = vmul.f32 %v4643_v1, %v652_v38  ;;  %v4644_v33 = vmov %v4641_v50  ;;  %v691_v41 = vadd.f32 %v689_v63, %v686_v4  ;;  %vm730_vm12 = vcmp.lt.s32.totalorder %v2895_v16, 29  ;;  %v4648_v50 = vld [vmem:[#allocation55_spill] sm:$0xff] }
 0x21a   : > { %v687_v55 = vmul.f32 %v4644_v33, %v677_v43  ;;  %v1378_v24 = vsel %vm1371_vm11, %v1375_v29, %v1377_v39  ;;  %v1379_v53 = vsel %vm1371_vm11, %v1377_v39, %v1375_v29  ;;  %vm1398_vm13 = vcmp.lt.s32.totalorder %v2895_v16, 97  ;;  %v4645_v43 = vld [vmem:[#allocation52_spill] sm:$0xff] }
 0x21b   : > { %v1381_v31 = vmul.f32 %v1380_v32, %v1372_v27  ;;  %v1382_v36 = vmul.f32 %v1380_v32, %v1373_v21  ;;  %v1384_v42 = vmul.f32 %v1383_v28, %v1378_v24  ;;  %v1385_v38 = vmul.f32 %v1383_v28, %v1379_v53 }
 0x21c   : > { %v667_v25 = vadd.f32 %v665_v46, %v662_v56  ;;  %v668_v58 = vadd.f32 %v666_v48, %v643_v54  ;;  %v692_v40 = vadd.f32 %v690_v49, %v687_v55  ;;  %v704_v63 = vsel %vm703_vm10, %v4646_v14, %v4645_v43  ;;  %v1395_v46 = vpop.permute.xlu0 %1394  ;;  %v1404_v53 = vpop.permute.xlu1 %1403 }
 0x21d   : > { %v710_v4 = vsel %vm703_vm10, %v4648_v50, %v4647_v30  ;;  %v711_v54 = vsel %vm703_vm10, %v4647_v30, %v4648_v50  ;;  %vm772_vm14 = vcmp.lt.s32.totalorder %v2895_v16, 19  ;;  %v1386_v27 = vadd.f32 %v1384_v42, %v1381_v31 }
 0x21e   : > { %v1387_v21 = vadd.f32 %v1385_v38, %v1382_v36  ;;  %v693_v48 = vmul.f32 %v691_v41, %v2943_v2  ;;  %v705_v47 = vsel %vm703_vm10, %v4645_v43, %v4646_v14  ;;  %v1399_v49 = vsel %vm1398_vm13, %v1395_v46, %v1397_v20 }
 0x21f   : > { %v1400_v32 = vsel %vm1398_vm13, %v1397_v20, %v1395_v46  ;;  %v1363_v39 = vmul.f32 %v1361_v37, %v2917_v6  ;;  %v1364_v28 = vmul.f32 %v1362_v62, %v2920_v11  ;;  %v1388_v1 = vmul.f32 %v1386_v27, %v2906_v12 }
 0x220   : > { %v1389_v56 = vmul.f32 %v1387_v21, %v2909_v13  ;;  %v4649_v33 = vstv %s2911_s4  ;;  %v1407_v24 = vstv %s3667_s28  ;;  %v1410_v31 = vstv %s3669_s14  ;;  %v1402_v43 = vpop.permute.xlu0 %1401  ;;  %s3777_s4 = sld [smem:[#allocation3 + $0x2b]]  ;;  %s4730_s28 = sld [smem:[#allocation22_spill]] }
 0x221   : > { %v716_v55 = vmul.f32 %v4649_v33, %v711_v54  ;;  %v4650_v29 = vmov %v4649_v33  ;;  %v3717_v36 = vadd.f32 %v667_v25, %v644_v52  ;;  %v4651_v37 = vstv %s2900_s17  ;;  %s3779_s17 = sld [smem:[#allocation3 + $0x5c]]  ;;  %s1993_s14 = sshll.u32 %s4727_s13, 7 }
 0x222   : > { %v717_v41 = vmul.f32 %v4650_v29, %v710_v4  ;;  %v713_v42 = vmul.f32 %v4651_v37, %v705_v47  ;;  %v1390_v62 = vadd.f32 %v1388_v1, %v1363_v39  ;;  %v1391_v38 = vadd.f32 %v1389_v56, %v1364_v28  ;;  %v1545_v47 = vpop.permute.xlu1 %1544  ;;  %v4653_v39 = vld [vmem:[#allocation56_spill] sm:$0xff]  ;;  %v4654_v28 = vld [vmem:[#allocation57_spill] sm:$0xff]  ;;  %v4658_v29 = vld [vmem:[#allocation62_spill] sm:$0xff] }
 0x223   : > { %v4652_v14 = vmov %v4651_v37  ;;  %v1405_v30 = vsel %vm1398_vm13, %v1402_v43, %v1404_v53  ;;  %v1406_v50 = vsel %vm1398_vm13, %v1404_v53, %v1402_v43  ;;  %vm1546_vm15 = vcmp.lt.s32.totalorder %v2895_v16, 83 }
 0x224   : > { %v714_v20 = vmul.f32 %v4652_v14, %v704_v63  ;;  %vm797_vm0 = vcmp.lt.s32.totalorder %v2895_v16, 18  ;;  %v1408_v4 = vmul.f32 %v1407_v24, %v1399_v49  ;;  %v1409_v52 = vmul.f32 %v1407_v24, %v1400_v32  ;;  %v4655_v49 = vld [vmem:[#allocation59_spill] sm:$0xff]  ;;  %v4656_v32 = vld [vmem:[#allocation58_spill] sm:$0xff] }
 0x225   : > { %v1411_v25 = vmul.f32 %v1410_v31, %v1405_v30  ;;  %v1412_v54 = vmul.f32 %v1410_v31, %v1406_v50  ;;  %v3730_v27 = vmul.f32 %v692_v40, %v2946_v10  ;;  %v3732_v21 = vadd.f32 %v693_v48, %v668_v58  ;;  %v1543_v48 = vpop.permute.xlu0 %1542  ;;  %v4660_v30 = vld [vmem:[#allocation60_spill] sm:$0xff]  ;;  %v4661_v50 = vld [vmem:[#allocation61_spill] sm:$0xff] }
 0x226   : > { %v3734_v63 = vadd.f32 %v716_v55, %v713_v42  ;;  %v3736_v46 = vadd.f32 %v717_v41, %v714_v20  ;;  %v731_v1 = vsel %vm730_vm12, %v4654_v28, %v4653_v39  ;;  %v738_v40 = vsel %vm730_vm12, %v4656_v32, %v4655_v49  ;;  %v4657_v55 = vld [vmem:[#allocation63_spill] sm:$0xff]  ;;  %p4733_p11 = scmp.ne.s32.totalorder %s4730_s28, 0 }
 0x227   : > { %v1413_v56 = vadd.f32 %v1411_v25, %v1408_v4  ;;  %v1414_v58 = vadd.f32 %v1412_v54, %v1409_v52  ;;  %v732_v33 = vsel %vm730_vm12, %v4653_v39, %v4654_v28  ;;  %v780_v41 = vsel %vm772_vm14, %v4658_v29, %v4657_v55  ;;  %v1552_v25 = vpop.permute.xlu1 %1551 }
 0x228   : > { %v1547_v24 = vsel %vm1546_vm15, %v1543_v48, %v1545_v47  ;;  %v1548_v53 = vsel %vm1546_vm15, %v1545_v47, %v1543_v48  ;;  %v737_v31 = vsel %vm730_vm12, %v4655_v49, %v4656_v32  ;;  %v779_v37 = vsel %vm772_vm14, %v4657_v55, %v4658_v29 }
 0x229   : > { %v1415_v42 = vmul.f32 %v1413_v56, %v2930_v8  ;;  %v1416_v43 = vmul.f32 %v1414_v58, %v2933_v15  ;;  %v4659_v14 = vstv %s2924_s11  ;;  %v773_v4 = vsel %vm772_vm14, %v4661_v50, %v4660_v30  ;;  %v1550_v49 = vpop.permute.xlu0 %1549 }
 0x22a   : > { %v743_v20 = vmul.f32 %v4659_v14, %v738_v40  ;;  %vm824_vm1 = vcmp.lt.s32.totalorder %v2895_v16, 17  ;;  %v1555_v52 = vstv %s3713_s23  ;;  %v1558_v54 = vstv %s3715_s25  ;;  %s4731_s23 = sshll.u32 %s4728_s10, 3 }
 0x22b   : > { %v774_v47 = vsel %vm772_vm14, %v4660_v30, %v4661_v50  ;;  %v4662_v39 = vstv %s2938_s9  ;;  %v3787_v32 = vadd.f32 %v1415_v42, %v1390_v62  ;;  %v3789_v40 = vadd.f32 %v1416_v43, %v1391_v38  ;;  %v1570_v18 = vpop.permute.xlu1 %1569  ;;  %s3836_s9 = sld [smem:[#allocation3 + $0x2c]]  ;;  %s243_s25 = scalar_lea.vmem [#allocation10], %s4731_s23 }
 0x22c   : > { %v785_v28 = vmul.f32 %v4662_v39, %v780_v41  ;;  %v4665_v56 = vmov %v4662_v39  ;;  %v1553_v48 = vsel %vm1546_vm15, %v1550_v49, %v1552_v25  ;;  %v1554_v55 = vsel %vm1546_vm15, %v1552_v25, %v1550_v49  ;;  %v4671_v25 = vld [vmem:[#allocation67_spill] sm:$0xff] }
 0x22d   : > { %4663 = vst [vmem:[#allocation27_spill] sm:$0xff] %v3787_v32  ;;  %4664 = vst [vmem:[#allocation26_spill] sm:$0xff] %v3789_v40  ;;  %v786_v58 = vmul.f32 %v4665_v56, %v779_v37  ;;  %vm1571_vm2 = vcmp.lt.s32.totalorder %v2895_v16, 82  ;;  %v1556_v29 = vmul.f32 %v1555_v52, %v1547_v24  ;;  %v1557_v14 = vmul.f32 %v1555_v52, %v1548_v53  ;;  %v1568_v52 = vpop.permute.xlu0 %1567 }
 0x22e   : > { %v1559_v30 = vmul.f32 %v1558_v54, %v1553_v48  ;;  %v1560_v41 = vmul.f32 %v1558_v54, %v1554_v55  ;;  %v4666_v50 = vstv %s2922_s5  ;;  %v4667_v42 = vstv %s2924_s11  ;;  %v4672_v54 = vld [vmem:[#allocation64_spill] sm:$0xff]  ;;  %s3838_s11 = sld [smem:[#allocation3 + $0x5d]]  ;;  %s4026_s5 = sld [smem:[#allocation3 + $0x22]] }
 0x22f   : > { %v740_v62 = vmul.f32 %v4666_v50, %v732_v33  ;;  %v744_v38 = vmul.f32 %v4667_v42, %v737_v31  ;;  %v4668_v43 = vstv %s2936_s3  ;;  %v804_v24 = vsel %vm797_vm0, %v4671_v25, %v4670_v60  ;;  %v1577_v61 = vpop.permute.xlu1 %1576  ;;  %s4028_s3 = sld [smem:[#allocation3 + $0x53]] }
 0x230   : > { %v782_v39 = vmul.f32 %v4668_v43, %v774_v47  ;;  %v4669_v37 = vmov %v4668_v43  ;;  %v805_v33 = vsel %vm797_vm0, %v4670_v60, %v4671_v25  ;;  %v1561_v53 = vadd.f32 %v1559_v30, %v1556_v29  ;;  %v4673_v47 = vld [vmem:[#allocation65_spill] sm:$0xff] }
 0x231   : > { %v783_v56 = vmul.f32 %v4669_v37, %v773_v4  ;;  %v1562_v31 = vadd.f32 %v1560_v41, %v1557_v14  ;;  %v798_v4 = vsel %vm797_vm0, %v4673_v47, %v4672_v54  ;;  %v799_v49 = vsel %vm797_vm0, %v4672_v54, %v4673_v47 }
 0x232   : > { %v1572_v48 = vsel %vm1571_vm2, %v1568_v52, %v1570_v18  ;;  %v1573_v60 = vsel %vm1571_vm2, %v1570_v18, %v1568_v52  ;;  %v4674_v55 = vmov %v4666_v50  ;;  %v3828_v14 = vadd.f32 %v743_v20, %v740_v62  ;;  %v4679_v62 = vld [vmem:[#allocation70_spill] sm:$0xff] }
 0x233   : > { %v741_v29 = vmul.f32 %v4674_v55, %v731_v1  ;;  %v787_v30 = vadd.f32 %v785_v28, %v782_v39  ;;  %v788_v41 = vadd.f32 %v786_v58, %v783_v56  ;;  %v4675_v50 = vstv %s3046_s7  ;;  %v4680_v28 = vld [vmem:[#allocation71_spill] sm:$0xff]  ;;  %v1575_v39 = vpop.permute.xlu0 %1574  ;;  %s4083_s7 = sld [smem:[#allocation3 + $0x26]] }
 0x234   : > { %v810_v42 = vmul.f32 %v4675_v50, %v805_v33  ;;  %v4676_v43 = vmov %v4675_v50  ;;  %v1580_v25 = vstv %s3777_s4  ;;  %v1583_v54 = vstv %s3779_s17  ;;  %s1783_s4 = sshll.u32 %s243_s25, 4  ;;  %s4300_s4 = int_to_ptr.vmem [resolvable:$true] %s1783_s4 }
 0x235   : > { %v811_v37 = vmul.f32 %v4676_v43, %v804_v24  ;;  %v3840_v47 = vadd.f32 %v744_v38, %v741_v29  ;;  %v4677_v18 = vstv %s2987_s1  ;;  %v831_v58 = vsel %vm824_vm1, %v4680_v28, %v4679_v62 }
 0x236   : > { %v807_v52 = vmul.f32 %v4677_v18, %v799_v49  ;;  %v4678_v1 = vmov %v4677_v18  ;;  %vm851_vm3 = vcmp.lt.s32.totalorder %v2895_v16, 16  ;;  %v832_v56 = vsel %vm824_vm1, %v4679_v62, %v4680_v28  ;;  %v4682_v62 = vld [vmem:[#allocation69_spill] sm:$0xff] }
 0x237   : > { %v808_v20 = vmul.f32 %v4678_v1, %v798_v4  ;;  %v1578_v38 = vsel %vm1571_vm2, %v1575_v39, %v1577_v61  ;;  %v1579_v24 = vsel %vm1571_vm2, %v1577_v61, %v1575_v39  ;;  %vm1598_vm4 = vcmp.lt.s32.totalorder %v2895_v16, 81  ;;  %v1597_v61 = vpop.permute.xlu1 %1596  ;;  %v4681_v1 = vld [vmem:[#allocation68_spill] sm:$0xff] }
 0x238   : > { %vm876_vm5 = vcmp.lt.s32.totalorder %v2895_v16, 15  ;;  %v1581_v33 = vmul.f32 %v1580_v25, %v1572_v48  ;;  %v1582_v4 = vmul.f32 %v1580_v25, %v1573_v60  ;;  %v1584_v49 = vmul.f32 %v1583_v54, %v1578_v38 }
 0x239   : > { %v1585_v55 = vmul.f32 %v1583_v54, %v1579_v24  ;;  %v3862_v29 = vmul.f32 %v787_v30, %v2917_v6  ;;  %v3865_v50 = vmul.f32 %v788_v41, %v2920_v11  ;;  %v812_v43 = vadd.f32 %v810_v42, %v807_v52  ;;  %v1595_v41 = vpop.permute.xlu0 %1594 }
 0x23a   : > { %v813_v18 = vadd.f32 %v811_v37, %v808_v20  ;;  %v825_v28 = vsel %vm824_vm1, %v4682_v62, %v4681_v1  ;;  %v826_v48 = vsel %vm824_vm1, %v4681_v1, %v4682_v62  ;;  %v1586_v60 = vadd.f32 %v1584_v49, %v1581_v33 }
 0x23b   : > { %v1587_v30 = vadd.f32 %v1585_v55, %v1582_v4  ;;  %v4683_v42 = vstv %s3072_s20  ;;  %v1599_v52 = vsel %vm1598_vm4, %v1595_v41, %v1597_v61  ;;  %v1600_v20 = vsel %vm1598_vm4, %v1597_v61, %v1595_v41  ;;  %v1604_v1 = vpop.permute.xlu1 %1603  ;;  %s4087_s20 = sld [smem:[#allocation3 + $0x27]] }
 0x23c   : > { %v837_v37 = vmul.f32 %v4683_v42, %v832_v56  ;;  %v4684_v25 = vmov %v4683_v42  ;;  %vm903_vm6 = vcmp.lt.s32.totalorder %v2895_v16, 14  ;;  %v1563_v39 = vmul.f32 %v1561_v53, %v2917_v6 }
 0x23d   : > { %v838_v54 = vmul.f32 %v4684_v25, %v831_v58  ;;  %v1564_v38 = vmul.f32 %v1562_v31, %v2920_v11  ;;  %v1588_v24 = vmul.f32 %v1586_v60, %v2906_v12  ;;  %v1589_v33 = vmul.f32 %v1587_v30, %v2909_v13  ;;  %v1602_v11 = vpop.permute.xlu0 %1601 }
 0x23e   : > { %v4685_v4 = vstv %s3070_s18  ;;  %v1607_v55 = vstv %s3836_s9  ;;  %v1610_v62 = vstv %s3838_s11  ;;  %v814_v42 = vmul.f32 %v812_v43, %v2906_v12  ;;  %v4687_v43 = vld [vmem:[#allocation72_spill] sm:$0xff]  ;;  %s4085_s18 = sld [smem:[#allocation3 + $0x57]] }
 0x23f   : > { %v834_v56 = vmul.f32 %v4685_v4, %v826_v48  ;;  %v4686_v49 = vmov %v4685_v4  ;;  %v815_v61 = vmul.f32 %v813_v18, %v2909_v13  ;;  %vm930_vm7 = vcmp.lt.s32.totalorder %v2895_v16, 13  ;;  %v4688_v13 = vld [vmem:[#allocation73_spill] sm:$0xff]  ;;  %s4732_s11 = sld [smem:[#allocation104_spill]] }
 0x240   : > { %v835_v58 = vmul.f32 %v4686_v49, %v825_v28  ;;  %v1590_v6 = vadd.f32 %v1588_v24, %v1563_v39  ;;  %v1591_v53 = vadd.f32 %v1589_v33, %v1564_v38  ;;  %v1605_v30 = vsel %vm1598_vm4, %v1602_v11, %v1604_v1  ;;  %v4690_v39 = vld [vmem:[#allocation75_spill] sm:$0xff]  ;;  %v3917_v38 = vpop.permute.xlu1 %1423  ;;  %v4692_v24 = vld [vmem:[#allocation78_spill] sm:$0xff] }
 0x241   : > { %v839_v31 = vadd.f32 %v837_v37, %v834_v56  ;;  %v1606_v28 = vsel %vm1598_vm4, %v1604_v1, %v1602_v11  ;;  %v1608_v48 = vmul.f32 %v1607_v55, %v1599_v52  ;;  %v1609_v41 = vmul.f32 %v1607_v55, %v1600_v20  ;;  %4691 = vst [vmem:[#allocation28_spill] sm:$0xff] %v3917_v38  ;;  %v4693_v33 = vld [vmem:[#allocation79_spill] sm:$0xff]  ;;  %v3927_v55 = vpop.permute.xlu0 %1421  ;;  %v4695_v11 = vld [vmem:[#allocation76_spill] sm:$0xff] }
 0x242   : > { %v840_v60 = vadd.f32 %v838_v54, %v835_v58  ;;  %v1611_v25 = vmul.f32 %v1610_v62, %v1605_v30  ;;  %v1612_v12 = vmul.f32 %v1610_v62, %v1606_v28  ;;  %v852_v18 = vsel %vm851_vm3, %v4688_v13, %v4687_v43  ;;  %v4689_v54 = vld [vmem:[#allocation74_spill] sm:$0xff]  ;;  %4694 = vst [vmem:[#allocation29_spill] sm:$0xff] %v3927_v55  ;;  %v4696_v30 = vld [vmem:[#allocation77_spill] sm:$0xff] }
 0x243   : > { %v853_v37 = vsel %vm851_vm3, %v4687_v43, %v4688_v13  ;;  %v858_v52 = vsel %vm851_vm3, %v4690_v39, %v4689_v54  ;;  %v859_v20 = vsel %vm851_vm3, %v4689_v54, %v4690_v39  ;;  %v883_v4 = vsel %vm876_vm5, %v4693_v33, %v4692_v24  ;;  %v4698_v13 = vld [vmem:[#allocation82_spill] sm:$0xff]  ;;  %v4699_v54 = vld [vmem:[#allocation83_spill] sm:$0xff] }
 0x244   : > { %v884_v56 = vsel %vm876_vm5, %v4692_v24, %v4693_v33  ;;  %v1613_v49 = vadd.f32 %v1611_v25, %v1608_v48  ;;  %v1614_v58 = vadd.f32 %v1612_v12, %v1609_v41  ;;  %v841_v1 = vmul.f32 %v839_v31, %v2930_v8  ;;  %v4702_v33 = vld [vmem:[#allocation80_spill] sm:$0xff] }
 0x245   : > { %v842_v62 = vmul.f32 %v840_v60, %v2933_v15  ;;  %v877_v28 = vsel %vm876_vm5, %v4696_v30, %v4695_v11  ;;  %v878_v43 = vsel %vm876_vm5, %v4695_v11, %v4696_v30  ;;  %v864_v48 = vmul.f32 %v863_v23, %v859_v20  ;;  %v3963_v20 = vpop.permute.xlu0 %1428  ;;  %s4298_s1 = scalar_lea.hbm %s4732_s11, %s1993_s14 }
 0x246   : > { %v865_v41 = vmul.f32 %v863_v23, %v858_v52  ;;  %v1615_v25 = vmul.f32 %v1613_v49, %v2930_v8  ;;  %v1616_v31 = vmul.f32 %v1614_v58, %v2933_v15  ;;  %v889_v60 = vmul.f32 %v888_v26, %v884_v56  ;;  %v3957_v23 = vpop.permute.xlu1 %1430  ;;  %v4704_v49 = vld [vmem:[#allocation91_spill] sm:$0xff]  ;;  %v4705_v58 = vld [vmem:[#allocation92_spill] sm:$0xff] }
 0x247   : > { %v890_v12 = vmul.f32 %v888_v26, %v883_v4  ;;  %v910_v39 = vsel %vm903_vm6, %v4699_v54, %v4698_v13  ;;  %v911_v8 = vsel %vm903_vm6, %v4698_v13, %v4699_v54  ;;  %v886_v15 = vmul.f32 %v885_v7, %v878_v43  ;;  %v4703_v4 = vld [vmem:[#allocation81_spill] sm:$0xff] }
 0x248   : > { %v887_v52 = vmul.f32 %v885_v7, %v877_v28  ;;  %v3965_v26 = vadd.f32 %v1615_v25, %v1590_v6  ;;  %v3967_v24 = vadd.f32 %v1616_v31, %v1591_v53  ;;  %v904_v56 = vsel %vm903_vm6, %v4703_v4, %v4702_v33 }
 0x249   : > { %v905_v7 = vsel %vm903_vm6, %v4702_v33, %v4703_v4  ;;  %v937_v6 = vsel %vm930_vm7, %v4705_v58, %v4704_v49  ;;  %v938_v53 = vsel %vm930_vm7, %v4704_v49, %v4705_v58  ;;  %v861_v11 = vmul.f32 %v860_v34, %v853_v37  ;;  %v4708_v33 = vld [vmem:[#allocation84_spill] sm:$0xff]  ;;  %v4709_v4 = vld [vmem:[#allocation87_spill] sm:$0xff]  ;;  %v4011_v58 = vpop.permute.xlu0 %1446 }
 0x24a   : > { %4700 = vst [vmem:[#allocation31_spill] sm:$0xff] %v3965_v26  ;;  %4701 = vst [vmem:[#allocation30_spill] sm:$0xff] %v3967_v24  ;;  %v862_v30 = vmul.f32 %v860_v34, %v852_v18  ;;  %v4706_v28 = vstv %s3354_s26  ;;  %v891_v13 = vadd.f32 %v889_v60, %v886_v15  ;;  %v892_v54 = vadd.f32 %v890_v12, %v887_v52  ;;  %v4001_v49 = vpop.permute.xlu1 %1448  ;;  %s4105_s26 = sld [smem:[#allocation3 + $0x5e]] }
 0x24b   : > { %v916_v43 = vmul.f32 %v4706_v28, %v911_v8  ;;  %v4707_v25 = vmov %v4706_v28  ;;  %v931_v24 = vsel %vm930_vm7, %v4709_v4, %v4708_v33  ;;  %v932_v37 = vsel %vm930_vm7, %v4708_v33, %v4709_v4 }
 0x24c   : > { %v917_v31 = vmul.f32 %v4707_v25, %v910_v39  ;;  %v4710_v34 = vstv %s3268_s0  ;;  %v4712_v60 = vstv %s3371_s6  ;;  %v816_v28 = vadd.f32 %v814_v42, %v3862_v29  ;;  %s4103_s0 = sld [smem:[#allocation3 + $0x2d]]  ;;  %s4116_s6 = sld [smem:[#allocation3 + $0x5f]] }
 0x24d   : > { %v913_v18 = vmul.f32 %v4710_v34, %v905_v7  ;;  %v4711_v8 = vmov %v4710_v34  ;;  %v943_v15 = vmul.f32 %v4712_v60, %v938_v53  ;;  %v4713_v12 = vmov %v4712_v60 }
 0x24e   : > { %v914_v39 = vmul.f32 %v4711_v8, %v904_v56  ;;  %v944_v52 = vmul.f32 %v4713_v12, %v937_v6  ;;  %v817_v25 = vadd.f32 %v815_v61, %v3865_v50  ;;  %v866_v26 = vadd.f32 %v864_v48, %v861_v11  ;;  %v4024_v29 = vpop.permute.xlu1 %1455  ;;  %v4031_v48 = vpop.permute.xlu0 %1453 }
 0x24f   : > { %v867_v40 = vadd.f32 %v865_v41, %v862_v30  ;;  %v918_v32 = vadd.f32 %v916_v43, %v913_v18  ;;  %v4714_v4 = vstv %s3364_s30  ;;  %v720_v56 = vmul.f32 %v3734_v63, %v2957_v9  ;;  %s4114_s30 = sld [smem:[#allocation3 + $0x2e]] }
 0x250   : > { %v919_v33 = vadd.f32 %v917_v31, %v914_v39  ;;  %v940_v55 = vmul.f32 %v4714_v4, %v932_v37  ;;  %v4715_v38 = vmov %v4714_v4  ;;  %v721_v6 = vmul.f32 %v3736_v46, %v2960_v17 }
 0x251   : > { %v941_v7 = vmul.f32 %v4715_v38, %v931_v24  ;;  %v843_v53 = vadd.f32 %v841_v1, %v816_v28  ;;  %v893_v34 = vmul.f32 %v891_v13, %v2943_v2  ;;  %v844_v50 = vadd.f32 %v842_v62, %v817_v25  ;;  %v291_v62 = vld [vmem:[#allocation7 + $0x10] ss:$8 sm:$0x3] }
 0x252   : > { %v894_v42 = vmul.f32 %v892_v54, %v2946_v10  ;;  %v945_v61 = vadd.f32 %v943_v15, %v940_v55  ;;  %v696_v63 = vadd.f32 %v3730_v27, %v3717_v36  ;;  %v747_v46 = vmul.f32 %v3828_v14, %v2971_v3  ;;  %v1303_v31 = vpop.permute.xlu1 %1302  ;;  %v4717_v54 = vld [vmem:[#allocation95_spill] sm:$0xff] }
 0x253   : > { %v946_v38 = vadd.f32 %v944_v52, %v941_v7  ;;  %v748_v1 = vmul.f32 %v3840_v47, %v2974_v5  ;;  %v868_v41 = vadd.f32 %v866_v26, %v843_v53  ;;  %v550_v24 = vmul.f32 %v2974_v5, %v3527_v22 }
 0x254   : > { %v869_v11 = vadd.f32 %v867_v40, %v844_v50  ;;  %v920_v55 = vmul.f32 %v918_v32, %v2957_v9  ;;  %v921_v30 = vmul.f32 %v919_v33, %v2960_v17  ;;  %v514_v43 = vadd.f32 %v3440_v57, %v3419_v59  ;;  %v1301_v32 = vpop.permute.xlu0 %1300  ;;  %v4716_v40 = vld [vmem:[#allocation94_spill] sm:$0xff] }
 0x255   : > { %v722_v36 = vadd.f32 %v720_v56, %v3732_v21  ;;  %v723_v27 = vadd.f32 %v721_v6, %v696_v63  ;;  %v895_v14 = vadd.f32 %v893_v34, %v868_v41  ;;  %v947_v26 = vmul.f32 %v945_v61, %v2971_v3  ;;  %v293_v21 = vld [vmem:[#allocation7 + $0x11] ss:$8 sm:$0x3]  ;;  %v4718_v63 = vld [vmem:[#allocation99_spill] sm:$0xff] }
 0x256   : > { %v896_v47 = vadd.f32 %v894_v42, %v869_v11  ;;  %v948_v22 = vmul.f32 %v946_v38, %v2974_v5  ;;  %vm1304_vm8 = vcmp.lt.s32.totalorder %v2895_v16, 109  ;;  %v755_v13 = vrot.slane %v291_v62, %v4716_v40  ;;  %v1310_v28 = vpop.permute.xlu1 %1309 }
 0x257   : > { %v759_v37 = vrot.slane %v291_v62, %v4717_v54  ;;  %v749_v59 = vadd.f32 %v747_v46, %v722_v36  ;;  %v750_v57 = vadd.f32 %v748_v1, %v723_v27  ;;  %v551_v18 = vadd.f32 %v3579_v51, %v3457_v45  ;;  %v295_v62 = vld [vmem:[#allocation7 + $0x13] ss:$8 sm:$0x3] }
 0x258   : > { %v552_v8 = vadd.f32 %v550_v24, %v514_v43  ;;  %v922_v39 = vadd.f32 %v920_v55, %v895_v14  ;;  %v923_v60 = vadd.f32 %v921_v30, %v896_v47  ;;  %v1313_v15 = vstv %s4026_s5  ;;  %v1308_v6 = vpop.permute.xlu0 %1307  ;;  %s1769_s5 = scalar_lea.sflag [#allocation5], %s4728_s10 }
 0x259   : > { %v1305_v12 = vsel %vm1304_vm8, %v1301_v32, %v1303_v31  ;;  %v1306_v52 = vsel %vm1304_vm8, %v1303_v31, %v1301_v32  ;;  %v1316_v25 = vstv %s4028_s3  ;;  %v955_v33 = vrot.slane %v293_v21, %v4716_v40  ;;  %s2194_s3 = scalar_lea.vmem %s4300_s4, 128 }
 0x25a   : > { %v959_v4 = vrot.slane %v293_v21, %v4717_v54  ;;  %v949_v7 = vadd.f32 %v947_v26, %v922_v39  ;;  %v950_v56 = vadd.f32 %v948_v22, %v923_v60  ;;  %v762_v45 = vmul.f32 %v755_v13, %v749_v59  ;;  %v4071_v11 = vpop.permute.xlu1 %1475  ;;  %p2195_p2 = scmp.ne.s32.totalorder %s4300_s4, %s2194_s3 }
 0x25b   : > { %v763_v51 = vmul.f32 %v759_v37, %v750_v57  ;;  %v1311_v53 = vsel %vm1304_vm8, %v1308_v6, %v1310_v28  ;;  %v1312_v34 = vsel %vm1304_vm8, %v1310_v28, %v1308_v6  ;;  %v1314_v50 = vmul.f32 %v1313_v15, %v1305_v12 }
 0x25c   : > { %v1315_v42 = vmul.f32 %v1313_v15, %v1306_v52  ;;  %v1317_v61 = vmul.f32 %v1316_v25, %v1311_v53  ;;  %v1318_v38 = vmul.f32 %v1316_v25, %v1312_v34  ;;  %v4719_v46 = vrot.slane %v4718_v63, %v4716_v40  ;;  %v4073_v27 = vpop.permute.xlu0 %1473  ;;  %p2196_p9 = pnand %p2195_p2, %p4733_p11 }
 0x25d   : > { %v4720_v41 = vrot.slane %v4718_v63, %v4717_v54  ;;  %v962_v55 = vmul.f32 %v955_v33, %v949_v7  ;;  %v963_v30 = vmul.f32 %v959_v4, %v950_v56  ;;  %v1329_v47 = vrot.slane %v295_v62, %v4716_v40  ;;  %v4722_v63 = vld [vmem:[#allocation29_spill] sm:$0xff] }
 0x25e   : > { %v564_v1 = vmul.f32 %v4719_v46, %v551_v18  ;;  %v1319_v43 = vadd.f32 %v1317_v61, %v1314_v50  ;;  %v1320_v36 = vadd.f32 %v1318_v38, %v1315_v42  ;;  %v1333_v26 = vrot.slane %v295_v62, %v4717_v54  ;;  %v1483_v13 = vpop.permute.xlu1 %1482  ;;  %p2197_p3 = pneg %p2196_p9 }
 0x25f   : > { %v565_v24 = vmul.f32 %v4720_v41, %v552_v8  ;;  %vm1425_vm9 = vcmp.lt.s32.totalorder %v2895_v16, 96  ;;  %v1434_v28 = vstv %s4083_s7  ;;  %v1437_v25 = vstv %s4085_s18  ;;  %s2323_s7 = smov [#allocation10]  }
 0x260   : > { %v764_v14 = vadd.f32 %v762_v45, %v564_v1  ;;  %v1321_v22 = vmul.f32 %v1319_v43, %v2971_v3  ;;  %v1322_v32 = vmul.f32 %v1320_v36, %v2974_v5  ;;  %v1481_v18 = vpop.permute.xlu0 %1480  ;;  %vm1450_vm10 = vcmp.lt.s32.totalorder %v2895_v16, 95  ;;  %s2198_s18 = sshll.u32 %s2323_s7, 4  ;;  %s2199_s18 = int_to_ptr.vmem [resolvable:$false] %s2198_s18 }
 0x261   : > { %v765_v31 = vadd.f32 %v763_v51, %v565_v24  ;;  %v1459_v33 = vstv %s4087_s20  ;;  %v1462_v4 = vstv %s4089_s15  ;;  %vm1477_vm11 = vcmp.lt.s32.totalorder %v2895_v16, 94  ;;  %s2200_s20 = scalar_lea.vmem %s2199_s18, 256  ;;  %p2201_p5 = scmp.lt.s32.totalorder %s4300_s4, %s2199_s18 }
 0x262   : > { %v964_v37 = vadd.f32 %v962_v55, %v764_v14  ;;  %v1323_v57 = vadd.f32 %v1321_v22, %v3620_v35  ;;  %v1324_v21 = vadd.f32 %v1322_v32, %v3622_v44  ;;  %v4091_v35 = vpop.permute.xlu1 %1623  ;;  %v1457_v56 = vsel %vm1450_vm10, %v4031_v48, %v4024_v29  ;;  %p2202_p10 = scmp.lt.s32.totalorder %s2200_s20, %s2194_s3 }
 0x263   : > { %v965_v59 = vadd.f32 %v963_v30, %v765_v31  ;;  %v1458_v6 = vsel %vm1450_vm10, %v4024_v29, %v4031_v48  ;;  %v1486_v45 = vstv %s4097_s16  ;;  %v1489_v51 = vstv %s4099_s24 }
 0x264   : > { %v1138_v8 = vadd.f32 %v3270_v0, %v964_v37  ;;  %v1336_v60 = vmul.f32 %v1329_v47, %v1323_v57  ;;  %v1337_v15 = vmul.f32 %v1333_v26, %v1324_v21  ;;  %v1432_v34 = vsel %vm1425_vm9, %v3963_v20, %v3957_v23  ;;  %v4185_v37 = vld [vmem:[#allocation7 + $0x14] ss:$8 sm:$0x3]  ;;  %p2203_p1 = por %p2202_p10, %p2201_p5 }
 0x265   : > { %v1139_v39 = vadd.f32 %v3272_v19, %v965_v59  ;;  %v4101_v19 = vpop.permute.xlu0 %1621  ;;  %v1433_v50 = vsel %vm1425_vm9, %v3957_v23, %v3963_v20  ;;  %vm1625_vm12 = vcmp.lt.s32.totalorder %v2895_v16, 80  ;;  %v1634_v42 = vstv %s4103_s0  ;;  %v4721_v20 = vld [vmem:[#allocation28_spill] sm:$0xff] }
 0x266   : > { %v4093_v44 = vadd.f32 %v1336_v60, %v1138_v8  ;;  %v4107_v12 = vpop.permute.xlu1 %1630  ;;  %v1637_v29 = vstv %s4105_s26  ;;  %v1451_v48 = vsel %vm1450_vm10, %v4011_v58, %v4001_v49  ;;  %v1452_v61 = vsel %vm1450_vm10, %v4001_v49, %v4011_v58  ;;  %p2204_p6 = pnand %p2203_p1, %p2197_p3 }
 0x267   : > { %v4095_v0 = vadd.f32 %v1337_v15, %v1139_v39  ;;  %v1484_v38 = vsel %vm1477_vm11, %v1481_v18, %v1483_v13  ;;  %v1485_v23 = vsel %vm1477_vm11, %v1483_v13, %v1481_v18  ;;  %v1426_v46 = vsel %vm1425_vm9, %v4722_v63, %v4721_v20 }
 0x268   : > { %v1427_v49 = vsel %vm1425_vm9, %v4721_v20, %v4722_v63  ;;  %v1463_v58 = vmul.f32 %v1462_v4, %v1457_v56  ;;  %v1464_v1 = vmul.f32 %v1462_v4, %v1458_v6  ;;  %v1438_v24 = vmul.f32 %v1437_v25, %v1432_v34 }
 0x269   : > { %v4109_v52 = vpop.permute.xlu0 %1628  ;;  %v1439_v62 = vmul.f32 %v1437_v25, %v1433_v50  ;;  %v1478_v55 = vsel %vm1477_vm11, %v4073_v27, %v4071_v11  ;;  %v1479_v30 = vsel %vm1477_vm11, %v4071_v11, %v4073_v27  ;;  %v1460_v36 = vmul.f32 %v1459_v33, %v1451_v48 }
 0x26a   : > { %v4122_v7 = vpop.permute.xlu1 %1648  ;;  %v1461_v14 = vmul.f32 %v1459_v33, %v1452_v61  ;;  %v1490_v31 = vmul.f32 %v1489_v51, %v1484_v38  ;;  %v1491_v47 = vmul.f32 %v1489_v51, %v1485_v23  ;;  %v1435_v26 = vmul.f32 %v1434_v28, %v1426_v46  ;;  %v4723_v61 = vld [vmem:[#allocation27_spill] sm:$0xff]  ;;  %v4724_v23 = vld [vmem:[#allocation26_spill] sm:$0xff] }
 0x26b   : > { %v1436_v22 = vmul.f32 %v1434_v28, %v1427_v49  ;;  %v1659_v32 = vstv %s4114_s30  ;;  %v1662_v13 = vstv %s4116_s6  ;;  %v1465_v59 = vadd.f32 %v1463_v58, %v1460_v36 }
 0x26c   : > { %v1466_v57 = vadd.f32 %v1464_v1, %v1461_v14  ;;  %v1487_v21 = vmul.f32 %v1486_v45, %v1478_v55  ;;  %v1488_v18 = vmul.f32 %v1486_v45, %v1479_v30  ;;  %vm1650_vm13 = vcmp.lt.s32.totalorder %v2895_v16, 79 }
 0x26d   : > { %v4134_v53 = vpop.permute.xlu0 %1646  ;;  %v1440_v27 = vadd.f32 %v1438_v24, %v1435_v26  ;;  %v1441_v8 = vadd.f32 %v1439_v62, %v1436_v22  ;;  %vm1504_vm14 = vcmp.lt.s32.totalorder %v2895_v16, 93  ;;  %v1513_v39 = vstv %s4136_s22 }
 0x26e   : > { %v1656_v41 = vpop.permute.xlu1 %1655  ;;  %v1492_v15 = vadd.f32 %v1490_v31, %v1487_v21  ;;  %v1493_v28 = vadd.f32 %v1491_v47, %v1488_v18  ;;  %v1516_v25 = vstv %s4149_s29  ;;  %v1529_v33 = vrot.slane %v4185_v37, %v4716_v40 }
 0x26f   : > { %v1533_v4 = vrot.slane %v4185_v37, %v4717_v54  ;;  %vm1677_vm15 = vcmp.lt.s32.totalorder %v2895_v16, 78  ;;  %v1686_v56 = vstv %s4163_s2  ;;  %v1689_v6 = vstv %s4165_s27 }
 0x270   : > { %v1467_v45 = vmul.f32 %v1465_v59, %v2943_v2  ;;  %v1468_v51 = vmul.f32 %v1466_v57, %v2946_v10  ;;  %v1442_v38 = vadd.f32 %v1440_v27, %v4723_v61  ;;  %v1443_v20 = vadd.f32 %v1441_v8, %v4724_v23 }
 0x271   : > { %v1654_v43 = vpop.permute.xlu0 %1653  ;;  %v1626_v63 = vsel %vm1625_vm12, %v4101_v19, %v4091_v35  ;;  %v1627_v46 = vsel %vm1625_vm12, %v4091_v35, %v4101_v19  ;;  %v1494_v58 = vmul.f32 %v1492_v15, %v2957_v9  ;;  %v1495_v1 = vmul.f32 %v1493_v28, %v2960_v17 }
 0x272   : > { %v1503_v11 = vpop.permute.xlu1 %1502  ;;  %v1469_v31 = vadd.f32 %v1467_v45, %v1442_v38  ;;  %v1470_v47 = vadd.f32 %v1468_v51, %v1443_v20  ;;  %v1632_v35 = vsel %vm1625_vm12, %v4109_v52, %v4107_v12  ;;  %v1633_v19 = vsel %vm1625_vm12, %v4107_v12, %v4109_v52 }
 0x273   : > { %v1657_v22 = vsel %vm1650_vm13, %v1654_v43, %v1656_v41  ;;  %v1658_v37 = vsel %vm1650_vm13, %v1656_v41, %v1654_v43  ;;  %vm1704_vm0 = vcmp.lt.s32.totalorder %v2895_v16, 77  ;;  %v1635_v27 = vmul.f32 %v1634_v42, %v1626_v63 }
 0x274   : > { %v1496_v18 = vadd.f32 %v1494_v58, %v1469_v31  ;;  %v1636_v12 = vmul.f32 %v1634_v42, %v1627_v46  ;;  %v1651_v52 = vsel %vm1650_vm13, %v4134_v53, %v4122_v7  ;;  %v1652_v41 = vsel %vm1650_vm13, %v4122_v7, %v4134_v53 }
 0x275   : > { %v1501_v60 = vpop.permute.xlu0 %1500  ;;  %v1639_v42 = vmul.f32 %v1637_v29, %v1633_v19  ;;  %v1664_v15 = vmul.f32 %v1662_v13, %v1658_v37  ;;  %v1716_v31 = vstv %s4253_s12 }
 0x276   : > { %v1505_v34 = vsel %vm1504_vm14, %v1501_v60, %v1503_v11  ;;  %v1506_v50 = vsel %vm1504_vm14, %v1503_v11, %v1501_v60  ;;  %v1510_v48 = vpop.permute.xlu1 %1509  ;;  %v1497_v11 = vadd.f32 %v1495_v1, %v1470_v47  ;;  %v1663_v60 = vmul.f32 %v1662_v13, %v1657_v22 }
 0x277   : > { %v1514_v55 = vmul.f32 %v1513_v39, %v1505_v34  ;;  %v1515_v30 = vmul.f32 %v1513_v39, %v1506_v50  ;;  %v1638_v39 = vmul.f32 %v1637_v29, %v1632_v35  ;;  %v1660_v34 = vmul.f32 %v1659_v32, %v1651_v52  ;;  %v4726_v35 = vld [vmem:[#allocation30_spill] sm:$0xff] }
 0x278   : > { %v1661_v29 = vmul.f32 %v1659_v32, %v1652_v41  ;;  %v1641_v63 = vadd.f32 %v1639_v42, %v1636_v12 }
 0x279   : > { %v1508_v49 = vpop.permute.xlu0 %1507  ;;  %v1640_v20 = vadd.f32 %v1638_v39, %v1635_v27  ;;  %v1665_v1 = vadd.f32 %v1663_v60, %v1660_v34 }
 0x27a   : > { %v1511_v24 = vsel %vm1504_vm14, %v1508_v49, %v1510_v48  ;;  %v1512_v62 = vsel %vm1504_vm14, %v1510_v48, %v1508_v49  ;;  %v1676_v26 = vpop.permute.xlu1 %1675  ;;  %v1643_v19 = vadd.f32 %v1641_v63, %v4726_v35 }
 0x27b   : > { %v1517_v36 = vmul.f32 %v1516_v25, %v1511_v24  ;;  %v1518_v14 = vmul.f32 %v1516_v25, %v1512_v62  ;;  %v1666_v24 = vadd.f32 %v1664_v15, %v1661_v29 }
 0x27d   : > { %v1519_v59 = vadd.f32 %v1517_v36, %v1514_v55  ;;  %v1520_v57 = vadd.f32 %v1518_v14, %v1515_v30  ;;  %v1674_v21 = vpop.permute.xlu0 %1673 }
 0x27e   : > { %v1683_v28 = vpop.permute.xlu1 %1682  ;;  %v1678_v7 = vsel %vm1677_vm15, %v1674_v21, %v1676_v26  ;;  %v1679_v53 = vsel %vm1677_vm15, %v1676_v26, %v1674_v21 }
 0x27f   : > { %v1521_v43 = vmul.f32 %v1519_v59, %v2971_v3  ;;  %v1522_v8 = vmul.f32 %v1520_v57, %v2974_v5  ;;  %v1687_v46 = vmul.f32 %v1686_v56, %v1678_v7  ;;  %v1688_v49 = vmul.f32 %v1686_v56, %v1679_v53  ;;  %v4725_v56 = vld [vmem:[#allocation31_spill] sm:$0xff] }
 0x280   : > { %v1642_v47 = vadd.f32 %v1640_v20, %v4725_v56 }
 0x281   : > { %v1523_v25 = vadd.f32 %v1521_v43, %v1496_v18  ;;  %v1524_v45 = vadd.f32 %v1522_v8, %v1497_v11  ;;  %v1681_v51 = vpop.permute.xlu0 %1680  ;;  %v299_v11 = vld [vmem:[#allocation7 + $0x15] ss:$8 sm:$0x3] }
 0x282   : > { %v1684_v13 = vsel %vm1677_vm15, %v1681_v51, %v1683_v28  ;;  %v1685_v50 = vsel %vm1677_vm15, %v1683_v28, %v1681_v51  ;;  %v1703_v58 = vpop.permute.xlu1 %1702 }
 0x283   : > { %v1536_v48 = vmul.f32 %v1529_v33, %v1523_v25  ;;  %v1537_v61 = vmul.f32 %v1533_v4, %v1524_v45  ;;  %v1690_v38 = vmul.f32 %v1689_v6, %v1684_v13  ;;  %v1691_v23 = vmul.f32 %v1689_v6, %v1685_v50 }
 0x284   : > { %v1713_v33 = vstv %s4251_s21  ;;  %v1741_v25 = vstv %s1740_s19 }
 0x285   : > { %v1538_v32 = vadd.f32 %v1536_v48, %v4093_v44  ;;  %v1539_v62 = vadd.f32 %v1537_v61, %v4095_v0  ;;  %v1701_v55 = vpop.permute.xlu0 %1700  ;;  %v1692_v30 = vadd.f32 %v1690_v38, %v1687_v46  ;;  %v1693_v36 = vadd.f32 %v1691_v23, %v1688_v49  ;;  %v2120_v46 = vld [vmem:[%s4729_s8] sm:$0xff] }
 0x286   : > { %v1705_v4 = vsel %vm1704_vm0, %v1701_v55, %v1703_v58  ;;  %v1706_v6 = vsel %vm1704_vm0, %v1703_v58, %v1701_v55  ;;  %v1710_v14 = vpop.permute.xlu1 %1709  ;;  %v1667_v44 = vmul.f32 %v1665_v1, %v2943_v2  ;;  %v1668_v0 = vmul.f32 %v1666_v24, %v2946_v10 }
 0x287   : > { %v1694_v22 = vmul.f32 %v1692_v30, %v2957_v9  ;;  %v1695_v37 = vmul.f32 %v1693_v36, %v2960_v17  ;;  %v1714_v21 = vmul.f32 %v1713_v33, %v1705_v4  ;;  %v1715_v18 = vmul.f32 %v1713_v33, %v1706_v6 }
 0x288   : > { %v1669_v2 = vadd.f32 %v1667_v44, %v1642_v47  ;;  %v1670_v52 = vadd.f32 %v1668_v0, %v1643_v19  ;;  %v1729_v9 = vrot.slane %v299_v11, %v4716_v40  ;;  %v1733_v17 = vrot.slane %v299_v11, %v4717_v54 }
 0x289   : > { %v1708_v26 = vpop.permute.xlu0 %1707 }
 0x28a   : > { %v1711_v59 = vsel %vm1704_vm0, %v1708_v26, %v1710_v14  ;;  %v1712_v57 = vsel %vm1704_vm0, %v1710_v14, %v1708_v26  ;;  %v1696_v43 = vadd.f32 %v1694_v22, %v1669_v2  ;;  %v1697_v8 = vadd.f32 %v1695_v37, %v1670_v52 }
 0x28b   : > { %v1717_v27 = vmul.f32 %v1716_v31, %v1711_v59  ;;  %v1718_v12 = vmul.f32 %v1716_v31, %v1712_v57 }
 0x28d   : > { %v1719_v10 = vadd.f32 %v1717_v27, %v1714_v21  ;;  %v1720_v41 = vadd.f32 %v1718_v12, %v1715_v18 }
 0x28f   : > { %v1721_v39 = vmul.f32 %v1719_v10, %v2971_v3  ;;  %v1722_v16 = vmul.f32 %v1720_v41, %v2974_v5 }
 0x291   : > { %v1723_v42 = vadd.f32 %v1721_v39, %v1696_v43  ;;  %v1724_v60 = vadd.f32 %v1722_v16, %v1697_v8 }
 0x293   : > { %v1736_v15 = vmul.f32 %v1729_v9, %v1723_v42  ;;  %v1737_v28 = vmul.f32 %v1733_v17, %v1724_v60 }
 0x295   : > { %v1738_v45 = vadd.f32 %v1736_v15, %v1538_v32  ;;  %v1739_v7 = vadd.f32 %v1737_v28, %v1539_v62 }
 0x297   : > { %v1742_v53 = vadd.f32 %v1741_v25, %v1738_v45  ;;  %v1743_v51 = vadd.f32 %v1741_v25, %v1739_v7 }
 0x299   : > { %v1744_v34 = vsub.f32 0.0, %v1742_v53  ;;  %v1745_v29 = vsub.f32 0.0, %v1743_v51 }
 0x29b   : > { %v1746_v54 = vmul.f32 1.442695, %v1744_v34  ;;  %v1748_v13 = vmul.f32 1.442695, %v1745_v29 }
 0x29d   : > { %2112 = vpow2.f32 %v1746_v54 }
 0x29e   : > { %2114 = vpow2.f32 %v1748_v13 }
 0x2a7   : > { %v2113_v3 = vpop.eup %2112 }
 0x2a8   : > { %v2115_v5 = vpop.eup %2114  ;;  %v1750_v50 = vadd.f32 1.0, %v2113_v3 }
 0x2a9   : > { %v1751_v48 = vadd.f32 1.0, %v2115_v5 }
 0x2aa   : > { %2116 = vrcp.f32 %v1750_v50 }
 0x2ab   : > { %2118 = vrcp.f32 %v1751_v48 }
 0x2b4   : > { %v2117_v61 = vpop.eup %2116 }
 0x2b5   : > { %v2119_v38 = vpop.eup %2118  ;;  %v1757_v23 = vrot.slane %v2117_v61, %v4716_v40 }
 0x2b6   : > { %v1761_v20 = vrot.slane %v2119_v38, %v4716_v40 }
 0x2b8   : > { %v1764_v63 = vcombine.low %v1757_v23, %v1761_v20 }
 0x2ba   : > { %v1766_v49 = vmul.f32 %v2120_v46, %v1764_v63 }
 0x2bc   : > { %1767 = vst [vmem:[%s243_s25] sm:$0xff] %v1766_v49 }
 0x2bd   : > { %2207 = shalt.err (!%p2204_p6)
}
 0x2be   : > { %s2208_s15 = scalar_lea.hbm %s4298_s1, 128  ;;  %s2212_s0 = scalar_lea.hbm %s4732_s11, 256 }
 0x2bf   : > { %p2209_p13 = scmp.ne.s32.totalorder %s4298_s1, %s2208_s15  ;;  %p2213_p0 = scmp.lt.u32.totalorder %s4298_s1, %s4732_s11 }
 0x2c0   : > { %p2214_p4 = scmp.lt.u32.totalorder %s2212_s0, %s2208_s15  ;;  %p2216_p2 = scmp.lt.u32.totalorder %s2208_s15, %s4298_s1 }
 0x2c1   : > { %p2210_p7 = pnand %p2209_p13, %p4733_p11 }
 0x2c2   : > { %p2215_p8 = por %p2214_p4, %p2213_p0 }
 0x2c3   : > { %p2211_p12 = pneg %p2210_p7 }
 0x2c4   : > { %p2217_p9 = por %p2216_p2, %p2215_p8 }
 0x2c6   : > { %p2218_p3 = pnand %p2217_p9, %p2211_p12 }
 0x2c8   : > { %2221 = shalt.err (!%p2218_p3)
}
 0x2c9   : > { %2004 = dma.vmem_to_hbm [thread:$0]  (%p4733_p11), %s4300_s4, 128, %s4298_s1, %s1769_s5  }
 0x2ca PF: > { %s4734_s6 = sld [smem:[#allocation15_spill]]  ;;  %s4735_s22 = sld [smem:[#allocation20_spill]] }
 0x2cb   : > { %s4736_s29 = sld [smem:[#allocation18_spill]] }
 0x2d0   : > { %s1795_s2 = sand.u32 1, %s4734_s6   ;;  %p4737_p5 = scmp.ne.s32.totalorder %s4735_s22, 0 }
 0x2d1   : > { %p4738_p10 = scmp.ge.s32.totalorder %s4736_s29, 2  ;;  %s1796_s27 = scalar_lea.sflag [#allocation5], %s1795_s2 }
 0x2d3   : > { %p2018_p1 = pnand %p4738_p10, %p4737_p5 }
 0x2d5   : > { %2251 = dma.done.wait (!%p2018_p1), %s1796_s27, 128  }
 0x2d6   : > { %2253 = vsyncadd (!%p2018_p1), %s1796_s27, 4294967168  ;;  %s4739_s20 = sld [smem:[#allocation21_spill]]  ;;  %s4740_s17 = sld [smem:[#allocation16_spill]] }
 0x2d7   : > { %s4741_s18 = sld [smem:[#allocation17_spill]]  ;;  %s4742_s19 = sld [smem:[#allocation23_spill]] }
 0x2dc   : > { %p20_p6 = scmp.ge.s32.totalorder %s4739_s20, 4  }
 0x2de   :  { %22 = sbr.rel (!%p20_p6) target bundleno = 13 (0xd), region = 102 }
 0x2e5   :  { %1801 = vsyncpa [#allocation4], 1 }
 0x2e6   :  { %1803 = vsyncpa [#allocation4 + $0x1], 1 }
 0x2e7   :  { %1804 = vsyncpa [#allocation9], 1 }
 0x2e8   :  { %1806 = vsyncpa [#allocation9 + $0x1], 1 }
 0x2e9   :  { %1807 = vsyncpa [#allocation5], 1 }
 0x2ea   :  { %1809 = vsyncpa [#allocation5 + $0x1], 1 }
 0x2eb   :  { %1810 = vsyncpa [#allocation6], 1 }
 0x2ec   :  { %1812 = vsyncpa [#allocation6 + $0x1], 1 }

</bundles_post_ra>
